<compile_context>
chip_gen: v6e
topology: v6e:2x2x1
jax: 0.10.0
libtpu: 0.0.40
codegen_flags: <defaults>
</compile_context>

<pallas_src>
import math
from functools import partial

import jax
import jax.numpy as jnp
from jax import lax
from jax.experimental import pallas as pl
from jax.experimental.pallas import tpu as pltpu


# ----------------------------------------------------------------------------
# Pallas kernel
#   rows   = tile_b * H   (ordered head-major, edge-minor inside a tile)
#   lanes  = E * 2S       for the sample slabs (e-major, then [src|dst], then s)
#   lanes  = 2S           for the per-sample scalar slabs
# ----------------------------------------------------------------------------
def _mad_edge_kernel(x0_ref,      # (R, E*2S) gathered negative-sample embeddings
                     gt_ref,      # (R, E*2S) grads broadcast per sample
                     x1t_ref,     # (R, E*2S) normalized query embedding per sample
                     adj2_ref,    # (R, 2S)   lbl*adj + <x1, g>  (logit base)
                     bdwt_ref,    # (E*2S, E*2S) kron(W.T, I_2S)
                     btile_ref,   # (1, E*2S)    bias, each element repeated 2S times
                     out_ref,     # (tile_b, 128)
                     *, num_sentinals, sentinal_dist, emb_dim, num_heads,
                     tile_b, two_s):
    x0 = x0_ref[...]
    gt = gt_ref[...]
    x1t = x1t_ref[...]

    # Projection of all 2S samples of all rows in one well-fed MXU matmul.
    proj = jnp.dot(x0, bdwt_ref[...],
                   preferred_element_type=jnp.float32) + btile_ref[...]

    # Lane-dense elementwise products (full 128-lane utilization).
    pg = x0 * gt          # -> grad contribution      <x0_j, g>
    pn = x1t * proj       # -> cosine numerator       <x1/||x1||, W x0_j + b>
    pq = proj * proj      # -> ||W x0_j + b||^2

    # Exact segmented reduction over the embedding dim: E static lane windows
    # of width 2S (offsets are multiples of 2S), summed on the VPU.
    def group_sum(v):
        acc = v[:, 0:two_s]
        for e in range(1, emb_dim):
            acc = acc + v[:, e * two_s:(e + 1) * two_s]
        return acc

    a = group_sum(pg)         # (R, 2S)
    num = group_sum(pn)       # (R, 2S)
    q = group_sum(pq)         # (R, 2S)

    # inner distance (EUP rsqrt instead of sqrt + divide)
    inner = -num * lax.rsqrt(q)               # (R, 2S)
    logits = adj2_ref[...] - a                # (R, 2S)

    # softmin over [2S distances | num_sentinals sentinels], keep first 2S
    neg = -inner
    m = jnp.max(neg, axis=-1, keepdims=True)  # (R, 1)
    if num_sentinals > 0:
        m = jnp.maximum(m, jnp.float32(-sentinal_dist))
    e_w = jnp.exp(neg - m)
    denom = (jnp.sum(e_w, axis=-1, keepdims=True) +
             jnp.float32(num_sentinals) * jnp.exp(jnp.float32(-sentinal_dist) - m))
    # exact divide (approx reciprocal would break the 1e-5 reference parity)
    z = (e_w * logits) / denom                # (R, 2S) weighted logits terms

    # mean over heads: rows inside the tile are head-major, edge-minor, so the
    # head reduction is a sum of `num_heads` aligned (tile_b, 2S) row bands.
    acc = z[0:tile_b, :]
    for h in range(1, num_heads):
        acc = acc + z[h * tile_b:(h + 1) * tile_b, :]
    wl = jnp.sum(acc, axis=-1, keepdims=True) * jnp.float32(1.0 / num_heads)

    # lane-dense (unmasked) store; wrapper reads lane 0
    out_ref[...] = jnp.broadcast_to(jax.nn.sigmoid(wl), out_ref.shape)


# ----------------------------------------------------------------------------
# Wrapper: gathers / sampling / slab packing (XLA glue) + pallas_call
# ----------------------------------------------------------------------------
def mad_model_forward(params, edges, sample_key, *, num_samples=16,
                      num_sentinals=16, sentinal_dist=1.0, tile_b=8):
    pos, grads, adj_pm1 = params["pos_embs"], params["grad_embs"], params["adj_pm1"]
    W_w, W_b, lbl_w = params["W_w"], params["W_b"], params["lbl_w"]
    N, H, E = pos.shape
    B = edges.shape[1]
    S = num_samples
    two_s = 2 * S
    L = E * two_s

    if B % tile_b != 0 or tile_b % 8 != 0:
        tile_b = B                       # single-tile fallback for odd sizes
    num_tiles = B // tile_b
    tile_r = tile_b * H

    src, dst = edges[0], edges[1]
    heads = jnp.arange(H, dtype=jnp.int32)

    pos_src, pos_dst = pos[src], pos[dst]            # (B,H,E)
    grads_src, grads_dst = grads[dst], grads[src]    # (B,H,E) (swapped, as in module)

    # training-mode negative sampling (torch.randint equivalent)
    k1, k2 = jax.random.split(sample_key)
    src0 = jax.random.randint(k1, (B, H, S), 0, N, dtype=jnp.int32)
    dst0 = jax.random.randint(k2, (B, H, S), 0, N, dtype=jnp.int32)
    pos_src0 = pos[src0, heads[None, :, None]]       # (B,H,S,E)
    pos_dst0 = pos[dst0, heads[None, :, None]]

    lbl = lbl_w[0, 0]
    adj_src = adj_pm1[src0, dst[:, None, None]]      # (B,H,S)
    adj_dst = adj_pm1[src[:, None, None], dst0]
    sg_src = jnp.sum(pos_src * grads_src, axis=-1, keepdims=True)   # <x1, g>
    sg_dst = jnp.sum(pos_dst * grads_dst, axis=-1, keepdims=True)

    inv_src = lax.rsqrt(jnp.sum(pos_src * pos_src, axis=-1, keepdims=True))
    inv_dst = lax.rsqrt(jnp.sum(pos_dst * pos_dst, axis=-1, keepdims=True))

    def bcast(v):                                   # (B,H,E) -> (B,H,S,E)
        return jnp.broadcast_to(v[:, :, None, :], (B, H, S, E))

    def lanes_emajor(a):                            # (B,H,2,S,E) -> (B,H,L)
        return jnp.transpose(a, (0, 1, 4, 2, 3)).reshape(B, H, L)

    def rows(a):                                    # (B,H,lanes) -> (R, lanes)
        ln = a.shape[-1]
        a = a.reshape(num_tiles, tile_b, H, ln)
        a = jnp.transpose(a, (0, 2, 1, 3))          # tile, head, edge-in-tile
        return a.reshape(num_tiles * H * tile_b, ln)

    x0 = rows(lanes_emajor(jnp.stack([pos_src0, pos_dst0], axis=2)))
    gt = rows(lanes_emajor(jnp.stack([bcast(grads_src), bcast(grads_dst)], axis=2)))
    x1t = rows(lanes_emajor(jnp.stack([bcast(pos_src * inv_src),
                                       bcast(pos_dst * inv_dst)], axis=2)))
    adj2 = rows(jnp.concatenate([lbl * adj_src + sg_src,
                                 lbl * adj_dst + sg_dst], axis=2))

    # W pre-arranged for the packed layout (no in-kernel transpose/reshape).
    bdwt = jnp.kron(W_w.T, jnp.eye(two_s, dtype=jnp.float32))        # (L, L)
    btile = jnp.repeat(W_b.reshape(-1), two_s)[None, :]              # (1, L)

    kernel = partial(_mad_edge_kernel,
                     num_sentinals=int(num_sentinals),
                     sentinal_dist=float(sentinal_dist),
                     emb_dim=E, num_heads=H, tile_b=tile_b, two_s=two_s)

    out = pl.pallas_call(
        kernel,
        out_shape=jax.ShapeDtypeStruct((B, 128), jnp.float32),
        grid=(num_tiles,),
        in_specs=[
            pl.BlockSpec((tile_r, L), lambda i: (i, 0)),      # x0
            pl.BlockSpec((tile_r, L), lambda i: (i, 0)),      # gt
            pl.BlockSpec((tile_r, L), lambda i: (i, 0)),      # x1t
            pl.BlockSpec((tile_r, two_s), lambda i: (i, 0)),  # adj2
            pl.BlockSpec((L, L), lambda i: (0, 0)),           # kron(W.T, I)
            pl.BlockSpec((1, L), lambda i: (0, 0)),           # tiled bias
        ],
        out_specs=pl.BlockSpec((tile_b, 128), lambda i: (i, 0)),
        compiler_params=pltpu.CompilerParams(
            dimension_semantics=("parallel",)),
    )(x0, gt, x1t, adj2, bdwt, btile)

    return out[:, 0]                                  # (B,)


# ----------------------------------------------------------------------------
# Pure-JAX reference (mirrors the PyTorch forward) for correctness check
# ----------------------------------------------------------------------------
def _reference_forward(params, edges, sample_key, *, num_samples=16,
                       num_sentinals=16, sentinal_dist=1.0):
    pos, grads, adj_pm1 = params["pos_embs"], params["grad_embs"], params["adj_pm1"]
    W_w, W_b, lbl_w = params["W_w"], params["W_b"], params["lbl_w"]
    N, H, E = pos.shape
    B = edges.shape[1]
    S = num_samples
    src, dst = edges[0], edges[1]
    heads = jnp.arange(H, dtype=jnp.int32)
    pos_src, pos_dst = pos[src], pos[dst]
    k1, k2 = jax.random.split(sample_key)
    src0 = jax.random.randint(k1, (B, H, S), 0, N, dtype=jnp.int32)
    dst0 = jax.random.randint(k2, (B, H, S), 0, N, dtype=jnp.int32)
    pos_src0 = pos[src0, heads[None, :, None]]
    pos_dst0 = pos[dst0, heads[None, :, None]]
    src_dist = pos_src[:, :, None, :] - pos_src0
    dst_dist = pos_dst[:, :, None, :] - pos_dst0
    grads_src, grads_dst = grads[dst], grads[src]
    src_contrib = jnp.sum(src_dist * grads_src[:, :, None, :], axis=-1)
    dst_contrib = jnp.sum(dst_dist * grads_dst[:, :, None, :], axis=-1)
    src_logits = lbl_w[0, 0] * adj_pm1[src0, dst[:, None, None]] + src_contrib
    dst_logits = lbl_w[0, 0] * adj_pm1[src[:, None, None], dst0] + dst_contrib
    logits = jnp.concatenate([src_logits, dst_logits], axis=2)
    ps0p = pos_src0 @ W_w.T + W_b[0]
    pd0p = pos_dst0 @ W_w.T + W_b[0]
    inner_src = -jnp.sum(pos_src[:, :, None, :] * ps0p, axis=-1) / (
        jnp.linalg.norm(pos_src, axis=-1, keepdims=True) * jnp.linalg.norm(ps0p, axis=-1))
    inner_dst = -jnp.sum(pos_dst[:, :, None, :] * pd0p, axis=-1) / (
        jnp.linalg.norm(pos_dst, axis=-1, keepdims=True) * jnp.linalg.norm(pd0p, axis=-1))
    distance = jnp.concatenate([inner_src, inner_dst], axis=2)
    sent = jnp.full((B, H, num_sentinals), sentinal_dist, jnp.float32)
    norm_sent = jnp.concatenate([distance, sent], axis=2)
    logit_weight = jax.nn.softmax(-norm_sent, axis=2)[:, :, :2 * S]
    weighed = jnp.sum(logit_weight * logits, axis=2)
    return jax.nn.sigmoid(jnp.mean(weighed, axis=1))


# ----------------------------------------------------------------------------
if __name__ == "__main__":
    # MAD_SAGE predictor shapes: num_heads=12, mad_size (embedding_dim)=12,
    # num_samples=16, num_sentinals=16, sentinal_dist=1.0; small N/B for test.
    N = 64      # num_nodes
    H = 12      # num_heads
    E = 12      # embedding_dim (mad_size)
    B = 16      # batch of edges  (grid of 2 tiles with tile_b=8)
    S = 16      # num_samples
    NS = 16     # num_sentinals
    SD = 1.0    # sentinal_dist

    root = jax.random.PRNGKey(0)
    k = jax.random.split(root, 8)

    bound = math.sqrt(6.0 / (H * E + N * E))
    pos_embs = jax.random.uniform(k[0], (N, H, E), jnp.float32, -bound, bound)
    grad_embs = jax.random.uniform(k[1], (N, H, E), jnp.float32, -bound, bound)

    wb = 1.0 / math.sqrt(E)
    W_w = jax.random.uniform(k[2], (E, E), jnp.float32, -wb, wb)
    W_b = jax.random.uniform(k[3], (1, E), jnp.float32, -wb, wb)

    lbl_w = jnp.ones((1, 1), jnp.float32)   # label_nn.weight forced to ones

    adj01 = (jax.random.uniform(k[4], (N, N)) < 0.2).astype(jnp.float32)
    adj01 = jnp.maximum(adj01, adj01.T)
    adj_pm1 = adj01 * 2.0 - 1.0

    edges = jnp.stack([jax.random.randint(k[5], (B,), 0, N, dtype=jnp.int32),
                       jax.random.randint(k[6], (B,), 0, N, dtype=jnp.int32)])
    sample_key = k[7]

    params = dict(pos_embs=pos_embs, grad_embs=grad_embs, adj_pm1=adj_pm1,
                  W_w=W_w, W_b=W_b, lbl_w=lbl_w)

    out = mad_model_forward(params, edges, sample_key, num_samples=S,
                            num_sentinals=NS, sentinal_dist=SD, tile_b=8)
    out = jax.block_until_ready(out)

    ref = _reference_forward(params, edges, sample_key, num_samples=S,
                             num_sentinals=NS, sentinal_dist=SD)
    ref = jax.block_until_ready(ref)

    assert out.shape == (B,), out.shape
    assert bool(jnp.all(jnp.isfinite(out)))
    assert bool(jnp.allclose(out, ref, atol=1e-5, rtol=1e-5)), (out, ref)

    print("KERNEL_OK")
</pallas_src>

<mosaic_0001>
module attributes {stable_mosaic.version = 11 : i64} {
  func.func @_mad_edge_kernel(%arg0: i32, %arg1: memref<96x384xf32, #tpu.memory_space<vmem>>, %arg2: memref<96x384xf32, #tpu.memory_space<vmem>>, %arg3: memref<96x384xf32, #tpu.memory_space<vmem>>, %arg4: memref<96x32xf32, #tpu.memory_space<vmem>>, %arg5: memref<384x384xf32, #tpu.memory_space<vmem>>, %arg6: memref<1x384xf32, #tpu.memory_space<vmem>>, %arg7: memref<8x128xf32, #tpu.memory_space<vmem>>) attributes {dimension_semantics = [#tpu.dimension_semantics<parallel>], iteration_bounds = array<i64: 2>, scalar_prefetch = 0 : i64, scratch_operands = 0 : i64, tpu.core_type = #tpu.core_type<tc>, window_params = [{transform_indices = @transform_0, window_bounds = array<i64: 96, 384>}, {transform_indices = @transform_1, window_bounds = array<i64: 96, 384>}, {transform_indices = @transform_2, window_bounds = array<i64: 96, 384>}, {transform_indices = @transform_3, window_bounds = array<i64: 96, 32>}, {pipeline_mode = #tpu.pipeline_mode<synchronous>, transform_indices = @transform_4, window_bounds = array<i64: 384, 384>}, {pipeline_mode = #tpu.pipeline_mode<synchronous>, transform_indices = @transform_5, window_bounds = array<i64: 1, 384>}, {transform_indices = @transform_6, window_bounds = array<i64: 8, 128>}]} {
    %c0 = arith.constant 0 : index
    %c0_0 = arith.constant 0 : index
    %0 = vector.load %arg1[%c0, %c0_0] : memref<96x384xf32, #tpu.memory_space<vmem>>, vector<96x384xf32>
    %c0_1 = arith.constant 0 : index
    %c0_2 = arith.constant 0 : index
    %1 = vector.load %arg2[%c0_1, %c0_2] : memref<96x384xf32, #tpu.memory_space<vmem>>, vector<96x384xf32>
    %c0_3 = arith.constant 0 : index
    %c0_4 = arith.constant 0 : index
    %2 = vector.load %arg3[%c0_3, %c0_4] : memref<96x384xf32, #tpu.memory_space<vmem>>, vector<96x384xf32>
    %c0_5 = arith.constant 0 : index
    %c0_6 = arith.constant 0 : index
    %3 = vector.load %arg5[%c0_5, %c0_6] : memref<384x384xf32, #tpu.memory_space<vmem>>, vector<384x384xf32>
    %cst = arith.constant dense<0.000000e+00> : vector<96x384xf32>
    %4 = tpu.matmul %0, %3, %cst {dimension_numbers = #tpu.dot_dimension_numbers<[1], [0], [0], [1], [0, 0, 1, 1], [], []>} : vector<96x384xf32>, vector<384x384xf32>, vector<96x384xf32> -> vector<96x384xf32>
    %c0_7 = arith.constant 0 : index
    %c0_8 = arith.constant 0 : index
    %5 = vector.load %arg6[%c0_7, %c0_8] : memref<1x384xf32, #tpu.memory_space<vmem>>, vector<1x384xf32>
    %6 = vector.broadcast %5 : vector<1x384xf32> to vector<96x384xf32>
    %7 = arith.addf %4, %6 : vector<96x384xf32>
    %8 = arith.mulf %0, %1 : vector<96x384xf32>
    %9 = arith.mulf %2, %7 : vector<96x384xf32>
    %10 = arith.mulf %7, %7 : vector<96x384xf32>
    %11 = vector.extract_strided_slice %8 {offsets = [0, 0], sizes = [96, 32], strides = [1, 1]} : vector<96x384xf32> to vector<96x32xf32>
    %12 = vector.extract_strided_slice %8 {offsets = [0, 32], sizes = [96, 32], strides = [1, 1]} : vector<96x384xf32> to vector<96x32xf32>
    %13 = arith.addf %11, %12 : vector<96x32xf32>
    %14 = vector.extract_strided_slice %8 {offsets = [0, 64], sizes = [96, 32], strides = [1, 1]} : vector<96x384xf32> to vector<96x32xf32>
    %15 = arith.addf %13, %14 : vector<96x32xf32>
    %16 = vector.extract_strided_slice %8 {offsets = [0, 96], sizes = [96, 32], strides = [1, 1]} : vector<96x384xf32> to vector<96x32xf32>
    %17 = arith.addf %15, %16 : vector<96x32xf32>
    %18 = vector.extract_strided_slice %8 {offsets = [0, 128], sizes = [96, 32], strides = [1, 1]} : vector<96x384xf32> to vector<96x32xf32>
    %19 = arith.addf %17, %18 : vector<96x32xf32>
    %20 = vector.extract_strided_slice %8 {offsets = [0, 160], sizes = [96, 32], strides = [1, 1]} : vector<96x384xf32> to vector<96x32xf32>
    %21 = arith.addf %19, %20 : vector<96x32xf32>
    %22 = vector.extract_strided_slice %8 {offsets = [0, 192], sizes = [96, 32], strides = [1, 1]} : vector<96x384xf32> to vector<96x32xf32>
    %23 = arith.addf %21, %22 : vector<96x32xf32>
    %24 = vector.extract_strided_slice %8 {offsets = [0, 224], sizes = [96, 32], strides = [1, 1]} : vector<96x384xf32> to vector<96x32xf32>
    %25 = arith.addf %23, %24 : vector<96x32xf32>
    %26 = vector.extract_strided_slice %8 {offsets = [0, 256], sizes = [96, 32], strides = [1, 1]} : vector<96x384xf32> to vector<96x32xf32>
    %27 = arith.addf %25, %26 : vector<96x32xf32>
    %28 = vector.extract_strided_slice %8 {offsets = [0, 288], sizes = [96, 32], strides = [1, 1]} : vector<96x384xf32> to vector<96x32xf32>
    %29 = arith.addf %27, %28 : vector<96x32xf32>
    %30 = vector.extract_strided_slice %8 {offsets = [0, 320], sizes = [96, 32], strides = [1, 1]} : vector<96x384xf32> to vector<96x32xf32>
    %31 = arith.addf %29, %30 : vector<96x32xf32>
    %32 = vector.extract_strided_slice %8 {offsets = [0, 352], sizes = [96, 32], strides = [1, 1]} : vector<96x384xf32> to vector<96x32xf32>
    %33 = arith.addf %31, %32 : vector<96x32xf32>
    %34 = vector.extract_strided_slice %9 {offsets = [0, 0], sizes = [96, 32], strides = [1, 1]} : vector<96x384xf32> to vector<96x32xf32>
    %35 = vector.extract_strided_slice %9 {offsets = [0, 32], sizes = [96, 32], strides = [1, 1]} : vector<96x384xf32> to vector<96x32xf32>
    %36 = arith.addf %34, %35 : vector<96x32xf32>
    %37 = vector.extract_strided_slice %9 {offsets = [0, 64], sizes = [96, 32], strides = [1, 1]} : vector<96x384xf32> to vector<96x32xf32>
    %38 = arith.addf %36, %37 : vector<96x32xf32>
    %39 = vector.extract_strided_slice %9 {offsets = [0, 96], sizes = [96, 32], strides = [1, 1]} : vector<96x384xf32> to vector<96x32xf32>
    %40 = arith.addf %38, %39 : vector<96x32xf32>
    %41 = vector.extract_strided_slice %9 {offsets = [0, 128], sizes = [96, 32], strides = [1, 1]} : vector<96x384xf32> to vector<96x32xf32>
    %42 = arith.addf %40, %41 : vector<96x32xf32>
    %43 = vector.extract_strided_slice %9 {offsets = [0, 160], sizes = [96, 32], strides = [1, 1]} : vector<96x384xf32> to vector<96x32xf32>
    %44 = arith.addf %42, %43 : vector<96x32xf32>
    %45 = vector.extract_strided_slice %9 {offsets = [0, 192], sizes = [96, 32], strides = [1, 1]} : vector<96x384xf32> to vector<96x32xf32>
    %46 = arith.addf %44, %45 : vector<96x32xf32>
    %47 = vector.extract_strided_slice %9 {offsets = [0, 224], sizes = [96, 32], strides = [1, 1]} : vector<96x384xf32> to vector<96x32xf32>
    %48 = arith.addf %46, %47 : vector<96x32xf32>
    %49 = vector.extract_strided_slice %9 {offsets = [0, 256], sizes = [96, 32], strides = [1, 1]} : vector<96x384xf32> to vector<96x32xf32>
    %50 = arith.addf %48, %49 : vector<96x32xf32>
    %51 = vector.extract_strided_slice %9 {offsets = [0, 288], sizes = [96, 32], strides = [1, 1]} : vector<96x384xf32> to vector<96x32xf32>
    %52 = arith.addf %50, %51 : vector<96x32xf32>
    %53 = vector.extract_strided_slice %9 {offsets = [0, 320], sizes = [96, 32], strides = [1, 1]} : vector<96x384xf32> to vector<96x32xf32>
    %54 = arith.addf %52, %53 : vector<96x32xf32>
    %55 = vector.extract_strided_slice %9 {offsets = [0, 352], sizes = [96, 32], strides = [1, 1]} : vector<96x384xf32> to vector<96x32xf32>
    %56 = arith.addf %54, %55 : vector<96x32xf32>
    %57 = vector.extract_strided_slice %10 {offsets = [0, 0], sizes = [96, 32], strides = [1, 1]} : vector<96x384xf32> to vector<96x32xf32>
    %58 = vector.extract_strided_slice %10 {offsets = [0, 32], sizes = [96, 32], strides = [1, 1]} : vector<96x384xf32> to vector<96x32xf32>
    %59 = arith.addf %57, %58 : vector<96x32xf32>
    %60 = vector.extract_strided_slice %10 {offsets = [0, 64], sizes = [96, 32], strides = [1, 1]} : vector<96x384xf32> to vector<96x32xf32>
    %61 = arith.addf %59, %60 : vector<96x32xf32>
    %62 = vector.extract_strided_slice %10 {offsets = [0, 96], sizes = [96, 32], strides = [1, 1]} : vector<96x384xf32> to vector<96x32xf32>
    %63 = arith.addf %61, %62 : vector<96x32xf32>
    %64 = vector.extract_strided_slice %10 {offsets = [0, 128], sizes = [96, 32], strides = [1, 1]} : vector<96x384xf32> to vector<96x32xf32>
    %65 = arith.addf %63, %64 : vector<96x32xf32>
    %66 = vector.extract_strided_slice %10 {offsets = [0, 160], sizes = [96, 32], strides = [1, 1]} : vector<96x384xf32> to vector<96x32xf32>
    %67 = arith.addf %65, %66 : vector<96x32xf32>
    %68 = vector.extract_strided_slice %10 {offsets = [0, 192], sizes = [96, 32], strides = [1, 1]} : vector<96x384xf32> to vector<96x32xf32>
    %69 = arith.addf %67, %68 : vector<96x32xf32>
    %70 = vector.extract_strided_slice %10 {offsets = [0, 224], sizes = [96, 32], strides = [1, 1]} : vector<96x384xf32> to vector<96x32xf32>
    %71 = arith.addf %69, %70 : vector<96x32xf32>
    %72 = vector.extract_strided_slice %10 {offsets = [0, 256], sizes = [96, 32], strides = [1, 1]} : vector<96x384xf32> to vector<96x32xf32>
    %73 = arith.addf %71, %72 : vector<96x32xf32>
    %74 = vector.extract_strided_slice %10 {offsets = [0, 288], sizes = [96, 32], strides = [1, 1]} : vector<96x384xf32> to vector<96x32xf32>
    %75 = arith.addf %73, %74 : vector<96x32xf32>
    %76 = vector.extract_strided_slice %10 {offsets = [0, 320], sizes = [96, 32], strides = [1, 1]} : vector<96x384xf32> to vector<96x32xf32>
    %77 = arith.addf %75, %76 : vector<96x32xf32>
    %78 = vector.extract_strided_slice %10 {offsets = [0, 352], sizes = [96, 32], strides = [1, 1]} : vector<96x384xf32> to vector<96x32xf32>
    %79 = arith.addf %77, %78 : vector<96x32xf32>
    %cst_9 = arith.constant 0.000000e+00 : f32
    %80 = vector.broadcast %cst_9 : f32 to vector<96x32xf32>
    %81 = arith.subf %80, %56 : vector<96x32xf32>
    %82 = math.rsqrt %79 : vector<96x32xf32>
    %83 = arith.mulf %81, %82 : vector<96x32xf32>
    %c0_10 = arith.constant 0 : index
    %c0_11 = arith.constant 0 : index
    %84 = vector.load %arg4[%c0_10, %c0_11] : memref<96x32xf32, #tpu.memory_space<vmem>>, vector<96x32xf32>
    %85 = arith.subf %84, %33 : vector<96x32xf32>
    %cst_12 = arith.constant 0.000000e+00 : f32
    %86 = vector.broadcast %cst_12 : f32 to vector<96x32xf32>
    %87 = arith.subf %86, %83 : vector<96x32xf32>
    %cst_13 = arith.constant dense<0xFF800000> : vector<96xf32>
    %88 = vector.multi_reduction <maximumf>, %87, %cst_13 [1] : vector<96x32xf32> to vector<96xf32>
    %89 = vector.shape_cast %88 : vector<96xf32> to vector<96x1xf32>
    %cst_14 = arith.constant -1.000000e+00 : f32
    %90 = vector.broadcast %cst_14 : f32 to vector<96x1xf32>
    %91 = arith.maximumf %89, %90 : vector<96x1xf32>
    %92 = vector.broadcast %91 : vector<96x1xf32> to vector<96x32xf32>
    %93 = arith.subf %87, %92 : vector<96x32xf32>
    %94 = math.exp %93 : vector<96x32xf32>
    %cst_15 = arith.constant dense<0.000000e+00> : vector<96xf32>
    %95 = vector.multi_reduction <add>, %94, %cst_15 [1] : vector<96x32xf32> to vector<96xf32>
    %96 = vector.shape_cast %95 : vector<96xf32> to vector<96x1xf32>
    %cst_16 = arith.constant -1.000000e+00 : f32
    %97 = vector.broadcast %cst_16 : f32 to vector<96x1xf32>
    %98 = arith.subf %97, %91 : vector<96x1xf32>
    %99 = math.exp %98 : vector<96x1xf32>
    %cst_17 = arith.constant 1.600000e+01 : f32
    %100 = vector.broadcast %cst_17 : f32 to vector<96x1xf32>
    %101 = arith.mulf %100, %99 : vector<96x1xf32>
    %102 = arith.addf %96, %101 : vector<96x1xf32>
    %103 = arith.mulf %94, %85 : vector<96x32xf32>
    %104 = vector.broadcast %102 : vector<96x1xf32> to vector<96x32xf32>
    %105 = arith.divf %103, %104 : vector<96x32xf32>
    %106 = vector.extract_strided_slice %105 {offsets = [0, 0], sizes = [8, 32], strides = [1, 1]} : vector<96x32xf32> to vector<8x32xf32>
    %107 = vector.extract_strided_slice %105 {offsets = [8, 0], sizes = [8, 32], strides = [1, 1]} : vector<96x32xf32> to vector<8x32xf32>
    %108 = arith.addf %106, %107 : vector<8x32xf32>
    %109 = vector.extract_strided_slice %105 {offsets = [16, 0], sizes = [8, 32], strides = [1, 1]} : vector<96x32xf32> to vector<8x32xf32>
    %110 = arith.addf %108, %109 : vector<8x32xf32>
    %111 = vector.extract_strided_slice %105 {offsets = [24, 0], sizes = [8, 32], strides = [1, 1]} : vector<96x32xf32> to vector<8x32xf32>
    %112 = arith.addf %110, %111 : vector<8x32xf32>
    %113 = vector.extract_strided_slice %105 {offsets = [32, 0], sizes = [8, 32], strides = [1, 1]} : vector<96x32xf32> to vector<8x32xf32>
    %114 = arith.addf %112, %113 : vector<8x32xf32>
    %115 = vector.extract_strided_slice %105 {offsets = [40, 0], sizes = [8, 32], strides = [1, 1]} : vector<96x32xf32> to vector<8x32xf32>
    %116 = arith.addf %114, %115 : vector<8x32xf32>
    %117 = vector.extract_strided_slice %105 {offsets = [48, 0], sizes = [8, 32], strides = [1, 1]} : vector<96x32xf32> to vector<8x32xf32>
    %118 = arith.addf %116, %117 : vector<8x32xf32>
    %119 = vector.extract_strided_slice %105 {offsets = [56, 0], sizes = [8, 32], strides = [1, 1]} : vector<96x32xf32> to vector<8x32xf32>
    %120 = arith.addf %118, %119 : vector<8x32xf32>
    %121 = vector.extract_strided_slice %105 {offsets = [64, 0], sizes = [8, 32], strides = [1, 1]} : vector<96x32xf32> to vector<8x32xf32>
    %122 = arith.addf %120, %121 : vector<8x32xf32>
    %123 = vector.extract_strided_slice %105 {offsets = [72, 0], sizes = [8, 32], strides = [1, 1]} : vector<96x32xf32> to vector<8x32xf32>
    %124 = arith.addf %122, %123 : vector<8x32xf32>
    %125 = vector.extract_strided_slice %105 {offsets = [80, 0], sizes = [8, 32], strides = [1, 1]} : vector<96x32xf32> to vector<8x32xf32>
    %126 = arith.addf %124, %125 : vector<8x32xf32>
    %127 = vector.extract_strided_slice %105 {offsets = [88, 0], sizes = [8, 32], strides = [1, 1]} : vector<96x32xf32> to vector<8x32xf32>
    %128 = arith.addf %126, %127 : vector<8x32xf32>
    %cst_18 = arith.constant dense<0.000000e+00> : vector<8xf32>
    %129 = vector.multi_reduction <add>, %128, %cst_18 [1] : vector<8x32xf32> to vector<8xf32>
    %130 = vector.shape_cast %129 : vector<8xf32> to vector<8x1xf32>
    %cst_19 = arith.constant 0.0833333358 : f32
    %131 = vector.broadcast %cst_19 : f32 to vector<8x1xf32>
    %132 = arith.mulf %130, %131 : vector<8x1xf32>
    %133 = arith.negf %132 : vector<8x1xf32>
    %134 = math.exp %133 : vector<8x1xf32>
    %cst_20 = arith.constant 1.000000e+00 : f32
    %135 = vector.broadcast %cst_20 : f32 to vector<8x1xf32>
    %136 = arith.addf %135, %134 : vector<8x1xf32>
    %137 = arith.divf %135, %136 : vector<8x1xf32>
    %138 = vector.shape_cast %137 : vector<8x1xf32> to vector<8x1xf32>
    %139 = vector.broadcast %138 : vector<8x1xf32> to vector<8x128xf32>
    %c0_21 = arith.constant 0 : index
    %c0_22 = arith.constant 0 : index
    %140 = vector.load %arg7[%c0_21, %c0_22] : memref<8x128xf32, #tpu.memory_space<vmem>>, vector<8x128xf32>
    tpu.vector_store %arg7[%c0_21, %c0_22], %139 {strides = array<i32>} : memref<8x128xf32, #tpu.memory_space<vmem>>, vector<8x128xf32>,
    return
  }
  func.func @transform_0(%arg0: i32) -> (i32, i32) {
    %c0_i32 = arith.constant 0 : i32
    %c0_i32_0 = arith.constant 0 : i32
    return %arg0, %c0_i32 : i32, i32
  }
  func.func @transform_1(%arg0: i32) -> (i32, i32) {
    %c0_i32 = arith.constant 0 : i32
    %c0_i32_0 = arith.constant 0 : i32
    return %arg0, %c0_i32 : i32, i32
  }
  func.func @transform_2(%arg0: i32) -> (i32, i32) {
    %c0_i32 = arith.constant 0 : i32
    %c0_i32_0 = arith.constant 0 : i32
    return %arg0, %c0_i32 : i32, i32
  }
  func.func @transform_3(%arg0: i32) -> (i32, i32) {
    %c0_i32 = arith.constant 0 : i32
    %c0_i32_0 = arith.constant 0 : i32
    return %arg0, %c0_i32 : i32, i32
  }
  func.func @transform_4(%arg0: i32) -> (i32, i32) {
    %c0_i32 = arith.constant 0 : i32
    %c0_i32_0 = arith.constant 0 : i32
    %c0_i32_1 = arith.constant 0 : i32
    return %c0_i32, %c0_i32_0 : i32, i32
  }
  func.func @transform_5(%arg0: i32) -> (i32, i32) {
    %c0_i32 = arith.constant 0 : i32
    %c0_i32_0 = arith.constant 0 : i32
    %c0_i32_1 = arith.constant 0 : i32
    return %c0_i32, %c0_i32_0 : i32, i32
  }
  func.func @transform_6(%arg0: i32) -> (i32, i32) {
    %c0_i32 = arith.constant 0 : i32
    %c0_i32_0 = arith.constant 0 : i32
    return %arg0, %c0_i32 : i32, i32
  }
}

</mosaic_0001>

<bundles_post_ra>
// kernel: tpu_custom_call.1
= control target key start
LH: loop header
LB: loop body
LE: loop exit
PB: predicated region body
PF: predicated region fallthrough
CT: control target
= control target key end

     0   :  { %s6924_s0 = inlined_call_operand.hbm [shape: f32[192,384], index: 0, kind: input, shape index: {}]   ;;  %s6925_s1 = inlined_call_operand.hbm [shape: f32[192,384], index: 1, kind: input, shape index: {}]   ;;  %s6926_s2 = inlined_call_operand.hbm [shape: f32[192,384], index: 2, kind: input, shape index: {}]   ;;  %s6927_s3 = inlined_call_operand.vmem [shape: f32[192,32], index: 3, kind: input, shape index: {}]   ;;  %s6928_s4 = inlined_call_operand.hbm [shape: f32[384,384], index: 4, kind: input, shape index: {}]   ;;  %s6929_s5 = inlined_call_operand.vmem [shape: f32[1,384], index: 5, kind: input, shape index: {}]   ;;  %s6930_s6 = inlined_call_operand.hbm [shape: f32[16,128], index: 6, kind: output, shape index: {}]  }
   0x1   :  { %7035 = sst [smem:[#allocation321_spill]] %s6925_s1 }
   0x2   :  { %11 = vsyncpa [#allocation3], 0 }
   0x3   :  { %13 = vsyncpa [#allocation3 + $0x1], 0 }
   0x4   :  { %14 = vsyncpa [#allocation6], 0 }
   0x5   :  { %16 = vsyncpa [#allocation6 + $0x1], 0 }
   0x6   :  { %17 = vsyncpa [#allocation9], 0 }
   0x7   :  { %18 = vsyncpa [#allocation4], 0 }
   0x8   :  { %20 = vsyncpa [#allocation4 + $0x1], 0  ;;  %s3844_s21 = smov 0   ;;  %s3846_s22 = smov 0  }
   0x9   :  { %s3848_s23 = smov 0   ;;  %s3850_s24 = smov 0  }
   0xa LB: > { %7036 = sst [smem:[#allocation15_spill]] %s3792_s23  ;;  %s3865_s25 = sadd.s32 1, %s3796_s24   ;;  %s3796_s24 = sphi %s3850_s24, %s7666_s24   ;;  %s3792_s23 = sphi %s3848_s23, %s7668_s23   ;;  %s3788_s22 = sphi %s3846_s22, %s7670_s22   ;;  %s3784_s21 = sphi %s3844_s21, %s7669_s21  }
   0xb   : > { %7037 = sst [smem:[#allocation16_spill]] %s3796_s24  ;;  %s33_s26 = sadd.s32 1, %s3792_s23 }
   0xc   : > { %7038 = sst [smem:[#allocation17_spill]] %s3865_s25  ;;  %s30_s27 = ssub.s32 %s3796_s24, %s3865_s25 }
   0xd   : > { %p6931_p0 = scmp.ne.s32.totalorder %s3792_s23, %s3788_s22  ;;  %p31_p1 = scmp.eq.s32.totalorder %s30_s27, 0 }
   0xe   : > { %p41_p2 = scmp.eq.s32.totalorder %s3796_s24, 0  ;;  %p3459_p5 = scmp.lt.s32.totalorder %s3796_s24, 2 }
   0xf   : > { %s3874_s28 = scalar_select %p31_p1, %s3792_s23, %s33_s26  }
  0x10   : > { %p42_p3 = por %p41_p2, %p6931_p0  ;;  %s6936_s29 = sand.u32 1, %s3792_s23  }
  0x11   : > { %7039 = sst [smem:[#allocation18_spill]] %s3874_s28  ;;  %s3884_s30 = smul.u32 288, %s6936_s29 }
  0x12   : > { %s254_s7 = sand.u32 1, %s3796_s24   ;;  %p3887_p6 = pnand %p3459_p5, %p42_p3 }
  0x13   : > { %s3892_s9 = smul.u32 4608, %s3796_s24  ;;  %s7041_s1 = sld [smem:[#allocation321_spill]] }
  0x14   : > { %s258_s13 = scalar_lea.vmem [#allocation5], %s3884_s30  ;;  %s3903_s15 = scalar_lea.sflag [#allocation6], %s254_s7 }
  0x15   : > { %s266_s14 = sshll.u32 %s258_s13, 4  ;;  %p3909_p8 = pneg %p3887_p6  ;;  %s3901_s14 = int_to_ptr.vmem [resolvable:$true] %s266_s14 }
  0x19   : > { %s3898_s12 = scalar_lea.hbm %s7041_s1, %s3892_s9  ;;  %s3619_s20 = scalar_lea.hbm %s7041_s1, 9216 }
  0x1a   : > { %s3614_s16 = scalar_lea.hbm %s3898_s12, 4608  ;;  %p3620_p11 = scmp.lt.s32.totalorder %s3898_s12, %s7041_s1 }
  0x1b   : > { %p3615_p7 = scmp.ne.s32.totalorder %s3898_s12, %s3614_s16  ;;  %p3621_p12 = scmp.lt.s32.totalorder %s3619_s20, %s3614_s16 }
  0x1d   : > { %p3617_p9 = pnand %p3909_p8, %p3615_p7  ;;  %p3622_p13 = por %p3621_p12, %p3620_p11 }
  0x1f   : > { %p3618_p10 = pneg %p3617_p9 }
  0x21   : > { %p3623_p1 = pnand %p3622_p13, %p3618_p10 }
  0x23   : > { %3626 = shalt.err (!%p3623_p1)
}
  0x24   : > { %s3627_s7 = scalar_lea.vmem %s3901_s14, 4608  ;;  %s3798_s10 = smov [#allocation5]  }
  0x25   : > { %p3628_p2 = scmp.ne.s32.totalorder %s3901_s14, %s3627_s7  ;;  %s3632_s11 = sshll.u32 %s3798_s10, 4  ;;  %s3633_s11 = int_to_ptr.vmem [resolvable:$false] %s3632_s11 }
  0x26   : > { %s3634_s13 = scalar_lea.vmem %s3633_s11, 9216  ;;  %p3635_p7 = scmp.lt.s32.totalorder %s3901_s14, %s3633_s11 }
  0x27   : > { %p3630_p3 = pnand %p3628_p2, %p3909_p8  ;;  %p3636_p9 = scmp.lt.s32.totalorder %s3634_s13, %s3627_s7 }
  0x29   : > { %p3631_p5 = pneg %p3630_p3  ;;  %p3637_p4 = por %p3636_p9, %p3635_p7 }
  0x2b   : > { %p3638_p0 = pnand %p3637_p4, %p3631_p5 }
  0x2d   : > { %3641 = shalt.err (!%p3638_p0)
}
  0x2e   : > { %s6932_s16 = smov 384   ;;  %s6934_s18 = smov 24  }
  0x2f   : > { %3450 = dma.hbm_to_vmem [thread:$0]  (!%p3887_p6), %s3898_s12, 4608, %s3901_s14, %s3903_s15, %s6932_s16, %s6932_s16, %s6934_s18  }
  0x30   : > { %s3936_s19 = sadd.s32 4294967295, %s3796_s24   ;;  %s3227_s20 = sadd.s32 4294967294, %s3796_s24  }
  0x31   : > { %p46_p0 = scmp.ne.s32.totalorder %s3788_s22, %s3784_s21  ;;  %p6940_p4 = scmp.eq.s32.totalorder %s3936_s19, 0 }
  0x32   : > { %p190_p10 = scmp.eq.s32.totalorder %s3936_s19, 1  ;;  %p196_p11 = scmp.eq.s32.totalorder %s3227_s20, 1 }
  0x33   : > { %p3228_p12 = scmp.ge.s32.totalorder %s3796_s24, 1  ;;  %p3946_p13 = por %p6940_p4, %p46_p0 }
  0x34   : > { %p7044_p1 = scmp.ne.s32.totalorder %s3792_s23, %s3788_s22  ;;  %p3957_p3 = por %p196_p11, %p46_p0 }
  0x35   : > { %s7043_s26 = scalar_select %p3946_p13, 1, 0 }
  0x36   : > { %p3953_p2 = por %p190_p10, %p7044_p1  ;;  %p203_p5 = scmp.lt.s32.totalorder %s3796_s24, 3 }
  0x37   : > { %s7046_s14 = scalar_select %p3957_p3, 1, 0 }
  0x38   : > { %s7045_s12 = scalar_select %p3953_p2, 1, 0 }
  0x39   : > { %p3962_p7 = pnand %p3228_p12, %p203_p5  ;;  %s3801_s7 = smov [#allocation8]  }
  0x3a   : > { %s215_s10 = sshll.u32 %s3801_s7, 4  ;;  %s3974_s20 = scalar_lea.hbm %s6924_s0, %s3892_s9  ;;  %s3966_s10 = int_to_ptr.vmem [resolvable:$true] %s215_s10 }
  0x3b   : > { %s7047_s27 = scalar_select %p3962_p7, 1, 0 }
  0x3c   : > { %p3440_p9 = pneg %p3962_p7  ;;  %s236_s16 = scalar_lea.vmem [#allocation2], %s3884_s30 }
  0x3d   : > { %s244_s18 = sshll.u32 %s236_s16, 4  ;;  %s7049_s7 = sand.u32 1, %s3792_s23   ;;  %s3983_s18 = int_to_ptr.vmem [resolvable:$true] %s244_s18 }
  0x3e   : > { %p3979_p0 = pnand %p3440_p9, %p6940_p4  ;;  %s233_s1 = scalar_lea.sflag [#allocation3], %s7049_s7 }
  0x3f   : > { %s3642_s28 = scalar_lea.hbm %s3974_s20, 4608  ;;  %s3647_s25 = scalar_lea.hbm %s6924_s0, 9216 }
  0x40   : > { %s7048_s29 = scalar_select %p3979_p0, 1, 0 }
  0x41   : > { %p3643_p10 = scmp.ne.s32.totalorder %s3974_s20, %s3642_s28  ;;  %p3648_p1 = scmp.lt.s32.totalorder %s3974_s20, %s6924_s0 }
  0x42   : > { %p3649_p5 = scmp.lt.s32.totalorder %s3647_s25, %s3642_s28 }
  0x43   : > { %p3645_p11 = pnand %p3643_p10, %p3909_p8 }
  0x44   : > { %p3650_p9 = por %p3649_p5, %p3648_p1 }
  0x45   : > { %p3646_p12 = pneg %p3645_p11 }
  0x47   : > { %p3651_p4 = pnand %p3650_p9, %p3646_p12 }
  0x49   : > { %3654 = shalt.err (!%p3651_p4)
}
  0x4a   : > { %s3655_s7 = scalar_lea.vmem %s3983_s18, 4608  ;;  %s3802_s23 = smov [#allocation2]  }
  0x4b   : > { %p3656_p3 = scmp.ne.s32.totalorder %s3983_s18, %s3655_s7  ;;  %s3660_s11 = sshll.u32 %s3802_s23, 4  ;;  %s3661_s11 = int_to_ptr.vmem [resolvable:$false] %s3660_s11 }
  0x4c   : > { %s3662_s13 = scalar_lea.vmem %s3661_s11, 9216  ;;  %p3663_p2 = scmp.lt.s32.totalorder %s3983_s18, %s3661_s11 }
  0x4d   : > { %p3658_p10 = pnand %p3656_p3, %p3909_p8  ;;  %p3664_p13 = scmp.lt.s32.totalorder %s3662_s13, %s3655_s7 }
  0x4f   : > { %p3659_p11 = pneg %p3658_p10  ;;  %p3665_p7 = por %p3664_p13, %p3663_p2 }
  0x51   : > { %p3666_p0 = pnand %p3665_p7, %p3659_p11 }
  0x53   : > { %3669 = shalt.err (!%p3666_p0)
}
  0x54   : > { %s7050_s24 = smov 24   ;;  %s7051_s25 = smov 384  }
  0x55   : > { %3447 = dma.hbm_to_vmem [thread:$0]  (!%p3887_p6), %s3974_s20, 4608, %s3983_s18, %s233_s1, %s7051_s25, %s7051_s25, %s7050_s24  }
  0x56   : > { %p7052_p4 = scmp.ne.s32.totalorder %s7048_s29, 0  ;;  %s3681_s23 = scalar_lea.vmem %s3966_s10, 18432 }
  0x57   : > { %p3682_p12 = scmp.ne.s32.totalorder %s3966_s10, %s3681_s23  ;;  %p3689_p2 = scmp.lt.s32.totalorder %s3966_s10, %s3966_s10 }
  0x58   : > { %p3672_p3 = pneg %p7052_p4  ;;  %p3690_p7 = scmp.lt.s32.totalorder %s3681_s23, %s3681_s23 }
  0x5a   : > { %p3684_p1 = pnand %p3682_p12, %p3672_p3  ;;  %p3691_p0 = por %p3690_p7, %p3689_p2 }
  0x5c   : > { %p3685_p13 = pneg %p3684_p1 }
  0x5e   : > { %p3692_p5 = pnand %p3691_p0, %p3685_p13 }
  0x60   : > { %3695 = shalt.err (!%p3692_p5)
}
  0x61   : > { %3443 = dma.hbm_to_vmem [thread:$0]  (!%p7052_p4), %s6928_s4, 18432, %s3966_s10, [#allocation9], %s7051_s25, %s7051_s25, %s7050_s24  }
  0x62   : > { %s4029_s16 = scalar_lea.hbm %s6926_s2, %s3892_s9  ;;  %s280_s29 = scalar_lea.vmem [#allocation7], %s3884_s30 }
  0x63   : > { %s288_s7 = sshll.u32 %s280_s29, 4  ;;  %s3696_s11 = scalar_lea.hbm %s4029_s16, 4608  ;;  %s289_s7 = int_to_ptr.vmem [resolvable:$true] %s288_s7 }
  0x64   : > { %p3697_p9 = scmp.ne.s32.totalorder %s4029_s16, %s3696_s11  ;;  %s3701_s10 = scalar_lea.hbm %s6926_s2, 9216 }
  0x65   : > { %p3702_p4 = scmp.lt.s32.totalorder %s4029_s16, %s6926_s2  ;;  %p3703_p3 = scmp.lt.s32.totalorder %s3701_s10, %s3696_s11 }
  0x66   : > { %p3699_p10 = pnand %p3697_p9, %p3909_p8 }
  0x67   : > { %p3704_p12 = por %p3703_p3, %p3702_p4 }
  0x68   : > { %p3700_p11 = pneg %p3699_p10 }
  0x6a   : > { %p3705_p1 = pnand %p3704_p12, %p3700_p11 }
  0x6c   : > { %3708 = shalt.err (!%p3705_p1)
}
  0x6d   : > { %s3709_s30 = scalar_lea.vmem %s289_s7, 4608  ;;  %s3803_s9 = smov [#allocation7]  }
  0x6e   : > { %p3710_p13 = scmp.ne.s32.totalorder %s289_s7, %s3709_s30  ;;  %s3714_s18 = sshll.u32 %s3803_s9, 4  ;;  %s3715_s18 = int_to_ptr.vmem [resolvable:$false] %s3714_s18 }
  0x6f   : > { %s3716_s20 = scalar_lea.vmem %s3715_s18, 9216  ;;  %p3717_p0 = scmp.lt.s32.totalorder %s289_s7, %s3715_s18 }
  0x70   : > { %p3712_p2 = pnand %p3710_p13, %p3909_p8  ;;  %p3718_p5 = scmp.lt.s32.totalorder %s3716_s20, %s3709_s30 }
  0x72   : > { %p3713_p7 = pneg %p3712_p2  ;;  %p3719_p9 = por %p3718_p5, %p3717_p0 }
  0x74   : > { %p3720_p10 = pnand %p3719_p9, %p3713_p7 }
  0x76   : > { %3723 = shalt.err (!%p3720_p10)
}
  0x77   : > { %3453 = dma.hbm_to_vmem [thread:$0]  (!%p3887_p6), %s4029_s16, 4608, %s289_s7, %s3903_s15, %s7051_s25, %s7051_s25, %s7050_s24  }
  0x78   : > { %p7053_p8 = scmp.ne.s32.totalorder %s7047_s27, 0 }
  0x7a   : > { %309 = sbr.rel (%p7053_p8) target bundleno = 1465 (0x5b9), region = 44 }
  0x7f   : > { %s4055_s17 = sand.u32 1, %s3788_s22   ;;  %p7054_p11 = scmp.ne.s32.totalorder %s7043_s26, 0 }
  0x80   : > { %s3427_s29 = smul.u32 288, %s4055_s17  ;;  %s312_s11 = scalar_lea.sflag [#allocation3], %s4055_s17 }
  0x82   : > { %s4059_s13 = scalar_lea.vmem [#allocation2], %s3427_s29 }
  0x83   : > { %3767 = dma.done.wait (%p7054_p11), %s312_s11, 4608  }
  0x84   : > { %3769 = vsyncadd (%p7054_p11), %s312_s11, 4294962688  ;;  %s320_s8 = sand.u32 1, %s3936_s19   ;;  %s4066_s27 = scalar_lea.vmem [#allocation5], %s3427_s29 }
  0x85   : > { %s321_s15 = scalar_lea.sflag [#allocation6], %s320_s8 }
  0x86   : > { %3771 = dma.done.wait (%p7054_p11), %s321_s15, 9216  }
  0x87   : > { %3773 = vsyncadd (%p7054_p11), %s321_s15, 4294958080  ;;  %s4072_s24 = scalar_lea.vmem [#allocation7], %s3427_s29  ;;  %p7055_p6 = scmp.eq.s32.totalorder %s3936_s19, 0 }
  0x89   : > { %3775 = dma.done.wait (%p7055_p6), [#allocation9], 18432   ;;  %p7056_p4 = pmov %p7055_p6 }
  0x8a   : > { %v3804_v0 = vmov 0.0   ;;  %v544_v1 = vld [vmem:[#allocation8 + $0x170] sm:$0xff]  ;;  %v543_v2 = vld [vmem:[#allocation8 + $0x168] sm:$0xff]  ;;  %v541_v3 = vld [vmem:[#allocation8 + $0x158] sm:$0xff]  ;;  %s3805_s26 = smov 96   ;;  %s3806_s25 = smov 64  }
  0x8b   : > { %3777 = vsyncadd (%p7056_p4), [#allocation9], 4294948864  ;;  %860 = vmatprep.mubr.f32.mxu1 %v3804_v0  ;;  %659 = vmatprep.subr.mxu0 %v544_v1  ;;  %v4080_v4 = vld [vmem:[%s4059_s13 + $0x30] sm:$0xff]  ;;  %v4084_v6 = vld [vmem:[%s4059_s13] sm:$0xff]  ;;  %s3807_s16 = smov 32   ;;  %vm2839_vm0 = vcmask 261120  }
  0x8c   : > { %v432_v5 = vld [vmem:[%s4066_s27 + $0x30] sm:$0xff]  ;;  %660 = vmatpush1.msra.mxu0 %v543_v2  ;;  %v426_v8 = vld [vmem:[%s4066_s27] sm:$0xff]  ;;  %v537_v12 = vld [vmem:[#allocation8 + $0x138] sm:$0xff]  ;;  %s384_s10 = smul.u32 12, %s3936_s19  ;;  %s3236_s18 = sshll.u32 %s4055_s17, 3 }
  0x8d   : > { %v4087_v7 = vmul.f32 %v432_v5, %v4080_v4  ;;  %v540_v9 = vld [vmem:[#allocation8 + $0x150] sm:$0xff]  ;;  %v538_v10 = vld [vmem:[#allocation8 + $0x140] sm:$0xff]  ;;  %661 = vmatprep.subr.mxu0 %v541_v3  ;;  %v4091_v11 = vmul.f32 %v426_v8, %v4084_v6  ;;  %v535_v13 = vld [vmem:[#allocation8 + $0x128] sm:$0xff]  ;;  %s3240_s20 = sshll.u32 %s3936_s19, 7  ;;  %s380_s29 = scalar_lea.vmem [#allocation10], %s3236_s18 }
  0x8e   : > { %v4094_v14 = vld [vmem:[%s4059_s13 + $0x48] sm:$0xff]  ;;  %662 = vmatpush1.msra.mxu0 %v540_v9  ;;  %v4100_v16 = vld [vmem:[%s4059_s13 + $0x18] sm:$0xff]  ;;  %v534_v20 = vld [vmem:[#allocation8 + $0x120] sm:$0xff]  ;;  %p385_p3 = scmp.lt.s32.totalorder %s384_s10, 23  ;;  %s3092_s11 = sshll.u32 %s380_s29, 4  ;;  %s3093_s11 = int_to_ptr.vmem [resolvable:$true] %s3092_s11 }
  0x8f   : > { %7057 = vst [vmem:[#allocation19_spill] sm:$0xff] %v4087_v7  ;;  %7058 = vst [vmem:[#allocation20_spill] sm:$0xff] %v4091_v11  ;;  %1307 = vrot.lane.b32.xlu1 %v4087_v7, %s3805_s26  ;;  %v435_v15 = vld [vmem:[%s4066_s27 + $0x48] sm:$0xff]  ;;  %v429_v17 = vld [vmem:[%s4066_s27 + $0x18] sm:$0xff]  ;;  %1303 = vrot.lane.b32.xlu0 %v4091_v11, %s3805_s26  ;;  %s6887_s15 = scalar_lea.hbm %s6930_s6, %s3240_s20  ;;  %p7662_p1 = scmp.ne.s32.totalorder %s7045_s12, 0 }
  0x90   : > { %663 = vmatprep.subr.mxu0 %v538_v10  ;;  %v4106_v18 = vmul.f32 %v435_v15, %v4094_v14  ;;  %v4109_v19 = vmul.f32 %v429_v17, %v4100_v16  ;;  %v532_v21 = vld [vmem:[#allocation8 + $0x110] sm:$0xff]  ;;  %v4112_v22 = vld [vmem:[%s4059_s13 + $0x78] sm:$0xff]  ;;  %v531_v24 = vld [vmem:[#allocation8 + $0x108] sm:$0xff]  ;;  %s7672_s10 = smov (!%p385_p3, %s384_s10), 23 }
  0x91   : > { %664 = vmatpush1.msra.mxu0 %v537_v12  ;;  %v441_v23 = vld [vmem:[%s4066_s27 + $0x78] sm:$0xff]  ;;  %v4116_v25 = vld [vmem:[%s4059_s13 + $0x60] sm:$0xff]  ;;  %v528_v30 = vld [vmem:[#allocation8 + $0xf0] sm:$0xff]  ;;  %s3237_s28 = sshll.u32 %s7672_s10, 3 }
  0x92   : > { %7059 = vst [vmem:[#allocation21_spill] sm:$0xff] %v4106_v18  ;;  %7060 = vst [vmem:[#allocation22_spill] sm:$0xff] %v4109_v19  ;;  %665 = vmatprep.subr.mxu0 %v535_v13  ;;  %v438_v26 = vld [vmem:[%s4066_s27 + $0x60] sm:$0xff]  ;;  %v529_v27 = vld [vmem:[#allocation8 + $0xf8] sm:$0xff]  ;;  %v4122_v28 = vmul.f32 %v441_v23, %v4112_v22  ;;  %s6726_s9 = scalar_lea.vmem %s6927_s3, %s3237_s28 }
  0x93   : > { %1309 = vrot.lane.b32.xlu1 %v4106_v18, %s3805_s26  ;;  %666 = vmatpush1.msra.mxu0 %v534_v20  ;;  %v4127_v29 = vmul.f32 %v438_v26, %v4116_v25  ;;  %v4130_v31 = vld [vmem:[%s4059_s13 + $0xa8] sm:$0xff]  ;;  %v526_v33 = vld [vmem:[#allocation8 + $0xe0] sm:$0xff]  ;;  %v4134_v34 = vld [vmem:[%s4059_s13 + $0x90] sm:$0xff] }
  0x94   : > { %7061 = vst [vmem:[#allocation23_spill] sm:$0xff] %v4122_v28  ;;  %1305 = vrot.lane.b32.xlu0 %v4109_v19, %s3805_s26  ;;  %667 = vmatprep.subr.mxu0 %v532_v21  ;;  %v447_v32 = vld [vmem:[%s4066_s27 + $0xa8] sm:$0xff]  ;;  %v444_v35 = vld [vmem:[%s4066_s27 + $0x90] sm:$0xff]  ;;  %v525_v36 = vld [vmem:[#allocation8 + $0xd8] sm:$0xff] }
  0x95   : > { %7062 = vst [vmem:[#allocation24_spill] sm:$0xff] %v4127_v29  ;;  %668 = vmatpush1.msra.mxu0 %v531_v24  ;;  %v523_v37 = vld [vmem:[#allocation8 + $0xc8] sm:$0xff]  ;;  %v4140_v38 = vmul.f32 %v447_v32, %v4130_v31  ;;  %v4145_v39 = vmul.f32 %v444_v35, %v4134_v34  ;;  %v522_v40 = vld [vmem:[#allocation8 + $0xc0] sm:$0xff]  ;;  %v4148_v41 = vld [vmem:[%s4059_s13 + $0xd8] sm:$0xff] }
  0x96   : > { %669 = vmatprep.subr.mxu0 %v529_v27  ;;  %v453_v42 = vld [vmem:[%s4066_s27 + $0xd8] sm:$0xff]  ;;  %v520_v43 = vld [vmem:[#allocation8 + $0xb0] sm:$0xff]  ;;  %v4152_v44 = vld [vmem:[%s4059_s13 + $0xc0] sm:$0xff] }
  0x97   : > { %1313 = vrot.lane.b32.xlu1 %v4122_v28, %s3805_s26  ;;  %670 = vmatpush1.msra.mxu0 %v528_v30  ;;  %7063 = vst [vmem:[#allocation25_spill] sm:$0xff] %v4140_v38  ;;  %7064 = vst [vmem:[#allocation26_spill] sm:$0xff] %v4145_v39  ;;  %v450_v45 = vld [vmem:[%s4066_s27 + $0xc0] sm:$0xff]  ;;  %v519_v46 = vld [vmem:[#allocation8 + $0xa8] sm:$0xff]  ;;  %v4158_v48 = vmul.f32 %v453_v42, %v4148_v41 }
  0x98   : > { %1311 = vrot.lane.b32.xlu0 %v4127_v29, %s3805_s26  ;;  %671 = vmatprep.subr.mxu0 %v526_v33  ;;  %v517_v47 = vld [vmem:[#allocation8 + $0x98] sm:$0xff]  ;;  %v4163_v49 = vmul.f32 %v450_v45, %v4152_v44  ;;  %v516_v50 = vld [vmem:[#allocation8 + $0x90] sm:$0xff]  ;;  %v4166_v51 = vld [vmem:[%s4059_s13 + $0x108] sm:$0xff] }
  0x99   : > { %672 = vmatpush1.msra.mxu0 %v525_v36  ;;  %7065 = vst [vmem:[#allocation27_spill] sm:$0xff] %v4158_v48  ;;  %v459_v52 = vld [vmem:[%s4066_s27 + $0x108] sm:$0xff]  ;;  %v514_v53 = vld [vmem:[#allocation8 + $0x80] sm:$0xff]  ;;  %v4170_v54 = vld [vmem:[%s4059_s13 + $0xf0] sm:$0xff] }
  0x9a   : > { %673 = vmatprep.subr.mxu0 %v523_v37  ;;  %7066 = vst [vmem:[#allocation28_spill] sm:$0xff] %v4163_v49  ;;  %v456_v55 = vld [vmem:[%s4066_s27 + $0xf0] sm:$0xff]  ;;  %v513_v56 = vld [vmem:[#allocation8 + $0x78] sm:$0xff]  ;;  %v511_v58 = vld [vmem:[#allocation8 + $0x68] sm:$0xff]  ;;  %v4176_v59 = vmul.f32 %v459_v52, %v4166_v51 }
  0x9b   : > { %1317 = vrot.lane.b32.xlu1 %v4140_v38, %s3805_s26  ;;  %674 = vmatpush1.msra.mxu0 %v522_v40  ;;  %v640_v57 = vld [vmem:[#allocation8 + $0x470] sm:$0xff]  ;;  %v639_v60 = vld [vmem:[#allocation8 + $0x468] sm:$0xff]  ;;  %v4181_v61 = vmul.f32 %v456_v55, %v4170_v54  ;;  %v510_v62 = vld [vmem:[#allocation8 + $0x60] sm:$0xff] }
  0x9c   : > { %1315 = vrot.lane.b32.xlu0 %v4145_v39, %s3805_s26  ;;  %675 = vmatprep.subr.mxu0 %v520_v43  ;;  %7067 = vst [vmem:[#allocation29_spill] sm:$0xff] %v4176_v59  ;;  %v508_v63 = vld [vmem:[#allocation8 + $0x50] sm:$0xff]  ;;  %v507_v1 = vld [vmem:[#allocation8 + $0x48] sm:$0xff]  ;;  %v637_v2 = vld [vmem:[#allocation8 + $0x458] sm:$0xff] }
  0x9d   : > { %676 = vmatpush1.msra.mxu0 %v519_v46  ;;  %7068 = vst [vmem:[#allocation30_spill] sm:$0xff] %v4181_v61  ;;  %796 = vmatprep.subr.mxu1 %v640_v57  ;;  %v505_v3 = vld [vmem:[#allocation8 + $0x38] sm:$0xff]  ;;  %v636_v5 = vld [vmem:[#allocation8 + $0x450] sm:$0xff]  ;;  %v502_v9 = vld [vmem:[#allocation8 + $0x20] sm:$0xff] }
  0x9e   : > { %677 = vmatprep.subr.mxu0 %v517_v47  ;;  %797 = vmatpush1.msra.mxu1 %v639_v60  ;;  %v504_v8 = vld [vmem:[#allocation8 + $0x30] sm:$0xff]  ;;  %v501_v10 = vld [vmem:[#allocation8 + $0x18] sm:$0xff]  ;;  %v634_v12 = vld [vmem:[#allocation8 + $0x440] sm:$0xff] }
  0x9f   : > { %1321 = vrot.lane.b32.xlu1 %v4158_v48, %s3805_s26  ;;  %678 = vmatpush1.msra.mxu0 %v516_v50  ;;  %v499_v13 = vld [vmem:[#allocation8 + $0x8] sm:$0xff]  ;;  %v633_v15 = vld [vmem:[#allocation8 + $0x438] sm:$0xff]  ;;  %v498_v17 = vld [vmem:[#allocation8] sm:$0xff] }
  0xa0   : > { %1319 = vrot.lane.b32.xlu0 %v4163_v49, %s3805_s26  ;;  %679 = vmatprep.subr.mxu0 %v514_v53  ;;  %v592_v20 = vld [vmem:[#allocation8 + $0x2f0] sm:$0xff]  ;;  %v591_v21 = vld [vmem:[#allocation8 + $0x2e8] sm:$0xff]  ;;  %v589_v24 = vld [vmem:[#allocation8 + $0x2d8] sm:$0xff] }
  0xa1   : > { %680 = vmatpush1.msra.mxu0 %v513_v56  ;;  %798 = vmatprep.subr.mxu1 %v637_v2  ;;  %v631_v23 = vld [vmem:[#allocation8 + $0x428] sm:$0xff]  ;;  %v630_v26 = vld [vmem:[#allocation8 + $0x420] sm:$0xff]  ;;  %v588_v27 = vld [vmem:[#allocation8 + $0x2d0] sm:$0xff] }
  0xa2   : > { %681 = vmatprep.subr.mxu0 %v511_v58  ;;  %799 = vmatpush1.msra.mxu1 %v636_v5  ;;  %v586_v30 = vld [vmem:[#allocation8 + $0x2c0] sm:$0xff]  ;;  %v585_v32 = vld [vmem:[#allocation8 + $0x2b8] sm:$0xff]  ;;  %v628_v33 = vld [vmem:[#allocation8 + $0x410] sm:$0xff] }
  0xa3   : > { %1325 = vrot.lane.b32.xlu1 %v4176_v59, %s3805_s26  ;;  %682 = vmatpush1.msra.mxu0 %v510_v62  ;;  %v583_v35 = vld [vmem:[#allocation8 + $0x2a8] sm:$0xff]  ;;  %v582_v37 = vld [vmem:[#allocation8 + $0x2a0] sm:$0xff]  ;;  %v580_v40 = vld [vmem:[#allocation8 + $0x290] sm:$0xff] }
  0xa4   : > { %1323 = vrot.lane.b32.xlu0 %v4181_v61, %s3805_s26  ;;  %683 = vmatprep.subr.mxu0 %v508_v63  ;;  %v627_v36 = vld [vmem:[#allocation8 + $0x408] sm:$0xff]  ;;  %v625_v43 = vld [vmem:[#allocation8 + $0x3f8] sm:$0xff]  ;;  %v624_v46 = vld [vmem:[#allocation8 + $0x3f0] sm:$0xff] }
  0xa5   : > { %684 = vmatpush1.msra.mxu0 %v507_v1  ;;  %800 = vmatprep.subr.mxu1 %v634_v12  ;;  %v579_v42 = vld [vmem:[#allocation8 + $0x288] sm:$0xff]  ;;  %v577_v45 = vld [vmem:[#allocation8 + $0x278] sm:$0xff]  ;;  %v576_v47 = vld [vmem:[#allocation8 + $0x270] sm:$0xff] }
  0xa6   : > { %685 = vmatprep.subr.mxu0 %v505_v3  ;;  %801 = vmatpush1.msra.mxu1 %v633_v15  ;;  %v574_v50 = vld [vmem:[#allocation8 + $0x260] sm:$0xff]  ;;  %v573_v53 = vld [vmem:[#allocation8 + $0x258] sm:$0xff]  ;;  %v571_v56 = vld [vmem:[#allocation8 + $0x248] sm:$0xff] }
  0xa7   : > { %1353 = vrot.lane.b32.xlu1 %v4109_v19, %s3806_s25  ;;  %686 = vmatpush1.msra.mxu0 %v504_v8  ;;  %v622_v52 = vld [vmem:[#allocation8 + $0x3e0] sm:$0xff]  ;;  %v621_v55 = vld [vmem:[#allocation8 + $0x3d8] sm:$0xff]  ;;  %v619_v57 = vld [vmem:[#allocation8 + $0x3c8] sm:$0xff] }
  0xa8   : > { %1351 = vrot.lane.b32.xlu0 %v4091_v11, %s3806_s25  ;;  %687 = vmatprep.subr.mxu0 %v502_v9  ;;  %v570_v58 = vld [vmem:[#allocation8 + $0x240] sm:$0xff]  ;;  %v568_v62 = vld [vmem:[#allocation8 + $0x230] sm:$0xff]  ;;  %v567_v1 = vld [vmem:[#allocation8 + $0x228] sm:$0xff] }
  0xa9   : > { %688 = vmatpush1.msra.mxu0 %v501_v10  ;;  %802 = vmatprep.subr.mxu1 %v631_v23  ;;  %v618_v60 = vld [vmem:[#allocation8 + $0x3c0] sm:$0xff]  ;;  %v616_v63 = vld [vmem:[#allocation8 + $0x3b0] sm:$0xff]  ;;  %v615_v2 = vld [vmem:[#allocation8 + $0x3a8] sm:$0xff] }
  0xaa   : > { %689 = vmatprep.subr.mxu0 %v499_v13  ;;  %803 = vmatpush1.msra.mxu1 %v630_v26  ;;  %v565_v3 = vld [vmem:[#allocation8 + $0x218] sm:$0xff]  ;;  %v564_v8 = vld [vmem:[#allocation8 + $0x210] sm:$0xff]  ;;  %v562_v10 = vld [vmem:[#allocation8 + $0x200] sm:$0xff] }
  0xab   : > { %1357 = vrot.lane.b32.xlu1 %v4106_v18, %s3806_s25  ;;  %690 = vmatpush1.msra.mxu0 %v498_v17  ;;  %v613_v5 = vld [vmem:[#allocation8 + $0x398] sm:$0xff]  ;;  %v612_v9 = vld [vmem:[#allocation8 + $0x390] sm:$0xff]  ;;  %v610_v12 = vld [vmem:[#allocation8 + $0x380] sm:$0xff] }
  0xac   : > { %1355 = vrot.lane.b32.xlu0 %v4087_v7, %s3806_s25  ;;  %691 = vmatprep.subr.mxu0 %v592_v20  ;;  %v561_v13 = vld [vmem:[#allocation8 + $0x1f8] sm:$0xff]  ;;  %v559_v17 = vld [vmem:[#allocation8 + $0x1e8] sm:$0xff]  ;;  %v606_v23 = vld [vmem:[#allocation8 + $0x360] sm:$0xff] }
  0xad   : > { %692 = vmatpush2.msra.mxu0 %v591_v21  ;;  %804 = vmatprep.subr.mxu1 %v628_v33  ;;  %v609_v15 = vld [vmem:[#allocation8 + $0x378] sm:$0xff]  ;;  %v607_v20 = vld [vmem:[#allocation8 + $0x368] sm:$0xff]  ;;  %v558_v21 = vld [vmem:[#allocation8 + $0x1e0] sm:$0xff] }
  0xae   : > { %693 = vmatprep.subr.mxu0 %v589_v24  ;;  %805 = vmatpush1.msra.mxu1 %v627_v36  ;;  %v556_v24 = vld [vmem:[#allocation8 + $0x1d0] sm:$0xff]  ;;  %v601_v33 = vld [vmem:[#allocation8 + $0x338] sm:$0xff] }
  0xaf   : > { %1361 = vrot.lane.b32.xlu1 %v4122_v28, %s3806_s25  ;;  %694 = vmatpush2.msra.mxu0 %v588_v27  ;;  %v604_v26 = vld [vmem:[#allocation8 + $0x350] sm:$0xff]  ;;  %v555_v27 = vld [vmem:[#allocation8 + $0x1c8] sm:$0xff] }
  0xb0   : > { %1359 = vrot.lane.b32.xlu0 %v4127_v29, %s3806_s25  ;;  %695 = vmatprep.subr.mxu0 %v586_v30  ;;  %v603_v30 = vld [vmem:[#allocation8 + $0x348] sm:$0xff]  ;;  %v600_v36 = vld [vmem:[#allocation8 + $0x330] sm:$0xff] }
  0xb1   : > { %696 = vmatpush2.msra.mxu0 %v585_v32  ;;  %806 = vmatprep.subr.mxu1 %v625_v43  ;;  %v553_v32 = vld [vmem:[#allocation8 + $0x1b8] sm:$0xff] }
  0xb2   : > { %697 = vmatprep.subr.mxu0 %v583_v35  ;;  %807 = vmatpush1.msra.mxu1 %v624_v46  ;;  %v552_v35 = vld [vmem:[#allocation8 + $0x1b0] sm:$0xff]  ;;  %v597_v43 = vld [vmem:[#allocation8 + $0x318] sm:$0xff]  ;;  %v595_v46 = vld [vmem:[#allocation8 + $0x308] sm:$0xff] }
  0xb3   : > { %1365 = vrot.lane.b32.xlu1 %v4140_v38, %s3806_s25  ;;  %698 = vmatpush2.msra.mxu0 %v582_v37  ;;  %v550_v37 = vld [vmem:[#allocation8 + $0x1a0] sm:$0xff] }
  0xb4   : > { %1363 = vrot.lane.b32.xlu0 %v4145_v39, %s3806_s25  ;;  %699 = vmatprep.subr.mxu0 %v580_v40  ;;  %v598_v40 = vld [vmem:[#allocation8 + $0x320] sm:$0xff] }
  0xb5   : > { %700 = vmatpush2.msra.mxu0 %v579_v42  ;;  %808 = vmatprep.subr.mxu1 %v622_v52  ;;  %v549_v42 = vld [vmem:[#allocation8 + $0x198] sm:$0xff]  ;;  %v594_v52 = vld [vmem:[#allocation8 + $0x300] sm:$0xff] }
  0xb6   : > { %701 = vmatprep.subr.mxu0 %v577_v45  ;;  %809 = vmatpush1.msra.mxu1 %v621_v55  ;;  %v547_v45 = vld [vmem:[#allocation8 + $0x188] sm:$0xff]  ;;  %v4234_v55 = vld [vmem:[%s4059_s13 + $0x20] sm:$0xff] }
  0xb7   : > { %1369 = vrot.lane.b32.xlu1 %v4158_v48, %s3806_s25  ;;  %702 = vmatpush2.msra.mxu0 %v576_v47  ;;  %v546_v47 = vld [vmem:[#allocation8 + $0x180] sm:$0xff] }
  0xb8   : > { %1367 = vrot.lane.b32.xlu0 %v4163_v49, %s3806_s25  ;;  %703 = vmatprep.subr.mxu0 %v574_v50  ;;  %v4224_v50 = vld [vmem:[%s4059_s13 + $0x8] sm:$0xff] }
  0xb9   : > { %704 = vmatpush2.msra.mxu0 %v573_v53  ;;  %810 = vmatprep.subr.mxu1 %v619_v57  ;;  %v4229_v53 = vld [vmem:[%s4059_s13 + $0x10] sm:$0xff]  ;;  %v4239_v57 = vld [vmem:[#allocation8 + $0x478] sm:$0xff] }
  0xba   : > { %705 = vmatprep.subr.mxu0 %v571_v56  ;;  %811 = vmatpush1.msra.mxu1 %v618_v60  ;;  %v593_v56 = vld [vmem:[#allocation8 + $0x2f8] sm:$0xff]  ;;  %v430_v60 = vld [vmem:[%s4066_s27 + $0x20] sm:$0xff] }
  0xbb   : > { %1373 = vrot.lane.b32.xlu1 %v4176_v59, %s3806_s25  ;;  %706 = vmatpush2.msra.mxu0 %v570_v58  ;;  %v4245_v58 = vld [vmem:[%s4059_s13 + $0x28] sm:$0xff] }
  0xbc   : > { %1371 = vrot.lane.b32.xlu0 %v4181_v61, %s3806_s25  ;;  %707 = vmatprep.subr.mxu0 %v568_v62  ;;  %v427_v62 = vld [vmem:[%s4066_s27 + $0x8] sm:$0xff] }
  0xbd   : > { %812 = vmatprep.subr.mxu1 %v616_v63  ;;  %708 = vmatpush2.msra.mxu0 %v567_v1  ;;  %v4256_v63 = vld [vmem:[%s4059_s13 + $0x38] sm:$0xff] }
  0xbe   : > { %813 = vmatpush1.msra.mxu1 %v615_v2  ;;  %709 = vmatprep.subr.mxu0 %v565_v3  ;;  %v545_v1 = vld [vmem:[#allocation8 + $0x178] sm:$0xff]  ;;  %v4259_v2 = vmul.f32 %v430_v60, %v4234_v55  ;;  %v4265_v3 = vld [vmem:[%s4059_s13 + $0x40] sm:$0xff] }
  0xbf   : > { %814 = vmatprep.subr.mxu1 %v613_v5  ;;  %1401 = vrot.lane.b32.xlu1 %v4109_v19, %s3807_s16  ;;  %v4268_v5 = vmul.f32 %v427_v62, %v4224_v50  ;;  %v4370_v62 = vld [vmem:[%s4059_s13 + $0xa0] sm:$0xff] }
  0xc0   : > { %1399 = vrot.lane.b32.xlu0 %v4091_v11, %s3807_s16  ;;  %710 = vmatpush2.msra.mxu0 %v564_v8  ;;  %7069 = vst [vmem:[#allocation31_spill] sm:$0xff] %v4259_v2  ;;  %v4273_v8 = vld [vmem:[%s4059_s13 + $0x50] sm:$0xff] }
  0xc1   : > { %815 = vmatpush1.msra.mxu1 %v612_v9  ;;  %711 = vmatprep.subr.mxu0 %v562_v10  ;;  %7070 = vst [vmem:[#allocation32_spill] sm:$0xff] %v4268_v5  ;;  %v436_v9 = vld [vmem:[%s4066_s27 + $0x50] sm:$0xff]  ;;  %v433_v10 = vld [vmem:[%s4066_s27 + $0x38] sm:$0xff] }
  0xc2   : > { %816 = vmatprep.subr.mxu1 %v610_v12  ;;  %712 = vmatpush2.msra.mxu0 %v561_v13  ;;  %v590_v12 = vld [vmem:[#allocation8 + $0x2e0] sm:$0xff] }
  0xc3   : > { %817 = vmatpush1.msra.mxu1 %v609_v15  ;;  %713 = vmatprep.subr.mxu0 %v559_v17  ;;  %v4281_v13 = vld [vmem:[#allocation8 + $0x460] sm:$0xff]  ;;  %v4286_v15 = vmul.f32 %v436_v9, %v4273_v8  ;;  %v4290_v17 = vld [vmem:[%s4059_s13 + $0x58] sm:$0xff]  ;;  %v460_v9 = vld [vmem:[%s4066_s27 + $0x110] sm:$0xff] }
  0xc4   : > { %818 = vmatprep.subr.mxu1 %v607_v20  ;;  %1405 = vrot.lane.b32.xlu1 %v4106_v18, %s3807_s16  ;;  %v4298_v20 = vld [vmem:[%s4059_s13 + $0x80] sm:$0xff]  ;;  %v500_v18 = vld [vmem:[#allocation8 + $0x10] sm:$0xff] }
  0xc5   : > { %1403 = vrot.lane.b32.xlu0 %v4087_v7, %s3807_s16  ;;  %714 = vmatpush2.msra.mxu0 %v558_v21  ;;  %7071 = vst [vmem:[#allocation33_spill] sm:$0xff] %v4286_v15  ;;  %v442_v21 = vld [vmem:[%s4066_s27 + $0x80] sm:$0xff] }
  0xc6   : > { %819 = vmatpush1.msra.mxu1 %v606_v23  ;;  %715 = vmatprep.subr.mxu0 %v556_v24  ;;  %v4303_v23 = vld [vmem:[%s4059_s13 + $0x68] sm:$0xff] }
  0xc7   : > { %820 = vmatprep.subr.mxu1 %v604_v26  ;;  %716 = vmatpush2.msra.mxu0 %v555_v27  ;;  %v439_v24 = vld [vmem:[%s4066_s27 + $0x68] sm:$0xff]  ;;  %v542_v26 = vld [vmem:[#allocation8 + $0x160] sm:$0xff]  ;;  %v4312_v27 = vmul.f32 %v442_v21, %v4298_v20  ;;  %v584_v21 = vld [vmem:[#allocation8 + $0x2b0] sm:$0xff] }
  0xc8   : > { %821 = vmatpush1.msra.mxu1 %v603_v30  ;;  %717 = vmatprep.subr.mxu0 %v553_v32  ;;  %v4316_v30 = vld [vmem:[%s4059_s13 + $0x70] sm:$0xff]  ;;  %v4321_v32 = vmul.f32 %v439_v24, %v4303_v23 }
  0xc9   : > { %822 = vmatprep.subr.mxu1 %v601_v33  ;;  %1409 = vrot.lane.b32.xlu1 %v4122_v28, %s3807_s16  ;;  %7073 = vst [vmem:[#allocation35_spill] sm:$0xff] %v4312_v27  ;;  %v448_v33 = vld [vmem:[%s4066_s27 + $0xb0] sm:$0xff]  ;;  %v557_v28 = vld [vmem:[#allocation8 + $0x1d8] sm:$0xff] }
  0xca   : > { %1407 = vrot.lane.b32.xlu0 %v4127_v29, %s3807_s16  ;;  %718 = vmatpush2.msra.mxu0 %v552_v35  ;;  %7074 = vst [vmem:[#allocation36_spill] sm:$0xff] %v4321_v32  ;;  %v4329_v35 = vld [vmem:[%s4059_s13 + $0x98] sm:$0xff]  ;;  %v4389_v24 = vld [vmem:[#allocation8 + $0x430] sm:$0xff]  ;;  %v4502_v29 = vld [vmem:[#allocation8 + $0x388] sm:$0xff] }
  0xcb   : > { %823 = vmatpush1.msra.mxu1 %v600_v36  ;;  %719 = vmatprep.subr.mxu0 %v550_v37  ;;  %v445_v36 = vld [vmem:[%s4066_s27 + $0x98] sm:$0xff]  ;;  %v587_v37 = vld [vmem:[#allocation8 + $0x2c8] sm:$0xff] }
  0xcc   : > { %824 = vmatprep.subr.mxu1 %v598_v40  ;;  %720 = vmatpush2.msra.mxu0 %v549_v42  ;;  %v4335_v40 = vld [vmem:[#allocation8 + $0x448] sm:$0xff] }
  0xcd   : > { %825 = vmatpush1.msra.mxu1 %v597_v43  ;;  %721 = vmatprep.subr.mxu0 %v547_v45  ;;  %v4344_v43 = vld [vmem:[%s4059_s13 + $0x88] sm:$0xff]  ;;  %v4352_v45 = vld [vmem:[%s4059_s13 + $0xe0] sm:$0xff] }
  0xce   : > { %826 = vmatprep.subr.mxu1 %v595_v46  ;;  %1413 = vrot.lane.b32.xlu1 %v4140_v38, %s3807_s16  ;;  %v454_v46 = vld [vmem:[%s4066_s27 + $0xe0] sm:$0xff]  ;;  %v515_v38 = vld [vmem:[#allocation8 + $0x88] sm:$0xff] }
  0xcf   : > { %1411 = vrot.lane.b32.xlu0 %v4145_v39, %s3807_s16  ;;  %722 = vmatpush2.msra.mxu0 %v546_v47  ;;  %v4357_v47 = vld [vmem:[%s4059_s13 + $0xc8] sm:$0xff]  ;;  %v4366_v60 = vmul.f32 %v454_v46, %v4352_v45  ;;  %v4421_v46 = vld [vmem:[#allocation8 + $0x418] sm:$0xff] }
  0xd0   : > { %723 = vmatprep.mubr.f32.mxu0 %v4224_v50  ;;  %827 = vmatpush1.msra.mxu1 %v594_v52  ;;  %v451_v52 = vld [vmem:[%s4066_s27 + $0xc8] sm:$0xff] }
  0xd1   : > { %724 = vmatmul.mubr.f32.vlgmr.msra.gmra.mxu0 %v4084_v6  ;;  %861 = vmatmul.mubr.f32.vlgmr.msra.gmra.mxu1 %v4229_v53  ;;  %7077 = vst [vmem:[#allocation39_spill] sm:$0xff] %v4366_v60 }
  0xd2   : > { %1417 = vrot.lane.b32.xlu1 %v4158_v48, %s3807_s16  ;;  %729 = vmatprep.mubr.f32.mxu0 %v4234_v55  ;;  %v4475_v48 = vld [vmem:[#allocation8 + $0x3d0] sm:$0xff] }
  0xd3   : > { %1415 = vrot.lane.b32.xlu0 %v4163_v49, %s3807_s16  ;;  %866 = vmatprep.mubr.f32.mxu1 %v3804_v0  ;;  %v563_v49 = vld [vmem:[#allocation8 + $0x208] sm:$0xff] }
  0xd4   : > { %3243 = vmatprep.subr.mxu1 %v593_v56  ;;  %3339 = vmatprep.subr.mxu0 %v4239_v57  ;;  %v539_v56 = vld [vmem:[#allocation8 + $0x148] sm:$0xff] }
  0xd5   : > { %730 = vmatmul.mubr.f32.gmra.mxu0 %v4100_v16  ;;  %867 = vmatmul.mubr.f32.gmra.mxu1 %v4245_v58 }
  0xd6   : > { %1421 = vrot.lane.b32.xlu1 %v4176_v59, %s3807_s16  ;;  %735 = vmatprep.mubr.f32.mxu0 %v4256_v63 }
  0xd7   : > { %1419 = vrot.lane.b32.xlu0 %v4181_v61, %s3807_s16  ;;  %872 = vmatprep.mubr.f32.mxu1 %v3804_v0  ;;  %v566_v61 = vld [vmem:[#allocation8 + $0x220] sm:$0xff] }
  0xd8   : > { %3244 = vmatpush3.msra.mxu1 %v545_v1  ;;  %3340 = vmatpush3.msra.mxu0 %v4239_v57  ;;  %v4375_v1 = vmul.f32 %v451_v52, %v4357_v47  ;;  %v4427_v52 = vld [vmem:[%s4059_s13 + $0xe8] sm:$0xff] }
  0xd9   : > { %736 = vmatmul.mubr.f32.gmra.mxu0 %v4080_v4  ;;  %873 = vmatmul.mubr.f32.gmra.mxu1 %v4265_v3  ;;  %v4295_v4 = vmul.f32 %v433_v10, %v4256_v63  ;;  %v4383_v10 = vld [vmem:[%s4059_s13 + $0xf8] sm:$0xff] }
  0xda   : > { %1473 = vrot.lane.b32.xlu1 %v4259_v2, %s3805_s26  ;;  %741 = vmatprep.mubr.f32.mxu0 %v4273_v8  ;;  %7078 = vst [vmem:[#allocation40_spill] sm:$0xff] %v4375_v1 }
  0xdb   : > { %1471 = vrot.lane.b32.xlu0 %v4268_v5, %s3805_s26  ;;  %7072 = vst [vmem:[#allocation34_spill] sm:$0xff] %v4295_v4  ;;  %878 = vmatprep.mubr.f32.mxu1 %v3804_v0 }
  0xdc   : > { %3245 = vmatprep.subr.mxu1 %v590_v12  ;;  %3341 = vmatprep.subr.mxu0 %v4281_v13  ;;  %v457_v12 = vld [vmem:[%s4066_s27 + $0xf8] sm:$0xff] }
  0xdd   : > { %742 = vmatmul.mubr.f32.gmra.mxu0 %v4094_v14  ;;  %879 = vmatmul.mubr.f32.gmra.mxu1 %v4290_v17  ;;  %v4324_v14 = vld [vmem:[%s4059_s13 + $0xb0] sm:$0xff] }
  0xde   : > { %1477 = vrot.lane.b32.xlu1 %v4286_v15, %s3805_s26  ;;  %747 = vmatprep.mubr.f32.mxu0 %v4303_v23  ;;  %v4340_v42 = vmul.f32 %v448_v33, %v4324_v14  ;;  %v4398_v33 = vld [vmem:[%s4059_s13 + $0xb8] sm:$0xff] }
  0xdf   : > { %1475 = vrot.lane.b32.xlu0 %v4295_v4, %s3805_s26  ;;  %884 = vmatprep.mubr.f32.mxu1 %v3804_v0 }
  0xe0   : > { %3246 = vmatpush3.msra.mxu1 %v542_v26  ;;  %3342 = vmatpush3.msra.mxu0 %v4281_v13  ;;  %7075 = vst [vmem:[#allocation37_spill] sm:$0xff] %v4340_v42 }
  0xe1   : > { %748 = vmatmul.mubr.f32.gmra.mxu0 %v4116_v25  ;;  %885 = vmatmul.mubr.f32.gmra.mxu1 %v4316_v30  ;;  %v4349_v25 = vmul.f32 %v445_v36, %v4329_v35  ;;  %v536_v36 = vld [vmem:[#allocation8 + $0x130] sm:$0xff] }
  0xe2   : > { %1481 = vrot.lane.b32.xlu1 %v4312_v27, %s3805_s26  ;;  %753 = vmatprep.mubr.f32.mxu0 %v4298_v20 }
  0xe3   : > { %1479 = vrot.lane.b32.xlu0 %v4321_v32, %s3805_s26  ;;  %7076 = vst [vmem:[#allocation38_spill] sm:$0xff] %v4349_v25  ;;  %890 = vmatprep.mubr.f32.mxu1 %v3804_v0 }
  0xe4   : > { %3247 = vmatprep.subr.mxu1 %v587_v37  ;;  %3343 = vmatprep.subr.mxu0 %v4335_v40  ;;  %v4413_v37 = vld [vmem:[%s4059_s13 + $0xd0] sm:$0xff] }
  0xe5   : > { %754 = vmatmul.mubr.f32.gmra.mxu0 %v4112_v22  ;;  %891 = vmatmul.mubr.f32.gmra.mxu1 %v4344_v43  ;;  %v4378_v22 = vld [vmem:[%s4059_s13 + $0x110] sm:$0xff] }
  0xe6   : > { %1485 = vrot.lane.b32.xlu1 %v4340_v42, %s3805_s26  ;;  %759 = vmatprep.mubr.f32.mxu0 %v4329_v35  ;;  %v4394_v26 = vmul.f32 %v460_v9, %v4378_v22  ;;  %v4447_v9 = vld [vmem:[#allocation8 + $0x400] sm:$0xff] }
  0xe7   : > { %1483 = vrot.lane.b32.xlu0 %v4349_v25, %s3805_s26  ;;  %896 = vmatprep.mubr.f32.mxu1 %v3804_v0 }
  0xe8   : > { %3248 = vmatpush3.msra.mxu1 %v539_v56  ;;  %3344 = vmatpush3.msra.mxu0 %v4335_v40  ;;  %7079 = vst [vmem:[#allocation41_spill] sm:$0xff] %v4394_v26  ;;  %v4439_v56 = vld [vmem:[%s4059_s13 + $0x100] sm:$0xff] }
  0xe9   : > { %760 = vmatmul.mubr.f32.gmra.mxu0 %v4134_v34  ;;  %897 = vmatmul.mubr.f32.gmra.mxu1 %v4370_v62  ;;  %v4403_v34 = vmul.f32 %v457_v12, %v4383_v10  ;;  %v4453_v12 = vld [vmem:[%s4059_s13 + $0x118] sm:$0xff] }
  0xea   : > { %1489 = vrot.lane.b32.xlu1 %v4366_v60, %s3805_s26  ;;  %765 = vmatprep.mubr.f32.mxu0 %v4324_v14 }
  0xeb   : > { %1487 = vrot.lane.b32.xlu0 %v4375_v1, %s3805_s26  ;;  %7080 = vst [vmem:[#allocation42_spill] sm:$0xff] %v4403_v34  ;;  %902 = vmatprep.mubr.f32.mxu1 %v3804_v0 }
  0xec   : > { %3249 = vmatprep.subr.mxu1 %v584_v21  ;;  %3345 = vmatprep.subr.mxu0 %v4389_v24  ;;  %v530_v21 = vld [vmem:[#allocation8 + $0x100] sm:$0xff] }
  0xed   : > { %766 = vmatmul.mubr.f32.gmra.mxu0 %v4130_v31  ;;  %903 = vmatmul.mubr.f32.gmra.mxu1 %v4398_v33  ;;  %v581_v31 = vld [vmem:[#allocation8 + $0x298] sm:$0xff] }
  0xee   : > { %1493 = vrot.lane.b32.xlu1 %v4394_v26, %s3805_s26  ;;  %771 = vmatprep.mubr.f32.mxu0 %v4357_v47 }
  0xef   : > { %1491 = vrot.lane.b32.xlu0 %v4403_v34, %s3805_s26  ;;  %908 = vmatprep.mubr.f32.mxu1 %v3804_v0 }
  0xf0   : > { %3250 = vmatpush3.msra.mxu1 %v536_v36  ;;  %3346 = vmatpush3.msra.mxu0 %v4389_v24  ;;  %v527_v36 = vld [vmem:[#allocation8 + $0xe8] sm:$0xff] }
  0xf1   : > { %772 = vmatmul.mubr.f32.gmra.mxu0 %v4152_v44  ;;  %909 = vmatmul.mubr.f32.gmra.mxu1 %v4413_v37  ;;  %v533_v44 = vld [vmem:[#allocation8 + $0x118] sm:$0xff] }
  0xf2   : > { %1521 = vrot.lane.b32.xlu1 %v4259_v2, %s3806_s25  ;;  %777 = vmatprep.mubr.f32.mxu0 %v4352_v45 }
  0xf3   : > { %1519 = vrot.lane.b32.xlu0 %v4268_v5, %s3806_s25  ;;  %914 = vmatprep.mubr.f32.mxu1 %v3804_v0 }
  0xf4   : > { %3251 = vmatprep.subr.mxu1 %v581_v31  ;;  %3347 = vmatprep.subr.mxu0 %v4421_v46  ;;  %v572_v31 = vld [vmem:[#allocation8 + $0x250] sm:$0xff] }
  0xf5   : > { %778 = vmatmul.mubr.f32.gmra.mxu0 %v4148_v41  ;;  %915 = vmatmul.mubr.f32.gmra.mxu1 %v4427_v52  ;;  %v578_v41 = vld [vmem:[#allocation8 + $0x280] sm:$0xff] }
  0xf6   : > { %1525 = vrot.lane.b32.xlu1 %v4286_v15, %s3806_s25  ;;  %783 = vmatprep.mubr.f32.mxu0 %v4383_v10 }
  0xf7   : > { %1523 = vrot.lane.b32.xlu0 %v4295_v4, %s3806_s25  ;;  %920 = vmatprep.mubr.f32.mxu1 %v3804_v0 }
  0xf8   : > { %3252 = vmatpush3.msra.mxu1 %v533_v44  ;;  %3348 = vmatpush3.msra.mxu0 %v4421_v46  ;;  %v4463_v44 = vld [vmem:[#allocation8 + $0x3e8] sm:$0xff] }
  0xf9   : > { %784 = vmatmul.mubr.f32.gmra.mxu0 %v4170_v54  ;;  %921 = vmatmul.mubr.f32.gmra.mxu1 %v4439_v56  ;;  %v575_v54 = vld [vmem:[#allocation8 + $0x268] sm:$0xff] }
  0xfa   : > { %1529 = vrot.lane.b32.xlu1 %v4312_v27, %s3806_s25  ;;  %789 = vmatprep.mubr.f32.mxu0 %v4378_v22 }
  0xfb   : > { %1527 = vrot.lane.b32.xlu0 %v4321_v32, %s3806_s25  ;;  %926 = vmatprep.mubr.f32.mxu1 %v3804_v0  ;;  %v524_v0 = vld [vmem:[#allocation8 + $0xd0] sm:$0xff] }
  0xfc   : > { %3253 = vmatprep.subr.mxu1 %v578_v41  ;;  %3349 = vmatprep.subr.mxu0 %v4447_v9 }
  0xfd   : > { %790 = vmatmul.mubr.f32.gmra.mxu0 %v4166_v51  ;;  %927 = vmatmul.mubr.f32.gmra.mxu1 %v4453_v12  ;;  %v569_v51 = vld [vmem:[#allocation8 + $0x238] sm:$0xff] }
  0xfe   : > { %1533 = vrot.lane.b32.xlu1 %v4340_v42, %s3806_s25  ;;  %3254 = vmatpush3.msra.mxu1 %v530_v21  ;;  %v521_v21 = vld [vmem:[#allocation8 + $0xb8] sm:$0xff] }
  0xff   : > { %1531 = vrot.lane.b32.xlu0 %v4349_v25, %s3806_s25  ;;  %3255 = vmatprep.subr.mxu1 %v575_v54  ;;  %v518_v54 = vld [vmem:[#allocation8 + $0xa0] sm:$0xff] }
 0x100   : > { %3256 = vmatpush3.msra.mxu1 %v527_v36  ;;  %3350 = vmatpush3.msra.mxu0 %v4447_v9 }
 0x101   : > { %v4467_v41 = vpop.permute.xlu1 %1307  ;;  %v4470_v59 = vpop.permute.xlu0 %1303  ;;  %3257 = vmatprep.subr.mxu1 %v572_v31  ;;  %3351 = vmatprep.subr.mxu0 %v4463_v44 }
 0x102   : > { %7081 = vst [vmem:[#allocation43_spill] sm:$0xff] %v4467_v41  ;;  %7082 = vst [vmem:[#allocation44_spill] sm:$0xff] %v4470_v59  ;;  %1537 = vrot.lane.b32.xlu1 %v4366_v60, %s3806_s25  ;;  %3258 = vmatpush3.msra.mxu1 %v524_v0  ;;  %v4485_v0 = vld [vmem:[#allocation8 + $0x3b8] sm:$0xff] }
 0x103   : > { %1535 = vrot.lane.b32.xlu0 %v4375_v1, %s3806_s25  ;;  %3259 = vmatprep.subr.mxu1 %v569_v51  ;;  %v560_v51 = vld [vmem:[#allocation8 + $0x1f0] sm:$0xff] }
 0x104   : > { %3260 = vmatpush3.msra.mxu1 %v521_v21  ;;  %3352 = vmatpush3.msra.mxu0 %v4463_v44 }
 0x105   : > { %v4479_v36 = vpop.permute.xlu1 %1309  ;;  %3261 = vmatprep.subr.mxu1 %v566_v61  ;;  %3353 = vmatprep.subr.mxu0 %v4475_v48  ;;  %v4495_v61 = vld [vmem:[#allocation8 + $0x3a0] sm:$0xff] }
 0x106   : > { %7083 = vst [vmem:[#allocation45_spill] sm:$0xff] %v4479_v36  ;;  %v4482_v31 = vpop.permute.xlu0 %1305  ;;  %1541 = vrot.lane.b32.xlu1 %v4394_v26, %s3806_s25  ;;  %3262 = vmatpush3.msra.mxu1 %v518_v54  ;;  %v512_v54 = vld [vmem:[#allocation8 + $0x70] sm:$0xff]  ;;  %v506_v36 = vld [vmem:[#allocation8 + $0x40] sm:$0xff] }
 0x107   : > { %7084 = vst [vmem:[#allocation46_spill] sm:$0xff] %v4482_v31  ;;  %1539 = vrot.lane.b32.xlu0 %v4403_v34, %s3806_s25  ;;  %3354 = vmatpush3.msra.mxu0 %v4475_v48 }
 0x108   : > { %3263 = vmatprep.subr.mxu1 %v563_v49  ;;  %3355 = vmatprep.subr.mxu0 %v4485_v0  ;;  %v509_v49 = vld [vmem:[#allocation8 + $0x58] sm:$0xff] }
 0x109   : > { %v4492_v21 = vpop.permute.xlu1 %1313  ;;  %3264 = vmatpush3.msra.mxu1 %v515_v38  ;;  %3356 = vmatpush3.msra.mxu0 %v4485_v0 }
 0x10a   : > { %7085 = vst [vmem:[#allocation47_spill] sm:$0xff] %v4492_v21  ;;  %v4497_v39 = vpop.permute.xlu0 %1311  ;;  %1569 = vrot.lane.b32.xlu1 %v4259_v2, %s3807_s16  ;;  %3265 = vmatprep.subr.mxu1 %v560_v51  ;;  %v554_v51 = vld [vmem:[#allocation8 + $0x1c0] sm:$0xff] }
 0x10b   : > { %7086 = vst [vmem:[#allocation48_spill] sm:$0xff] %v4497_v39  ;;  %1567 = vrot.lane.b32.xlu0 %v4268_v5, %s3807_s16  ;;  %3357 = vmatprep.subr.mxu0 %v4495_v61  ;;  %v4513_v39 = vld [vmem:[#allocation8 + $0x370] sm:$0xff] }
 0x10c   : > { %3266 = vmatpush3.msra.mxu1 %v512_v54  ;;  %3358 = vmatpush3.msra.mxu0 %v4495_v61  ;;  %v551_v54 = vld [vmem:[#allocation8 + $0x1a8] sm:$0xff] }
 0x10d   : > { %v4507_v21 = vpop.permute.xlu1 %1317  ;;  %3267 = vmatprep.subr.mxu1 %v557_v28  ;;  %3359 = vmatprep.subr.mxu0 %v4502_v29  ;;  %v503_v28 = vld [vmem:[#allocation8 + $0x28] sm:$0xff] }
 0x10e   : > { %7087 = vst [vmem:[#allocation49_spill] sm:$0xff] %v4507_v21  ;;  %v4510_v38 = vpop.permute.xlu0 %1315  ;;  %1573 = vrot.lane.b32.xlu1 %v4286_v15, %s3807_s16  ;;  %3268 = vmatpush3.msra.mxu1 %v509_v49  ;;  %v4526_v15 = vld [vmem:[#allocation8 + $0x358] sm:$0xff]  ;;  %v548_v49 = vld [vmem:[#allocation8 + $0x190] sm:$0xff] }
 0x10f   : > { %7088 = vst [vmem:[#allocation50_spill] sm:$0xff] %v4510_v38  ;;  %1571 = vrot.lane.b32.xlu0 %v4295_v4, %s3807_s16  ;;  %3360 = vmatpush3.msra.mxu0 %v4502_v29 }
 0x110   : > { %3269 = vmatprep.subr.mxu1 %v554_v51  ;;  %3361 = vmatprep.subr.mxu0 %v4513_v39 }
 0x111   : > { %v4520_v21 = vpop.permute.xlu1 %1321  ;;  %3270 = vmatpush3.msra.mxu1 %v506_v36  ;;  %3362 = vmatpush3.msra.mxu0 %v4513_v39 }
 0x112   : > { %7089 = vst [vmem:[#allocation51_spill] sm:$0xff] %v4520_v21  ;;  %v4523_v38 = vpop.permute.xlu0 %1319  ;;  %1577 = vrot.lane.b32.xlu1 %v4312_v27, %s3807_s16  ;;  %3271 = vmatprep.subr.mxu1 %v551_v54  ;;  %v4538_v21 = vld [vmem:[#allocation8 + $0x340] sm:$0xff]  ;;  %v4546_v54 = vld [vmem:[#allocation8 + $0x328] sm:$0xff] }
 0x113   : > { %7090 = vst [vmem:[#allocation52_spill] sm:$0xff] %v4523_v38  ;;  %1575 = vrot.lane.b32.xlu0 %v4321_v32, %s3807_s16  ;;  %3272 = vmatpush3.msra.mxu1 %v503_v28  ;;  %v466_v32 = vld [vmem:[%s4072_s24 + $0x20] sm:$0xff] }
 0x114   : > { %3363 = vmatprep.subr.mxu0 %v4526_v15  ;;  %3273 = vmatprep.subr.mxu1 %v548_v49  ;;  %v4555_v49 = vld [vmem:[#allocation8 + $0x310] sm:$0xff] }
 0x115   : > { %v4532_v51 = vpop.permute.xlu1 %1325  ;;  %3364 = vmatpush3.msra.mxu0 %v4526_v15  ;;  %3274 = vmatpush3.msra.mxu1 %v500_v18 }
 0x116   : > { %7091 = vst [vmem:[#allocation53_spill] sm:$0xff] %v4532_v51  ;;  %v4535_v36 = vpop.permute.xlu0 %1323  ;;  %1581 = vrot.lane.b32.xlu1 %v4340_v42, %s3807_s16  ;;  %997 = vmatprep.mubr.f32.mxu1 %v4224_v50  ;;  %v428_v50 = vld [vmem:[%s4066_s27 + $0x10] sm:$0xff] }
 0x117   : > { %7092 = vst [vmem:[#allocation54_spill] sm:$0xff] %v4535_v36  ;;  %1579 = vrot.lane.b32.xlu0 %v4349_v25, %s3807_s16  ;;  %998 = vmatmul.mubr.f32.vlgmr.msra.gmra.mxu1 %v4084_v6  ;;  %v431_v6 = vld [vmem:[%s4066_s27 + $0x28] sm:$0xff] }
 0x118   : > { %3365 = vmatprep.subr.mxu0 %v4538_v21  ;;  %1002 = vmatprep.mubr.f32.mxu1 %v4234_v55 }
 0x119   : > { %v4548_v28 = vpop.permute.xlu1 %1353  ;;  %3366 = vmatpush3.msra.mxu0 %v4538_v21  ;;  %3371 = vmatprep.mubr.f32.mxu0 %v4229_v53 }
 0x11a   : > { %7093 = vst [vmem:[#allocation55_spill] sm:$0xff] %v4548_v28  ;;  %v4552_v18 = vpop.permute.xlu0 %1351  ;;  %1585 = vrot.lane.b32.xlu1 %v4366_v60, %s3807_s16  ;;  %3367 = vmatprep.subr.mxu0 %v4546_v54  ;;  %v4575_v60 = vmul.f32 %v431_v6, %v4245_v58  ;;  %v3604_v6 = vld [vmem:[%s4059_s13 + $0x30] sm:$0xff]  ;;  %v475_v28 = vld [vmem:[%s4072_s24 + $0x68] sm:$0xff] }
 0x11b   : > { %7094 = vst [vmem:[#allocation56_spill] sm:$0xff] %v4552_v18  ;;  %1583 = vrot.lane.b32.xlu0 %v4375_v1, %s3807_s16  ;;  %3368 = vmatpush3.msra.mxu0 %v4546_v54  ;;  %v4581_v1 = vmul.f32 %v428_v50, %v4229_v53 }
 0x11c   : > { %1003 = vmatmul.mubr.f32.gmra.mxu1 %v4100_v16  ;;  %3369 = vmatprep.subr.mxu0 %v4555_v49  ;;  %7097 = vst [vmem:[#allocation59_spill] sm:$0xff] %v4575_v60  ;;  %v437_v16 = vld [vmem:[%s4066_s27 + $0x58] sm:$0xff] }
 0x11d   : > { %v4566_v55 = vpop.permute.xlu1 %1357  ;;  %3370 = vmatpush3.msra.mxu0 %v4555_v49  ;;  %1007 = vmatprep.mubr.f32.mxu1 %v4256_v63  ;;  %7098 = vst [vmem:[#allocation60_spill] sm:$0xff] %v4581_v1  ;;  %v434_v63 = vld [vmem:[%s4066_s27 + $0x40] sm:$0xff]  ;;  %v4597_v53 = vmul.f32 %v437_v16, %v4290_v17  ;;  %v3605_v16 = vld [vmem:[%s4059_s13 + $0x48] sm:$0xff] }
 0x11e   : > { %7095 = vst [vmem:[#allocation57_spill] sm:$0xff] %v4566_v55  ;;  %v4570_v51 = vpop.permute.xlu0 %1355  ;;  %1589 = vrot.lane.b32.xlu1 %v4394_v26, %s3807_s16  ;;  %3372 = vmatmul.mubr.f32.vlgmr.msra.gmra.mxu0 %v4245_v58  ;;  %v4603_v50 = vmul.f32 %v434_v63, %v4265_v3 }
 0x11f   : > { %7096 = vst [vmem:[#allocation58_spill] sm:$0xff] %v4570_v51  ;;  %1587 = vrot.lane.b32.xlu0 %v4403_v34, %s3807_s16  ;;  %3374 = vmatprep.mubr.f32.mxu0 %v4265_v3  ;;  %7101 = vst [vmem:[#allocation63_spill] sm:$0xff] %v4597_v53 }
 0x120   : > { %1008 = vmatmul.mubr.f32.gmra.mxu1 %v3604_v6  ;;  %3389 = vmatprep.subr.mxu1 %v4239_v57  ;;  %7102 = vst [vmem:[#allocation64_spill] sm:$0xff] %v4603_v50  ;;  %v443_v6 = vld [vmem:[%s4066_s27 + $0x88] sm:$0xff] }
 0x121   : > { %v4588_v36 = vpop.permute.xlu1 %1361  ;;  %1012 = vmatprep.mubr.f32.mxu1 %v4273_v8  ;;  %3405 = vmatpush3.msra.mxu1 %v4239_v57  ;;  %v440_v57 = vld [vmem:[%s4066_s27 + $0x70] sm:$0xff]  ;;  %v4619_v3 = vmul.f32 %v443_v6, %v4344_v43  ;;  %v3606_v6 = vld [vmem:[%s4059_s13 + $0x60] sm:$0xff] }
 0x122   : > { %7099 = vst [vmem:[#allocation61_spill] sm:$0xff] %v4588_v36  ;;  %v4592_v58 = vpop.permute.xlu0 %1359  ;;  %1641 = vrot.lane.b32.xlu1 %v4575_v60, %s3805_s26  ;;  %3375 = vmatmul.mubr.f32.gmra.mxu0 %v4290_v17  ;;  %v4625_v63 = vmul.f32 %v440_v57, %v4316_v30 }
 0x123   : > { %7100 = vst [vmem:[#allocation62_spill] sm:$0xff] %v4592_v58  ;;  %1639 = vrot.lane.b32.xlu0 %v4581_v1, %s3805_s26  ;;  %3377 = vmatprep.mubr.f32.mxu0 %v4316_v30  ;;  %7105 = vst [vmem:[#allocation67_spill] sm:$0xff] %v4619_v3 }
 0x124   : > { %1013 = vmatmul.mubr.f32.gmra.mxu1 %v3605_v16  ;;  %3390 = vmatprep.subr.mxu1 %v4281_v13  ;;  %7106 = vst [vmem:[#allocation68_spill] sm:$0xff] %v4625_v63  ;;  %v449_v16 = vld [vmem:[%s4066_s27 + $0xb8] sm:$0xff] }
 0x125   : > { %v4610_v8 = vpop.permute.xlu1 %1365  ;;  %1017 = vmatprep.mubr.f32.mxu1 %v4303_v23  ;;  %3406 = vmatpush3.msra.mxu1 %v4281_v13  ;;  %v446_v13 = vld [vmem:[%s4066_s27 + $0xa0] sm:$0xff]  ;;  %v4641_v30 = vmul.f32 %v449_v16, %v4398_v33  ;;  %v3607_v16 = vld [vmem:[%s4059_s13 + $0x78] sm:$0xff] }
 0x126   : > { %7103 = vst [vmem:[#allocation65_spill] sm:$0xff] %v4610_v8  ;;  %v4614_v17 = vpop.permute.xlu0 %1363  ;;  %1645 = vrot.lane.b32.xlu1 %v4597_v53, %s3805_s26  ;;  %3378 = vmatmul.mubr.f32.gmra.mxu0 %v4344_v43  ;;  %v4647_v57 = vmul.f32 %v446_v13, %v4370_v62 }
 0x127   : > { %7104 = vst [vmem:[#allocation66_spill] sm:$0xff] %v4614_v17  ;;  %1643 = vrot.lane.b32.xlu0 %v4603_v50, %s3805_s26  ;;  %3380 = vmatprep.mubr.f32.mxu0 %v4370_v62  ;;  %7109 = vst [vmem:[#allocation71_spill] sm:$0xff] %v4641_v30  ;;  %v465_v17 = vld [vmem:[%s4072_s24 + $0x18] sm:$0xff] }
 0x128   : > { %1018 = vmatmul.mubr.f32.gmra.mxu1 %v3606_v6  ;;  %3391 = vmatprep.subr.mxu1 %v4335_v40  ;;  %7110 = vst [vmem:[#allocation72_spill] sm:$0xff] %v4647_v57  ;;  %v455_v6 = vld [vmem:[%s4066_s27 + $0xe8] sm:$0xff] }
 0x129   : > { %v4632_v23 = vpop.permute.xlu1 %1369  ;;  %1022 = vmatprep.mubr.f32.mxu1 %v4298_v20  ;;  %3407 = vmatpush3.msra.mxu1 %v4335_v40  ;;  %v452_v20 = vld [vmem:[%s4066_s27 + $0xd0] sm:$0xff]  ;;  %v4663_v62 = vmul.f32 %v455_v6, %v4427_v52 }
 0x12a   : > { %7107 = vst [vmem:[#allocation69_spill] sm:$0xff] %v4632_v23  ;;  %v4636_v43 = vpop.permute.xlu0 %1367  ;;  %1649 = vrot.lane.b32.xlu1 %v4619_v3, %s3805_s26  ;;  %3381 = vmatmul.mubr.f32.gmra.mxu0 %v4398_v33  ;;  %v4669_v13 = vmul.f32 %v452_v20, %v4413_v37 }
 0x12b   : > { %7108 = vst [vmem:[#allocation70_spill] sm:$0xff] %v4636_v43  ;;  %1647 = vrot.lane.b32.xlu0 %v4625_v63, %s3805_s26  ;;  %3392 = vmatprep.subr.mxu1 %v4389_v24  ;;  %7113 = vst [vmem:[#allocation75_spill] sm:$0xff] %v4663_v62 }
 0x12c   : > { %1023 = vmatmul.mubr.f32.gmra.mxu1 %v3607_v16  ;;  %3383 = vmatprep.mubr.f32.mxu0 %v4413_v37  ;;  %7114 = vst [vmem:[#allocation76_spill] sm:$0xff] %v4669_v13  ;;  %v461_v16 = vld [vmem:[%s4066_s27 + $0x118] sm:$0xff] }
 0x12d   : > { %v4654_v40 = vpop.permute.xlu1 %1373  ;;  %1027 = vmatprep.mubr.f32.mxu1 %v4329_v35  ;;  %3408 = vmatpush3.msra.mxu1 %v4389_v24  ;;  %v458_v35 = vld [vmem:[%s4066_s27 + $0x100] sm:$0xff]  ;;  %v3608_v24 = vld [vmem:[%s4059_s13 + $0x90] sm:$0xff]  ;;  %s3079_s27 = scalar_lea.sflag [#allocation4], %s4055_s17 }
 0x12e   : > { %7111 = vst [vmem:[#allocation73_spill] sm:$0xff] %v4654_v40  ;;  %v4658_v33 = vpop.permute.xlu0 %1371  ;;  %1653 = vrot.lane.b32.xlu1 %v4641_v30, %s3805_s26  ;;  %3384 = vmatmul.mubr.f32.gmra.mxu0 %v4427_v52  ;;  %v4682_v52 = vmul.f32 %v461_v16, %v4453_v12  ;;  %v4690_v20 = vmul.f32 %v458_v35, %v4439_v56  ;;  %v3610_v16 = vld [vmem:[%s4059_s13 + $0xc0] sm:$0xff] }
 0x12f   : > { %7112 = vst [vmem:[#allocation74_spill] sm:$0xff] %v4658_v33  ;;  %1651 = vrot.lane.b32.xlu0 %v4647_v57, %s3805_s26  ;;  %3393 = vmatprep.subr.mxu1 %v4421_v46 }
 0x130   : > { %1028 = vmatmul.mubr.f32.gmra.mxu1 %v3608_v24  ;;  %7116 = vst [vmem:[#allocation78_spill] sm:$0xff] %v4682_v52  ;;  %7118 = vst [vmem:[#allocation80_spill] sm:$0xff] %v4690_v20 }
 0x131   : > { %v4677_v6 = vpop.permute.xlu1 %1401  ;;  %1032 = vmatprep.mubr.f32.mxu1 %v4324_v14  ;;  %3409 = vmatpush3.msra.mxu1 %v4421_v46  ;;  %v3609_v14 = vld [vmem:[%s4059_s13 + $0xa8] sm:$0xff] }
 0x132   : > { %7115 = vst [vmem:[#allocation77_spill] sm:$0xff] %v4677_v6  ;;  %1657 = vrot.lane.b32.xlu1 %v4663_v62, %s3805_s26  ;;  %v4686_v37 = vpop.permute.xlu0 %1399  ;;  %3394 = vmatprep.subr.mxu1 %v4447_v9 }
 0x133   : > { %7117 = vst [vmem:[#allocation79_spill] sm:$0xff] %v4686_v37  ;;  %1655 = vrot.lane.b32.xlu0 %v4669_v13, %s3805_s26  ;;  %3410 = vmatpush3.msra.mxu1 %v4447_v9 }
 0x134   : > { %1033 = vmatmul.mubr.f32.gmra.mxu1 %v3609_v14  ;;  %3395 = vmatprep.subr.mxu1 %v4463_v44 }
 0x135   : > { %1037 = vmatprep.mubr.f32.mxu1 %v4357_v47  ;;  %3411 = vmatpush3.msra.mxu1 %v4463_v44  ;;  %v3611_v44 = vld [vmem:[%s4059_s13 + $0xd8] sm:$0xff] }
 0x136   : > { %1661 = vrot.lane.b32.xlu1 %v4682_v52, %s3805_s26  ;;  %v4701_v46 = vpop.permute.xlu1 %1405  ;;  %3396 = vmatprep.subr.mxu1 %v4475_v48 }
 0x137   : > { %7119 = vst [vmem:[#allocation81_spill] sm:$0xff] %v4701_v46  ;;  %1659 = vrot.lane.b32.xlu0 %v4690_v20, %s3805_s26  ;;  %v4706_v9 = vpop.permute.xlu0 %1403  ;;  %3412 = vmatpush3.msra.mxu1 %v4475_v48 }
 0x138   : > { %7120 = vst [vmem:[#allocation82_spill] sm:$0xff] %v4706_v9  ;;  %1038 = vmatmul.mubr.f32.gmra.mxu1 %v3610_v16  ;;  %3397 = vmatprep.subr.mxu1 %v4485_v0 }
 0x139   : > { %1042 = vmatprep.mubr.f32.mxu1 %v4352_v45  ;;  %3413 = vmatpush3.msra.mxu1 %v4485_v0  ;;  %v3612_v0 = vld [vmem:[%s4059_s13 + $0xf0] sm:$0xff] }
 0x13a   : > { %1689 = vrot.lane.b32.xlu1 %v4575_v60, %s3806_s25  ;;  %3398 = vmatprep.subr.mxu1 %v4495_v61 }
 0x13b   : > { %1687 = vrot.lane.b32.xlu0 %v4581_v1, %s3806_s25  ;;  %v4718_v47 = vpop.permute.xlu1 %1409  ;;  %3414 = vmatpush3.msra.mxu1 %v4495_v61 }
 0x13c   : > { %7121 = vst [vmem:[#allocation83_spill] sm:$0xff] %v4718_v47  ;;  %v4721_v48 = vpop.permute.xlu0 %1407  ;;  %1043 = vmatmul.mubr.f32.gmra.mxu1 %v3611_v44  ;;  %3399 = vmatprep.subr.mxu1 %v4502_v29 }
 0x13d   : > { %7122 = vst [vmem:[#allocation84_spill] sm:$0xff] %v4721_v48  ;;  %3415 = vmatpush3.msra.mxu1 %v4502_v29  ;;  %1047 = vmatprep.mubr.f32.mxu1 %v4383_v10  ;;  %v3613_v10 = vld [vmem:[%s4059_s13 + $0x108] sm:$0xff] }
 0x13e   : > { %1693 = vrot.lane.b32.xlu1 %v4597_v53, %s3806_s25  ;;  %3400 = vmatprep.subr.mxu1 %v4513_v39 }
 0x13f   : > { %1691 = vrot.lane.b32.xlu0 %v4603_v50, %s3806_s25  ;;  %3416 = vmatpush3.msra.mxu1 %v4513_v39 }
 0x140   : > { %v4733_v45 = vpop.permute.xlu1 %1413  ;;  %1048 = vmatmul.mubr.f32.gmra.mxu1 %v3612_v0  ;;  %3401 = vmatprep.subr.mxu1 %v4526_v15 }
 0x141   : > { %7123 = vst [vmem:[#allocation85_spill] sm:$0xff] %v4733_v45  ;;  %v4737_v29 = vpop.permute.xlu0 %1411  ;;  %3417 = vmatpush3.msra.mxu1 %v4526_v15  ;;  %1052 = vmatprep.mubr.f32.mxu1 %v4378_v22 }
 0x142   : > { %7124 = vst [vmem:[#allocation86_spill] sm:$0xff] %v4737_v29  ;;  %1697 = vrot.lane.b32.xlu1 %v4619_v3, %s3806_s25  ;;  %3402 = vmatprep.subr.mxu1 %v4538_v21 }
 0x143   : > { %1695 = vrot.lane.b32.xlu0 %v4625_v63, %s3806_s25  ;;  %3418 = vmatpush3.msra.mxu1 %v4538_v21 }
 0x144   : > { %v4747_v39 = vpop.permute.xlu1 %1417  ;;  %1053 = vmatmul.mubr.f32.gmra.mxu1 %v3613_v10  ;;  %3403 = vmatprep.subr.mxu1 %v4546_v54 }
 0x145   : > { %7125 = vst [vmem:[#allocation87_spill] sm:$0xff] %v4747_v39  ;;  %v4751_v61 = vpop.permute.xlu0 %1415  ;;  %3419 = vmatpush3.msra.mxu1 %v4546_v54  ;;  %3386 = vmatprep.mubr.f32.mxu1 %v4439_v56 }
 0x146   : > { %7126 = vst [vmem:[#allocation88_spill] sm:$0xff] %v4751_v61  ;;  %1701 = vrot.lane.b32.xlu1 %v4641_v30, %s3806_s25  ;;  %3404 = vmatprep.subr.mxu1 %v4555_v49 }
 0x147   : > { %1699 = vrot.lane.b32.xlu0 %v4647_v57, %s3806_s25  ;;  %3420 = vmatpush3.msra.mxu1 %v4555_v49 }
 0x148   : > { %v4761_v15 = vpop.permute.xlu1 %1421  ;;  %3387 = vmatmul.mubr.f32.vlgmr.msra.gmra.mxu1 %v4453_v12 }
 0x149   : > { %7127 = vst [vmem:[#allocation89_spill] sm:$0xff] %v4761_v15  ;;  %v4764_v22 = vpop.permute.xlu0 %1419 }
 0x14a   : > { %7128 = vst [vmem:[#allocation90_spill] sm:$0xff] %v4764_v22  ;;  %1705 = vrot.lane.b32.xlu1 %v4663_v62, %s3806_s25 }
 0x14b   : > { %1703 = vrot.lane.b32.xlu0 %v4669_v13, %s3806_s25 }
 0x14c   : > { %v4770_v56 = vpop.permute.xlu1 %1473 }
 0x14d   : > { %7129 = vst [vmem:[#allocation91_spill] sm:$0xff] %v4770_v56  ;;  %v4772_v21 = vpop.permute.xlu0 %1471 }
 0x14e   : > { %7130 = vst [vmem:[#allocation92_spill] sm:$0xff] %v4772_v21  ;;  %1709 = vrot.lane.b32.xlu1 %v4682_v52, %s3806_s25 }
 0x14f   : > { %1707 = vrot.lane.b32.xlu0 %v4690_v20, %s3806_s25 }
 0x150   : > { %v4778_v54 = vpop.permute.xlu1 %1477 }
 0x151   : > { %7131 = vst [vmem:[#allocation93_spill] sm:$0xff] %v4778_v54  ;;  %v4780_v12 = vpop.permute.xlu0 %1475 }
 0x152   : > { %7132 = vst [vmem:[#allocation94_spill] sm:$0xff] %v4780_v12  ;;  %1737 = vrot.lane.b32.xlu1 %v4575_v60, %s3807_s16 }
 0x153   : > { %1735 = vrot.lane.b32.xlu0 %v4581_v1, %s3807_s16 }
 0x154   : > { %v4786_v49 = vpop.permute.xlu1 %1481 }
 0x155   : > { %7133 = vst [vmem:[#allocation95_spill] sm:$0xff] %v4786_v49  ;;  %v4788_v35 = vpop.permute.xlu0 %1479 }
 0x156   : > { %7134 = vst [vmem:[#allocation96_spill] sm:$0xff] %v4788_v35  ;;  %1741 = vrot.lane.b32.xlu1 %v4597_v53, %s3807_s16 }
 0x157   : > { %1739 = vrot.lane.b32.xlu0 %v4603_v50, %s3807_s16 }
 0x158   : > { %v4794_v24 = vpop.permute.xlu1 %1485 }
 0x159   : > { %7135 = vst [vmem:[#allocation97_spill] sm:$0xff] %v4794_v24  ;;  %v4796_v14 = vpop.permute.xlu0 %1483 }
 0x15a   : > { %7136 = vst [vmem:[#allocation98_spill] sm:$0xff] %v4796_v14  ;;  %1745 = vrot.lane.b32.xlu1 %v4619_v3, %s3807_s16  ;;  %v462_v14 = vld [vmem:[%s4072_s24] sm:$0xff] }
 0x15b   : > { %1743 = vrot.lane.b32.xlu0 %v4625_v63, %s3807_s16 }
 0x15c   : > { %v4802_v16 = vpop.permute.xlu1 %1489 }
 0x15d   : > { %7137 = vst [vmem:[#allocation99_spill] sm:$0xff] %v4802_v16  ;;  %v4804_v44 = vpop.permute.xlu0 %1487 }
 0x15e   : > { %7138 = vst [vmem:[#allocation100_spill] sm:$0xff] %v4804_v44  ;;  %1749 = vrot.lane.b32.xlu1 %v4641_v30, %s3807_s16 }
 0x15f   : > { %1747 = vrot.lane.b32.xlu0 %v4647_v57, %s3807_s16 }
 0x160   : > { %v4810_v0 = vpop.permute.xlu1 %1493 }
 0x161   : > { %7139 = vst [vmem:[#allocation101_spill] sm:$0xff] %v4810_v0  ;;  %v4812_v10 = vpop.permute.xlu0 %1491 }
 0x162   : > { %7140 = vst [vmem:[#allocation102_spill] sm:$0xff] %v4812_v10  ;;  %1753 = vrot.lane.b32.xlu1 %v4663_v62, %s3807_s16 }
 0x163   : > { %1751 = vrot.lane.b32.xlu0 %v4669_v13, %s3807_s16 }
 0x164   : > { %v4818_v26 = vpop.permute.xlu1 %1521 }
 0x165   : > { %7141 = vst [vmem:[#allocation103_spill] sm:$0xff] %v4818_v26  ;;  %v4820_v34 = vpop.permute.xlu0 %1519 }
 0x166   : > { %7142 = vst [vmem:[#allocation104_spill] sm:$0xff] %v4820_v34  ;;  %1757 = vrot.lane.b32.xlu1 %v4682_v52, %s3807_s16 }
 0x167   : > { %1755 = vrot.lane.b32.xlu0 %v4690_v20, %s3807_s16 }
 0x168   : > { %v4826_v16 = vpop.permute.xlu1 %1525 }
 0x169   : > { %7143 = vst [vmem:[#allocation105_spill] sm:$0xff] %v4826_v16  ;;  %v4828_v0 = vpop.permute.xlu0 %1523  ;;  %v468_v16 = vld [vmem:[%s4072_s24 + $0x30] sm:$0xff] }
 0x16a   : > { %7144 = vst [vmem:[#allocation106_spill] sm:$0xff] %v4828_v0 }
 0x16c   : > { %v4830_v10 = vpop.permute.xlu1 %1529 }
 0x16d   : > { %7145 = vst [vmem:[#allocation107_spill] sm:$0xff] %v4830_v10  ;;  %v4832_v62 = vpop.permute.xlu0 %1527 }
 0x16e   : > { %7146 = vst [vmem:[#allocation108_spill] sm:$0xff] %v4832_v62 }
 0x170   : > { %v4834_v15 = vpop.permute.xlu1 %1533 }
 0x171   : > { %7147 = vst [vmem:[#allocation109_spill] sm:$0xff] %v4834_v15  ;;  %v4836_v13 = vpop.permute.xlu0 %1531  ;;  %v644_v15 = vlaneseq }
 0x172   : > { %7148 = vst [vmem:[#allocation110_spill] sm:$0xff] %v4836_v13 }
 0x173   : > { %v4854_v23 = vshrl.u32 %v644_v15, 7 }
 0x174   : > { %v4838_v22 = vpop.permute.xlu1 %1537 }
 0x175   : > { %7149 = vst [vmem:[#allocation111_spill] sm:$0xff] %v4838_v22  ;;  %v4840_v30 = vpop.permute.xlu0 %1535  ;;  %v650_v8 = vsub.s32 1, %v4854_v23 }
 0x176   : > { %7150 = vst [vmem:[#allocation112_spill] sm:$0xff] %v4840_v30 }
 0x178   : > { %v4842_v52 = vpop.permute.xlu1 %1541 }
 0x179   : > { %7151 = vst [vmem:[#allocation113_spill] sm:$0xff] %v4842_v52  ;;  %v4844_v40 = vpop.permute.xlu0 %1539  ;;  %v646_v52 = vsub.s32 0, %v4854_v23 }
 0x17a   : > { %7152 = vst [vmem:[#allocation114_spill] sm:$0xff] %v4844_v40  ;;  %v4864_v40 = vld [vmem:[%s6929_s5] sm:$0x7] }
 0x17b   : > { %v4871_v42 = vrot.slane %v4864_v40, %v646_v52  ;;  %v4886_v10 = vrot.slane %v4864_v40, %v650_v8 }
 0x17c   : > { %v4846_v20 = vpop.permute.xlu1 %1569 }
 0x17d   : > { %7153 = vst [vmem:[#allocation115_spill] sm:$0xff] %v4846_v20  ;;  %v4848_v39 = vpop.permute.xlu0 %1567 }
 0x17e   : > { %7154 = vst [vmem:[#allocation116_spill] sm:$0xff] %v4848_v39 }
 0x180   : > { %v4850_v33 = vpop.permute.xlu1 %1573 }
 0x181   : > { %7155 = vst [vmem:[#allocation117_spill] sm:$0xff] %v4850_v33  ;;  %v4852_v44 = vpop.permute.xlu0 %1571 }
 0x182   : > { %7156 = vst [vmem:[#allocation118_spill] sm:$0xff] %v4852_v44 }
 0x184   : > { %v4856_v24 = vpop.permute.xlu1 %1577 }
 0x185   : > { %7157 = vst [vmem:[#allocation119_spill] sm:$0xff] %v4856_v24  ;;  %v4858_v22 = vpop.permute.xlu0 %1575 }
 0x186   : > { %7158 = vst [vmem:[#allocation120_spill] sm:$0xff] %v4858_v22 }
 0x188   : > { %v4866_v30 = vpop.permute.xlu1 %1581 }
 0x189   : > { %7159 = vst [vmem:[#allocation121_spill] sm:$0xff] %v4866_v30  ;;  %v4868_v57 = vpop.permute.xlu0 %1579 }
 0x18a   : > { %7160 = vst [vmem:[#allocation122_spill] sm:$0xff] %v4868_v57 }
 0x18c   : > { %v4874_v43 = vpop.permute.xlu1 %1585 }
 0x18d   : > { %7161 = vst [vmem:[#allocation123_spill] sm:$0xff] %v4874_v43  ;;  %v4878_v38 = vpop.permute.xlu0 %1583 }
 0x18e   : > { %7162 = vst [vmem:[#allocation124_spill] sm:$0xff] %v4878_v38 }
 0x191   : > { %v862_v15 = vpop.f32.mrf.mxu1  ;;  %v725_v61 = vpop.f32.mrf.mxu0 }
 0x192   : > { %v726_v45 = vadd.f32 %v725_v61, %v4871_v42 }
 0x193   : > { %v864_v13 = vpop.f32.mrf.mxu1  ;;  %v727_v25 = vpop.f32.mrf.mxu0 }
 0x194   : > { %v863_v30 = vadd.f32 %v862_v15, %v726_v45  ;;  %v4891_v45 = vpop.permute.xlu1 %1589  ;;  %v728_v15 = vadd.f32 %v727_v25, %v4886_v10  ;;  %v463_v25 = vld [vmem:[%s4072_s24 + $0x8] sm:$0xff] }
 0x195   : > { %v868_v3 = vpop.f32.mrf.mxu1  ;;  %v731_v57 = vpop.f32.mrf.mxu0  ;;  %7163 = vst [vmem:[#allocation125_spill] sm:$0xff] %v4891_v45 }
 0x196   : > { %v4880_v29 = vmul.f32 %v863_v30, %v462_v14  ;;  %v4882_v52 = vmul.f32 %v863_v30, %v863_v30  ;;  %v732_v24 = vadd.f32 %v731_v57, %v4871_v42  ;;  %v4895_v14 = vpop.permute.xlu0 %1587 }
 0x197   : > { %v870_v61 = vpop.f32.mrf.mxu1  ;;  %v733_v43 = vpop.f32.mrf.mxu0  ;;  %7164 = vst [vmem:[#allocation126_spill] sm:$0xff] %v4895_v14 }
 0x198   : > { %v869_v49 = vadd.f32 %v868_v3, %v732_v24  ;;  %2287 = vrot.lane.b32.xlu1 %v4882_v52, %s3805_s26  ;;  %1795 = vrot.lane.b32.xlu0 %v4880_v29, %s3805_s26  ;;  %v734_v27 = vadd.f32 %v733_v43, %v4886_v10  ;;  %v4911_v14 = vpop.permute.xlu1 %1641 }
 0x199   : > { %v874_v38 = vpop.f32.mrf.mxu1  ;;  %v737_v30 = vpop.f32.mrf.mxu0  ;;  %7166 = vst [vmem:[#allocation128_spill] sm:$0xff] %v4911_v14 }
 0x19a   : > { %v4897_v57 = vmul.f32 %v869_v49, %v465_v17  ;;  %v4909_v17 = vadd.f32 %v864_v13, %v728_v15  ;;  %v4914_v36 = vpop.permute.xlu0 %1639  ;;  %v738_v22 = vadd.f32 %v737_v30, %v4871_v42  ;;  %v4921_v35 = vadd.f32 %v870_v61, %v734_v27 }
 0x19b   : > { %v4899_v8 = vpop.f32.mrf.mxu1  ;;  %v739_v3 = vpop.f32.mrf.mxu0  ;;  %7167 = vst [vmem:[#allocation129_spill] sm:$0xff] %v4914_v36  ;;  %v4946_v50 = vmul.f32 %v869_v49, %v869_v49 }
 0x19c   : > { %7165 = vst [vmem:[#allocation127_spill] sm:$0xff] %v4897_v57  ;;  %1797 = vrot.lane.b32.xlu1 %v4897_v57, %s3805_s26  ;;  %1843 = vrot.lane.b32.xlu0 %v4880_v29, %s3806_s25  ;;  %v4926_v15 = vmul.f32 %v4909_v17, %v463_v25  ;;  %v875_v30 = vadd.f32 %v874_v38, %v738_v22  ;;  %v4934_v33 = vpop.permute.xlu1 %1645 }
 0x19d   : > { %v880_v24 = vpop.f32.mrf.mxu1  ;;  %v743_v45 = vpop.f32.mrf.mxu0  ;;  %7169 = vst [vmem:[#allocation131_spill] sm:$0xff] %v4934_v33  ;;  %v4939_v61 = vmul.f32 %v4921_v35, %v466_v32 }
 0x19e   : > { %7168 = vst [vmem:[#allocation130_spill] sm:$0xff] %v4926_v15  ;;  %v744_v58 = vadd.f32 %v743_v45, %v4871_v42  ;;  %v4941_v25 = vpop.permute.xlu0 %1643  ;;  %v4950_v22 = vmul.f32 %v875_v30, %v875_v30  ;;  %v4958_v32 = vmul.f32 %v875_v30, %v468_v16 }
 0x19f   : > { %v4907_v47 = vpop.f32.mrf.mxu1  ;;  %v745_v63 = vpop.f32.mrf.mxu0  ;;  %7170 = vst [vmem:[#allocation132_spill] sm:$0xff] %v4939_v61  ;;  %7171 = vst [vmem:[#allocation133_spill] sm:$0xff] %v4941_v25  ;;  %v471_v25 = vld [vmem:[%s4072_s24 + $0x48] sm:$0xff] }
 0x1a0   : > { %1845 = vrot.lane.b32.xlu1 %v4897_v57, %s3806_s25  ;;  %1891 = vrot.lane.b32.xlu0 %v4880_v29, %s3807_s16  ;;  %v4954_v45 = vadd.f32 %v880_v24, %v744_v58  ;;  %7172 = vst [vmem:[#allocation134_spill] sm:$0xff] %v4958_v32  ;;  %v4967_v46 = vpop.permute.xlu1 %1649 }
 0x1a1   : > { %v886_v62 = vpop.f32.mrf.mxu1  ;;  %v749_v43 = vpop.f32.mrf.mxu0  ;;  %7173 = vst [vmem:[#allocation135_spill] sm:$0xff] %v4967_v46  ;;  %v740_v46 = vadd.f32 %v739_v3, %v4886_v10  ;;  %v746_v3 = vadd.f32 %v745_v63, %v4886_v10 }
 0x1a2   : > { %v4971_v36 = vpop.permute.xlu0 %1647  ;;  %v4974_v58 = vmul.f32 %v4954_v45, %v471_v25  ;;  %v750_v55 = vadd.f32 %v749_v43, %v4871_v42 }
 0x1a3   : > { %v4923_v13 = vpop.f32.mrf.mxu1  ;;  %v4929_v48 = vpop.f32.mrf.mxu0  ;;  %7174 = vst [vmem:[#allocation136_spill] sm:$0xff] %v4971_v36  ;;  %v5006_v26 = vadd.f32 %v4899_v8, %v740_v46  ;;  %v5023_v46 = vadd.f32 %v4907_v47, %v746_v3  ;;  %v474_v8 = vld [vmem:[%s4072_s24 + $0x60] sm:$0xff] }
 0x1a4   : > { %1893 = vrot.lane.b32.xlu1 %v4897_v57, %s3807_s16  ;;  %1963 = vrot.lane.b32.xlu0 %v4926_v15, %s3805_s26  ;;  %7175 = vst [vmem:[#allocation137_spill] sm:$0xff] %v4974_v58  ;;  %v4993_v36 = vpop.permute.xlu1 %1653  ;;  %v5018_v63 = vadd.f32 %v886_v62, %v750_v55 }
 0x1a5   : > { %v892_v53 = vpop.f32.mrf.mxu1  ;;  %v755_v27 = vpop.f32.mrf.mxu0  ;;  %7176 = vst [vmem:[#allocation138_spill] sm:$0xff] %v4993_v36  ;;  %v469_v36 = vld [vmem:[%s4072_s24 + $0x38] sm:$0xff]  ;;  %v5380_v31 = vmul.f32 %v5023_v46, %v5023_v46 }
 0x1a6   : > { %v5000_v20 = vpop.permute.xlu0 %1651  ;;  %v756_v43 = vadd.f32 %v755_v27, %v4871_v42  ;;  %v5029_v34 = vmul.f32 %v5006_v26, %v469_v36  ;;  %v472_v27 = vld [vmem:[%s4072_s24 + $0x50] sm:$0xff]  ;;  %v5042_v3 = vmul.f32 %v5018_v63, %v474_v8  ;;  %v477_v36 = vld [vmem:[%s4072_s24 + $0x78] sm:$0xff] }
 0x1a7   : > { %v4944_v54 = vpop.f32.mrf.mxu1  ;;  %v4948_v38 = vpop.f32.mrf.mxu0  ;;  %7177 = vst [vmem:[#allocation139_spill] sm:$0xff] %v5000_v20  ;;  %7231 = vst [vmem:[#allocation193_spill] sm:$0xff] %v5380_v31 }
 0x1a8   : > { %1965 = vrot.lane.b32.xlu1 %v4939_v61, %s3805_s26  ;;  %2289 = vrot.lane.b32.xlu0 %v4946_v50, %s3805_s26  ;;  %v5026_v4 = vpop.permute.xlu1 %1657  ;;  %7179 = vst [vmem:[#allocation141_spill] sm:$0xff] %v5029_v34  ;;  %v5036_v55 = vadd.f32 %v892_v53, %v756_v43  ;;  %7181 = vst [vmem:[#allocation143_spill] sm:$0xff] %v5042_v3 }
 0x1a9   : > { %v4956_v33 = vpop.f32.mrf.mxu1  ;;  %v4963_v14 = vpop.f32.mrf.mxu0  ;;  %7178 = vst [vmem:[#allocation140_spill] sm:$0xff] %v5026_v4 }
 0x1aa   : > { %v5032_v21 = vpop.permute.xlu0 %1655 }
 0x1ab   : > { %v4965_v49 = vpop.f32.mrf.mxu1  ;;  %v4969_v60 = vpop.f32.mrf.mxu0  ;;  %7180 = vst [vmem:[#allocation142_spill] sm:$0xff] %v5032_v21  ;;  %v5050_v21 = vmul.f32 %v5023_v46, %v472_v27 }
 0x1ac   : > { %2291 = vrot.lane.b32.xlu1 %v4950_v22, %s3805_s26  ;;  %1799 = vrot.lane.b32.xlu0 %v4958_v32, %s3805_s26 }
 0x1ad   : > { %v4978_v16 = vpop.f32.mrf.mxu1  ;;  %v4982_v24 = vpop.f32.mrf.mxu0  ;;  %7182 = vst [vmem:[#allocation144_spill] sm:$0xff] %v5050_v21 }
 0x1af   : > { %v4984_v30 = vpop.f32.mrf.mxu1  ;;  %v4987_v44 = vpop.f32.mrf.mxu0 }
 0x1b0   : > { %1801 = vrot.lane.b32.xlu1 %v4974_v58, %s3805_s26  ;;  %1847 = vrot.lane.b32.xlu0 %v4958_v32, %s3806_s25 }
 0x1b1   : > { %v4991_v25 = vpop.f32.mrf.mxu1  ;;  %v4998_v1 = vpop.f32.mrf.mxu0 }
 0x1b3   : > { %v5003_v0 = vpop.f32.mrf.mxu1  ;;  %v5008_v12 = vpop.f32.mrf.mxu0 }
 0x1b4   : > { %1849 = vrot.lane.b32.xlu1 %v4974_v58, %s3806_s25  ;;  %1895 = vrot.lane.b32.xlu0 %v4958_v32, %s3807_s16 }
 0x1b5   : > { %v5014_v39 = vpop.f32.mrf.mxu1  ;;  %v5020_v20 = vpop.f32.mrf.mxu0 }
 0x1b7   : > { %v918_v56 = vpop.f32.mrf.mxu1  ;;  %v781_v2 = vpop.f32.mrf.mxu0 }
 0x1b8   : > { %1897 = vrot.lane.b32.xlu1 %v4974_v58, %s3807_s16  ;;  %v782_v62 = vadd.f32 %v781_v2, %v4886_v10  ;;  %1967 = vrot.lane.b32.xlu0 %v5029_v34, %s3805_s26  ;;  %v5055_v2 = vmul.f32 %v5036_v55, %v477_v36  ;;  %v752_v36 = vadd.f32 %v4929_v48, %v4886_v10 }
 0x1b9   : > { %v5039_v47 = vpop.f32.mrf.mxu1  ;;  %v5047_v4 = vpop.f32.mrf.mxu0 }
 0x1ba   : > { %v5052_v9 = vadd.f32 %v918_v56, %v782_v62  ;;  %v5066_v56 = vpop.permute.xlu1 %1661  ;;  %v5068_v62 = vpop.permute.xlu0 %1659  ;;  %v5086_v48 = vadd.f32 %v4923_v13, %v752_v36  ;;  %v480_v13 = vld [vmem:[%s4072_s24 + $0x90] sm:$0xff]  ;;  %v478_v36 = vld [vmem:[%s4072_s24 + $0x80] sm:$0xff] }
 0x1bb   : > { %v924_v53 = vpop.f32.mrf.mxu1  ;;  %v787_v43 = vpop.f32.mrf.mxu0  ;;  %7183 = vst [vmem:[#allocation145_spill] sm:$0xff] %v5066_v56  ;;  %7184 = vst [vmem:[#allocation146_spill] sm:$0xff] %v5068_v62  ;;  %v762_v56 = vadd.f32 %v4963_v14, %v4871_v42 }
 0x1bc   : > { %1969 = vrot.lane.b32.xlu1 %v5050_v21, %s3805_s26  ;;  %v788_v8 = vadd.f32 %v787_v43, %v4886_v10  ;;  %1803 = vrot.lane.b32.xlu0 %v5042_v3, %s3805_s26 }
 0x1bd   : > { %v5060_v5 = vpop.f32.mrf.mxu1  ;;  %v5064_v27 = vpop.f32.mrf.mxu0 }
 0x1be   : > { %v5070_v6 = vadd.f32 %v924_v53, %v788_v8  ;;  %v758_v53 = vadd.f32 %v4948_v38, %v4886_v10  ;;  %v5088_v62 = vpop.permute.xlu1 %1689  ;;  %v5095_v41 = vpop.permute.xlu0 %1687  ;;  %v5107_v38 = vmul.f32 %v5086_v48, %v475_v28 }
 0x1bf   : > { %v793_v51 = vpop.f32.mrf.mxu0  ;;  %v930_v37 = vpop.f32.mrf.mxu1  ;;  %7185 = vst [vmem:[#allocation147_spill] sm:$0xff] %v5088_v62  ;;  %7186 = vst [vmem:[#allocation148_spill] sm:$0xff] %v5095_v41  ;;  %v484_v62 = vld [vmem:[%s4072_s24 + $0xb0] sm:$0xff] }
 0x1c0   : > { %1805 = vrot.lane.b32.xlu1 %v5055_v2, %s3805_s26  ;;  %v794_v43 = vadd.f32 %v793_v51, %v4886_v10  ;;  %1851 = vrot.lane.b32.xlu0 %v5042_v3, %s3806_s25  ;;  %v768_v51 = vadd.f32 %v4982_v24, %v4871_v42  ;;  %v5103_v14 = vadd.f32 %v4944_v54, %v758_v53 }
 0x1c1   : > { %7187 = vst [vmem:[#allocation149_spill] sm:$0xff] %v5107_v38 }
 0x1c2   : > { %v5083_v8 = vadd.f32 %v930_v37, %v794_v43  ;;  %v5100_v37 = vadd.f32 %v4956_v33, %v762_v56  ;;  %v5113_v24 = vadd.f32 %v4978_v16, %v768_v51  ;;  %v483_v33 = vld [vmem:[%s4072_s24 + $0xa8] sm:$0xff]  ;;  %v5121_v54 = vpop.permute.xlu1 %1693  ;;  %v5124_v28 = vmul.f32 %v5103_v14, %v478_v36  ;;  %v5126_v56 = vpop.permute.xlu0 %1691 }
 0x1c3   : > { %7189 = vst [vmem:[#allocation151_spill] sm:$0xff] %v5121_v54  ;;  %7190 = vst [vmem:[#allocation152_spill] sm:$0xff] %v5126_v56  ;;  %v764_v16 = vadd.f32 %v4969_v60, %v4886_v10  ;;  %v774_v36 = vadd.f32 %v4998_v1, %v4871_v42  ;;  %v481_v60 = vld [vmem:[%s4072_s24 + $0x98] sm:$0xff] }
 0x1c4   : > { %1853 = vrot.lane.b32.xlu1 %v5055_v2, %s3806_s25  ;;  %1899 = vrot.lane.b32.xlu0 %v5042_v3, %s3807_s16  ;;  %v5116_v43 = vmul.f32 %v5100_v37, %v480_v13  ;;  %v5129_v53 = vmul.f32 %v5113_v24, %v483_v33  ;;  %v770_v33 = vadd.f32 %v4987_v44, %v4886_v10  ;;  %v654_v3 = vsub.s32 2, %v4854_v23 }
 0x1c5   : > { %v5150_v54 = vadd.f32 %v4965_v49, %v764_v16  ;;  %v486_v49 = vld [vmem:[%s4072_s24 + $0xc0] sm:$0xff]  ;;  %v5370_v7 = vmul.f32 %v5113_v24, %v5113_v24 }
 0x1c6   : > { %7188 = vst [vmem:[#allocation150_spill] sm:$0xff] %v5116_v43  ;;  %7191 = vst [vmem:[#allocation153_spill] sm:$0xff] %v5129_v53  ;;  %v5137_v51 = vpop.permute.xlu1 %1697  ;;  %v5141_v13 = vpop.permute.xlu0 %1695  ;;  %v5165_v44 = vadd.f32 %v4984_v30, %v770_v33  ;;  %v489_v30 = vld [vmem:[%s4072_s24 + $0xd8] sm:$0xff] }
 0x1c7   : > { %7192 = vst [vmem:[#allocation154_spill] sm:$0xff] %v5137_v51  ;;  %7193 = vst [vmem:[#allocation155_spill] sm:$0xff] %v5141_v13  ;;  %v780_v51 = vadd.f32 %v5020_v20, %v4871_v42  ;;  %v5160_v13 = vadd.f32 %v4991_v25, %v774_v36  ;;  %v5171_v56 = vmul.f32 %v5150_v54, %v481_v60 }
 0x1c8   : > { %1901 = vrot.lane.b32.xlu1 %v5055_v2, %s3807_s16  ;;  %1971 = vrot.lane.b32.xlu0 %v5107_v38, %s3805_s26  ;;  %v5186_v36 = vmul.f32 %v5165_v44, %v484_v62  ;;  %v786_v62 = vadd.f32 %v5047_v4, %v4871_v42 }
 0x1c9   : > { %7196 = vst [vmem:[#allocation158_spill] sm:$0xff] %v5171_v56  ;;  %v5177_v20 = vadd.f32 %v5014_v39, %v780_v51  ;;  %v5180_v25 = vmul.f32 %v5160_v13, %v486_v49  ;;  %v776_v51 = vadd.f32 %v5008_v12, %v4886_v10  ;;  %v792_v12 = vadd.f32 %v5064_v27, %v4871_v42  ;;  %v492_v10 = vld [vmem:[%s4072_s24 + $0xf0] sm:$0xff] }
 0x1ca   : > { %v5162_v1 = vpop.permute.xlu1 %1701  ;;  %v5168_v16 = vpop.permute.xlu0 %1699  ;;  %7198 = vst [vmem:[#allocation160_spill] sm:$0xff] %v5186_v36  ;;  %v5222_v4 = vadd.f32 %v5039_v47, %v786_v62  ;;  %v495_v47 = vld [vmem:[%s4072_s24 + $0x108] sm:$0xff]  ;;  %v5400_v46 = vmul.f32 %v5160_v13, %v5160_v13 }
 0x1cb   : > { %7194 = vst [vmem:[#allocation156_spill] sm:$0xff] %v5162_v1  ;;  %7195 = vst [vmem:[#allocation157_spill] sm:$0xff] %v5168_v16  ;;  %v5191_v60 = vmul.f32 %v5177_v20, %v489_v30 }
 0x1cc   : > { %1973 = vrot.lane.b32.xlu1 %v5124_v28, %s3805_s26  ;;  %1807 = vrot.lane.b32.xlu0 %v5116_v43, %s3805_s26  ;;  %7197 = vst [vmem:[#allocation159_spill] sm:$0xff] %v5180_v25  ;;  %v5238_v42 = vmul.f32 %v5222_v4, %v492_v10  ;;  %7236 = vst [vmem:[#allocation198_spill] sm:$0xff] %v5400_v46 }
 0x1cd   : > { %7200 = vst [vmem:[#allocation162_spill] sm:$0xff] %v5191_v60 }
 0x1ce   : > { %v5188_v33 = vpop.permute.xlu1 %1705  ;;  %v5195_v39 = vpop.permute.xlu0 %1703  ;;  %7207 = vst [vmem:[#allocation169_spill] sm:$0xff] %v5238_v42 }
 0x1cf   : > { %7199 = vst [vmem:[#allocation161_spill] sm:$0xff] %v5188_v33  ;;  %7201 = vst [vmem:[#allocation163_spill] sm:$0xff] %v5195_v39  ;;  %v5212_v33 = vadd.f32 %v5003_v0, %v776_v51  ;;  %v487_v39 = vld [vmem:[%s4072_s24 + $0xc8] sm:$0xff]  ;;  %v5233_v0 = vadd.f32 %v5060_v5, %v792_v12 }
 0x1d0   : > { %1809 = vrot.lane.b32.xlu1 %v5129_v53, %s3805_s26  ;;  %1855 = vrot.lane.b32.xlu0 %v5116_v43, %s3806_s25 }
 0x1d1   : > { %v5244_v27 = vmul.f32 %v5233_v0, %v495_v47  ;;  %v5274_v47 = vmul.f32 %v4954_v45, %v4954_v45  ;;  %v5292_v45 = vmul.f32 %v5018_v63, %v5018_v63 }
 0x1d2   : > { %v5207_v49 = vpop.permute.xlu1 %1709  ;;  %v5209_v30 = vpop.permute.xlu0 %1707 }
 0x1d3   : > { %7202 = vst [vmem:[#allocation164_spill] sm:$0xff] %v5207_v49  ;;  %7203 = vst [vmem:[#allocation165_spill] sm:$0xff] %v5209_v30  ;;  %v5226_v49 = vmul.f32 %v5212_v33, %v487_v39 }
 0x1d4   : > { %1857 = vrot.lane.b32.xlu1 %v5129_v53, %s3806_s25  ;;  %1903 = vrot.lane.b32.xlu0 %v5116_v43, %s3807_s16  ;;  %7208 = vst [vmem:[#allocation170_spill] sm:$0xff] %v5244_v27  ;;  %7214 = vst [vmem:[#allocation176_spill] sm:$0xff] %v5274_v47 }
 0x1d5   : > { %7204 = vst [vmem:[#allocation166_spill] sm:$0xff] %v5226_v49  ;;  %7218 = vst [vmem:[#allocation180_spill] sm:$0xff] %v5292_v45 }
 0x1d6   : > { %v5228_v30 = vpop.permute.xlu1 %1737  ;;  %v5235_v51 = vpop.permute.xlu0 %1735 }
 0x1d7   : > { %7205 = vst [vmem:[#allocation167_spill] sm:$0xff] %v5228_v30  ;;  %7206 = vst [vmem:[#allocation168_spill] sm:$0xff] %v5235_v51 }
 0x1d8   : > { %1905 = vrot.lane.b32.xlu1 %v5129_v53, %s3807_s16  ;;  %1975 = vrot.lane.b32.xlu0 %v5171_v56, %s3805_s26 }
 0x1da   : > { %v5250_v5 = vpop.permute.xlu1 %1741  ;;  %v5252_v39 = vpop.permute.xlu0 %1739 }
 0x1db   : > { %7209 = vst [vmem:[#allocation171_spill] sm:$0xff] %v5250_v5  ;;  %7210 = vst [vmem:[#allocation172_spill] sm:$0xff] %v5252_v39 }
 0x1dc   : > { %1977 = vrot.lane.b32.xlu1 %v5186_v36, %s3805_s26  ;;  %1811 = vrot.lane.b32.xlu0 %v5180_v25, %s3805_s26 }
 0x1de   : > { %v5258_v62 = vpop.permute.xlu1 %1745  ;;  %v5262_v12 = vpop.permute.xlu0 %1743 }
 0x1df   : > { %7211 = vst [vmem:[#allocation173_spill] sm:$0xff] %v5258_v62  ;;  %7212 = vst [vmem:[#allocation174_spill] sm:$0xff] %v5262_v12 }
 0x1e0   : > { %1813 = vrot.lane.b32.xlu1 %v5191_v60, %s3805_s26  ;;  %1859 = vrot.lane.b32.xlu0 %v5180_v25, %s3806_s25 }
 0x1e2   : > { %v5270_v10 = vpop.permute.xlu1 %1749  ;;  %v5276_v1 = vpop.permute.xlu0 %1747 }
 0x1e3   : > { %7213 = vst [vmem:[#allocation175_spill] sm:$0xff] %v5270_v10  ;;  %7215 = vst [vmem:[#allocation177_spill] sm:$0xff] %v5276_v1 }
 0x1e4   : > { %1861 = vrot.lane.b32.xlu1 %v5191_v60, %s3806_s25  ;;  %1907 = vrot.lane.b32.xlu0 %v5180_v25, %s3807_s16 }
 0x1e6   : > { %v5282_v16 = vpop.permute.xlu1 %1753  ;;  %v5286_v62 = vpop.permute.xlu0 %1751 }
 0x1e7   : > { %7216 = vst [vmem:[#allocation178_spill] sm:$0xff] %v5282_v16  ;;  %7217 = vst [vmem:[#allocation179_spill] sm:$0xff] %v5286_v62  ;;  %v5300_v16 = vmul.f32 %v5036_v55, %v5036_v55  ;;  %v5320_v55 = vmul.f32 %v4921_v35, %v4921_v35  ;;  %v5338_v35 = vmul.f32 %v5100_v37, %v5100_v37 }
 0x1e8   : > { %1909 = vrot.lane.b32.xlu1 %v5191_v60, %s3807_s16  ;;  %1979 = vrot.lane.b32.xlu0 %v5226_v49, %s3805_s26  ;;  %v3275_v60 = vpop.f32.mrf.mxu1 }
 0x1e9   : > { %7219 = vst [vmem:[#allocation181_spill] sm:$0xff] %v5300_v16  ;;  %7222 = vst [vmem:[#allocation184_spill] sm:$0xff] %v5320_v55 }
 0x1ea   : > { %v5302_v10 = vpop.permute.xlu1 %1757  ;;  %v5304_v62 = vpop.permute.xlu0 %1755 }
 0x1eb   : > { %7220 = vst [vmem:[#allocation182_spill] sm:$0xff] %v5302_v10  ;;  %7221 = vst [vmem:[#allocation183_spill] sm:$0xff] %v5304_v62  ;;  %v5326_v62 = vmul.f32 %v4909_v17, %v4909_v17  ;;  %v5348_v17 = vmul.f32 %v5006_v26, %v5006_v26  ;;  %v3276_v13 = vpop.f32.mrf.mxu1 }
 0x1ec   : > { %2337 = vrot.lane.b32.xlu1 %v4946_v50, %s3806_s25  ;;  %1815 = vrot.lane.b32.xlu0 %v5238_v42, %s3805_s26  ;;  %v3277_v23 = vadd.f32 %v3276_v13, %v3275_v60 }
 0x1ed   : > { %7226 = vst [vmem:[#allocation188_spill] sm:$0xff] %v5348_v17 }
 0x1f0   : > { %1817 = vrot.lane.b32.xlu1 %v5244_v27, %s3805_s26  ;;  %1863 = vrot.lane.b32.xlu0 %v5238_v42, %s3806_s25 }
 0x1f4   : > { %1865 = vrot.lane.b32.xlu1 %v5244_v27, %s3806_s25  ;;  %1911 = vrot.lane.b32.xlu0 %v5238_v42, %s3807_s16 }
 0x1f8   : > { %1913 = vrot.lane.b32.xlu1 %v5244_v27, %s3807_s16  ;;  %2335 = vrot.lane.b32.xlu0 %v4882_v52, %s3806_s25 }
 0x1fc   : > { %2339 = vrot.lane.b32.xlu1 %v4950_v22, %s3806_s25  ;;  %2293 = vrot.lane.b32.xlu0 %v5274_v47, %s3805_s26 }
 0x200   : > { %2385 = vrot.lane.b32.xlu1 %v4946_v50, %s3807_s16  ;;  %2383 = vrot.lane.b32.xlu0 %v4882_v52, %s3807_s16 }
 0x204   : > { %2341 = vrot.lane.b32.xlu1 %v5274_v47, %s3806_s25  ;;  %2295 = vrot.lane.b32.xlu0 %v5292_v45, %s3805_s26 }
 0x208   : > { %2297 = vrot.lane.b32.xlu1 %v5300_v16, %s3805_s26  ;;  %2387 = vrot.lane.b32.xlu0 %v4950_v22, %s3807_s16 }
 0x20a   : > { %v5310_v63 = vpop.permute.xlu1 %2287  ;;  %v5312_v1 = vpop.permute.xlu0 %1795 }
 0x20c   : > { %2389 = vrot.lane.b32.xlu1 %v5274_v47, %s3807_s16  ;;  %2343 = vrot.lane.b32.xlu0 %v5292_v45, %s3806_s25 }
 0x20e   : > { %v5322_v10 = vpop.permute.xlu1 %1797  ;;  %v5328_v12 = vpop.permute.xlu0 %1843 }
 0x20f   : > { %7223 = vst [vmem:[#allocation185_spill] sm:$0xff] %v5322_v10 }
 0x210   : > { %2457 = vrot.lane.b32.xlu1 %v5320_v55, %s3805_s26  ;;  %2455 = vrot.lane.b32.xlu0 %v5326_v62, %s3805_s26 }
 0x212   : > { %v5334_v5 = vpop.permute.xlu1 %1845  ;;  %v5340_v39 = vpop.permute.xlu0 %1891 }
 0x213   : > { %7224 = vst [vmem:[#allocation186_spill] sm:$0xff] %v5334_v5  ;;  %7225 = vst [vmem:[#allocation187_spill] sm:$0xff] %v5340_v39  ;;  %v470_v39 = vld [vmem:[%s4072_s24 + $0x40] sm:$0xff] }
 0x214   : > { %2345 = vrot.lane.b32.xlu1 %v5300_v16, %s3806_s25  ;;  %2299 = vrot.lane.b32.xlu0 %v5338_v35, %s3805_s26 }
 0x216   : > { %v5350_v30 = vpop.permute.xlu1 %1893  ;;  %v5352_v51 = vpop.permute.xlu0 %1963 }
 0x217   : > { %7227 = vst [vmem:[#allocation189_spill] sm:$0xff] %v5350_v30  ;;  %7228 = vst [vmem:[#allocation190_spill] sm:$0xff] %v5352_v51  ;;  %v5486_v51 = vmul.f32 %v5222_v4, %v5222_v4 }
 0x218   : > { %2459 = vrot.lane.b32.xlu1 %v5348_v17, %s3805_s26  ;;  %2391 = vrot.lane.b32.xlu0 %v5292_v45, %s3807_s16  ;;  %v5423_v45 = vmul.f32 %v5086_v48, %v5086_v48 }
 0x219   : > { %7252 = vst [vmem:[#allocation214_spill] sm:$0xff] %v5486_v51 }
 0x21a   : > { %v5358_v37 = vpop.permute.xlu1 %1965  ;;  %v5360_v41 = vpop.permute.xlu0 %2289  ;;  %7241 = vst [vmem:[#allocation203_spill] sm:$0xff] %v5423_v45 }
 0x21b   : > { %7229 = vst [vmem:[#allocation191_spill] sm:$0xff] %v5358_v37 }
 0x21c   : > { %2505 = vrot.lane.b32.xlu1 %v5320_v55, %s3806_s25  ;;  %2503 = vrot.lane.b32.xlu0 %v5326_v62, %s3806_s25 }
 0x21e   : > { %v5366_v26 = vpop.permute.xlu1 %2291  ;;  %v5372_v18 = vpop.permute.xlu0 %1799 }
 0x21f   : > { %7230 = vst [vmem:[#allocation192_spill] sm:$0xff] %v5372_v18 }
 0x220   : > { %2347 = vrot.lane.b32.xlu1 %v5338_v35, %s3806_s25  ;;  %2301 = vrot.lane.b32.xlu0 %v5370_v7, %s3805_s26 }
 0x222   : > { %v5382_v19 = vpop.permute.xlu1 %1801  ;;  %v5384_v59 = vpop.permute.xlu0 %1847 }
 0x223   : > { %7232 = vst [vmem:[#allocation194_spill] sm:$0xff] %v5382_v19  ;;  %7233 = vst [vmem:[#allocation195_spill] sm:$0xff] %v5384_v59 }
 0x224   : > { %2461 = vrot.lane.b32.xlu1 %v5380_v31, %s3805_s26  ;;  %2393 = vrot.lane.b32.xlu0 %v5300_v16, %s3807_s16 }
 0x226   : > { %v5390_v24 = vpop.permute.xlu1 %1849  ;;  %v5392_v11 = vpop.permute.xlu0 %1895 }
 0x227   : > { %7234 = vst [vmem:[#allocation196_spill] sm:$0xff] %v5390_v24  ;;  %7235 = vst [vmem:[#allocation197_spill] sm:$0xff] %v5392_v11 }
 0x228   : > { %2551 = vrot.lane.b32.xlu1 %v5326_v62, %s3807_s16  ;;  %2507 = vrot.lane.b32.xlu0 %v5348_v17, %s3806_s25 }
 0x22a   : > { %v5402_v27 = vpop.permute.xlu1 %1897  ;;  %v5404_v42 = vpop.permute.xlu0 %1967 }
 0x22b   : > { %7237 = vst [vmem:[#allocation199_spill] sm:$0xff] %v5402_v27  ;;  %7238 = vst [vmem:[#allocation200_spill] sm:$0xff] %v5404_v42  ;;  %v5438_v42 = vrot.slane %v4864_v40, %v654_v3 }
 0x22c   : > { %2303 = vrot.lane.b32.xlu1 %v5400_v46, %s3805_s26  ;;  %2553 = vrot.lane.b32.xlu0 %v5320_v55, %s3807_s16 }
 0x22e   : > { %v5410_v25 = vpop.permute.xlu1 %1969  ;;  %v5412_v53 = vpop.permute.xlu0 %1803 }
 0x22f   : > { %7239 = vst [vmem:[#allocation201_spill] sm:$0xff] %v5410_v25  ;;  %7240 = vst [vmem:[#allocation202_spill] sm:$0xff] %v5412_v53  ;;  %v3278_v53 = vpop.f32.mrf.mxu1  ;;  %v5433_v25 = vmul.f32 %v5177_v20, %v5177_v20  ;;  %v1000_v20 = vadd.f32 %v3277_v23, %v5438_v42 }
 0x230   : > { %2395 = vrot.lane.b32.xlu1 %v5338_v35, %s3807_s16  ;;  %2349 = vrot.lane.b32.xlu0 %v5370_v7, %s3806_s25 }
 0x231   : > { %7243 = vst [vmem:[#allocation205_spill] sm:$0xff] %v5433_v25  ;;  %v3279_v19 = vpop.f32.mrf.mxu1 }
 0x232   : > { %v5418_v16 = vpop.permute.xlu1 %1805  ;;  %v5425_v27 = vpop.permute.xlu0 %1851  ;;  %v3280_v60 = vadd.f32 %v3279_v19, %v3278_v53 }
 0x233   : > { %7242 = vst [vmem:[#allocation204_spill] sm:$0xff] %v5425_v27  ;;  %v3373_v27 = vpop.f32.mrf.mxu0  ;;  %v3281_v19 = vpop.f32.mrf.mxu1 }
 0x234   : > { %2509 = vrot.lane.b32.xlu1 %v5380_v31, %s3806_s25  ;;  %2463 = vrot.lane.b32.xlu0 %v5423_v45, %s3805_s26  ;;  %v1005_v23 = vadd.f32 %v3280_v60, %v5438_v42 }
 0x235   : > { %v1124_v13 = vpop.f32.mrf.mxu0  ;;  %v3282_v60 = vpop.f32.mrf.mxu1 }
 0x236   : > { %v5435_v24 = vpop.permute.xlu1 %1853  ;;  %v5440_v48 = vpop.permute.xlu0 %1899  ;;  %v5455_v40 = vadd.f32 %v1124_v13, %v1000_v20  ;;  %v5476_v13 = vadd.f32 %v3373_v27, %v1005_v23 }
 0x237   : > { %7244 = vst [vmem:[#allocation206_spill] sm:$0xff] %v5440_v48  ;;  %v5461_v48 = vmul.f32 %v5103_v14, %v5103_v14  ;;  %v3376_v11 = vpop.f32.mrf.mxu0 }
 0x238   : > { %2305 = vrot.lane.b32.xlu1 %v5433_v25, %s3805_s26  ;;  %2555 = vrot.lane.b32.xlu0 %v5348_v17, %s3807_s16  ;;  %v5472_v53 = vmul.f32 %v5455_v40, %v5455_v40  ;;  %v5492_v27 = vmul.f32 %v5476_v13, %v5476_v13 }
 0x239   : > { %7247 = vst [vmem:[#allocation209_spill] sm:$0xff] %v5461_v48 }
 0x23a   : > { %v5446_v58 = vpop.permute.xlu1 %1901  ;;  %v5449_v37 = vpop.permute.xlu0 %1971  ;;  %7249 = vst [vmem:[#allocation211_spill] sm:$0xff] %v5472_v53  ;;  %7254 = vst [vmem:[#allocation216_spill] sm:$0xff] %v5492_v27 }
 0x23b   : > { %7245 = vst [vmem:[#allocation207_spill] sm:$0xff] %v5449_v37  ;;  %v3283_v37 = vadd.f32 %v3282_v60, %v3281_v19  ;;  %v1134_v60 = vpop.f32.mrf.mxu0 }
 0x23c   : > { %2397 = vrot.lane.b32.xlu1 %v5370_v7, %s3807_s16  ;;  %2351 = vrot.lane.b32.xlu0 %v5400_v46, %s3806_s25 }
 0x23d   : > { %v1010_v19 = vadd.f32 %v3283_v37, %v5438_v42  ;;  %v5515_v37 = vmul.f32 %v5150_v54, %v5150_v54 }
 0x23e   : > { %v5457_v3 = vpop.permute.xlu1 %1973  ;;  %v5464_v47 = vpop.permute.xlu0 %1807 }
 0x23f   : > { %7246 = vst [vmem:[#allocation208_spill] sm:$0xff] %v5457_v3  ;;  %7248 = vst [vmem:[#allocation210_spill] sm:$0xff] %v5464_v47 }
 0x240   : > { %2511 = vrot.lane.b32.xlu1 %v5423_v45, %s3806_s25  ;;  %2465 = vrot.lane.b32.xlu0 %v5461_v48, %s3805_s26 }
 0x242   : > { %v5474_v20 = vpop.permute.xlu1 %1809  ;;  %v5478_v14 = vpop.permute.xlu0 %1855 }
 0x243   : > { %7250 = vst [vmem:[#allocation212_spill] sm:$0xff] %v5474_v20  ;;  %7251 = vst [vmem:[#allocation213_spill] sm:$0xff] %v5478_v14 }
 0x244   : > { %2623 = vrot.lane.b32.xlu1 %v5472_v53, %s3805_s26  ;;  %2557 = vrot.lane.b32.xlu0 %v5380_v31, %s3807_s16 }
 0x246   : > { %v5488_v59 = vpop.permute.xlu1 %1857  ;;  %v5494_v23 = vpop.permute.xlu0 %1903 }
 0x247   : > { %7253 = vst [vmem:[#allocation215_spill] sm:$0xff] %v5488_v59  ;;  %7255 = vst [vmem:[#allocation217_spill] sm:$0xff] %v5494_v23  ;;  %v5507_v59 = vadd.f32 %v1134_v60, %v1010_v19 }
 0x248   : > { %2307 = vrot.lane.b32.xlu1 %v5486_v51, %s3805_s26  ;;  %2625 = vrot.lane.b32.xlu0 %v5492_v27, %s3805_s26 }
 0x24a   : > { %v5501_v20 = vpop.permute.xlu1 %1905  ;;  %v5503_v4 = vpop.permute.xlu0 %1975 }
 0x24b   : > { %7256 = vst [vmem:[#allocation218_spill] sm:$0xff] %v5501_v20  ;;  %7257 = vst [vmem:[#allocation219_spill] sm:$0xff] %v5503_v4  ;;  %v5521_v20 = vmul.f32 %v5507_v59, %v5507_v59 }
 0x24c   : > { %2399 = vrot.lane.b32.xlu1 %v5400_v46, %s3807_s16  ;;  %2353 = vrot.lane.b32.xlu0 %v5433_v25, %s3806_s25 }
 0x24d   : > { %7260 = vst [vmem:[#allocation222_spill] sm:$0xff] %v5521_v20 }
 0x24e   : > { %v5511_v31 = vpop.permute.xlu1 %1977  ;;  %v5517_v23 = vpop.permute.xlu0 %1811 }
 0x24f   : > { %7258 = vst [vmem:[#allocation220_spill] sm:$0xff] %v5511_v31  ;;  %7259 = vst [vmem:[#allocation221_spill] sm:$0xff] %v5517_v23  ;;  %v3284_v31 = vpop.f32.mrf.mxu1 }
 0x250   : > { %2513 = vrot.lane.b32.xlu1 %v5461_v48, %s3806_s25  ;;  %2467 = vrot.lane.b32.xlu0 %v5515_v37, %s3805_s26 }
 0x251   : > { %v3285_v4 = vpop.f32.mrf.mxu1 }
 0x252   : > { %v5527_v19 = vpop.permute.xlu1 %1813  ;;  %v5529_v60 = vpop.permute.xlu0 %1859  ;;  %v3286_v14 = vadd.f32 %v3285_v4, %v3284_v31 }
 0x253   : > { %7261 = vst [vmem:[#allocation223_spill] sm:$0xff] %v5527_v19  ;;  %7262 = vst [vmem:[#allocation224_spill] sm:$0xff] %v5529_v60  ;;  %v5547_v60 = vmul.f32 %v5233_v0, %v5233_v0 }
 0x254   : > { %2627 = vrot.lane.b32.xlu1 %v5521_v20, %s3805_s26  ;;  %2559 = vrot.lane.b32.xlu0 %v5423_v45, %s3807_s16 }
 0x255   : > { %7266 = vst [vmem:[#allocation228_spill] sm:$0xff] %v5547_v60 }
 0x256   : > { %v5535_v54 = vpop.permute.xlu1 %1861  ;;  %v5537_v23 = vpop.permute.xlu0 %1907 }
 0x257   : > { %7263 = vst [vmem:[#allocation225_spill] sm:$0xff] %v5535_v54  ;;  %7264 = vst [vmem:[#allocation226_spill] sm:$0xff] %v5537_v23  ;;  %v5557_v54 = vmul.f32 %v5165_v44, %v5165_v44 }
 0x258   : > { %2673 = vrot.lane.b32.xlu1 %v5492_v27, %s3806_s25  ;;  %2671 = vrot.lane.b32.xlu0 %v5472_v53, %s3806_s25 }
 0x25a   : > { %v5543_v19 = vpop.permute.xlu1 %1909  ;;  %v5549_v17 = vpop.permute.xlu0 %1979 }
 0x25b   : > { %7265 = vst [vmem:[#allocation227_spill] sm:$0xff] %v5543_v19  ;;  %7267 = vst [vmem:[#allocation229_spill] sm:$0xff] %v5549_v17  ;;  %v1015_v19 = vadd.f32 %v3286_v14, %v5438_v42  ;;  %v3287_v17 = vpop.f32.mrf.mxu1 }
 0x25c   : > { %2355 = vrot.lane.b32.xlu1 %v5486_v51, %s3806_s25  ;;  %2309 = vrot.lane.b32.xlu0 %v5547_v60, %s3805_s26 }
 0x25d   : > { %v5570_v0 = vadd.f32 %v3376_v11, %v1015_v19 }
 0x25e   : > { %v5559_v23 = vpop.permute.xlu1 %2337  ;;  %v5562_v45 = vpop.permute.xlu0 %1815 }
 0x25f   : > { %7268 = vst [vmem:[#allocation230_spill] sm:$0xff] %v5562_v45  ;;  %v5582_v14 = vmul.f32 %v5570_v0, %v5570_v0 }
 0x260   : > { %2469 = vrot.lane.b32.xlu1 %v5557_v54, %s3805_s26  ;;  %2401 = vrot.lane.b32.xlu0 %v5433_v25, %s3807_s16 }
 0x261   : > { %7272 = vst [vmem:[#allocation234_spill] sm:$0xff] %v5582_v14 }
 0x262   : > { %v5568_v31 = vpop.permute.xlu1 %1817  ;;  %v5572_v4 = vpop.permute.xlu0 %1863 }
 0x263   : > { %7269 = vst [vmem:[#allocation231_spill] sm:$0xff] %v5568_v31  ;;  %7270 = vst [vmem:[#allocation232_spill] sm:$0xff] %v5572_v4  ;;  %v3288_v4 = vpop.f32.mrf.mxu1 }
 0x264   : > { %2561 = vrot.lane.b32.xlu1 %v5461_v48, %s3807_s16  ;;  %2515 = vrot.lane.b32.xlu0 %v5515_v37, %s3806_s25 }
 0x266   : > { %v5578_v44 = vpop.permute.xlu1 %1865  ;;  %v5584_v45 = vpop.permute.xlu0 %1911 }
 0x267   : > { %7271 = vst [vmem:[#allocation233_spill] sm:$0xff] %v5578_v44  ;;  %7273 = vst [vmem:[#allocation235_spill] sm:$0xff] %v5584_v45  ;;  %v3289_v44 = vadd.f32 %v3288_v4, %v3287_v17  ;;  %v3379_v45 = vpop.f32.mrf.mxu0 }
 0x268   : > { %2675 = vrot.lane.b32.xlu1 %v5521_v20, %s3806_s25  ;;  %2629 = vrot.lane.b32.xlu0 %v5582_v14, %s3805_s26 }
 0x269   : > { %v1144_v25 = vpop.f32.mrf.mxu0 }
 0x26a   : > { %v5590_v11 = vpop.permute.xlu1 %1913  ;;  %v5592_v19 = vpop.permute.xlu0 %2335 }
 0x26b   : > { %7274 = vst [vmem:[#allocation236_spill] sm:$0xff] %v5590_v11  ;;  %v1020_v11 = vadd.f32 %v3289_v44, %v5438_v42  ;;  %v5621_v44 = vmul.f32 %v5212_v33, %v5212_v33 }
 0x26c   : > { %2721 = vrot.lane.b32.xlu1 %v5492_v27, %s3807_s16  ;;  %2719 = vrot.lane.b32.xlu0 %v5472_v53, %s3807_s16 }
 0x26d   : > { %v5613_v4 = vadd.f32 %v1144_v25, %v1020_v11  ;;  %7278 = vst [vmem:[#allocation240_spill] sm:$0xff] %v5621_v44  ;;  %v3290_v11 = vpop.f32.mrf.mxu1 }
 0x26e   : > { %v5598_v31 = vpop.permute.xlu1 %2339  ;;  %v5600_v48 = vpop.permute.xlu0 %2293 }
 0x26f   : > { %7275 = vst [vmem:[#allocation237_spill] sm:$0xff] %v5598_v31  ;;  %7276 = vst [vmem:[#allocation238_spill] sm:$0xff] %v5600_v48  ;;  %v5627_v53 = vmul.f32 %v5613_v4, %v5613_v4  ;;  %v473_v31 = vld [vmem:[%s4072_s24 + $0x58] sm:$0xff] }
 0x270   : > { %2013 = vrot.lane.b32.xlu1 %v4939_v61, %s3806_s25  ;;  %2011 = vrot.lane.b32.xlu0 %v4926_v15, %s3806_s25 }
 0x271   : > { %7280 = vst [vmem:[#allocation242_spill] sm:$0xff] %v5627_v53 }
 0x272   : > { %v5607_v47 = vpop.permute.xlu1 %2385  ;;  %v5609_v17 = vpop.permute.xlu0 %2383 }
 0x274   : > { %2403 = vrot.lane.b32.xlu1 %v5486_v51, %s3807_s16  ;;  %2357 = vrot.lane.b32.xlu0 %v5547_v60, %s3806_s25 }
 0x276   : > { %v5617_v27 = vpop.permute.xlu1 %2341  ;;  %v5623_v48 = vpop.permute.xlu0 %2295 }
 0x277   : > { %7277 = vst [vmem:[#allocation239_spill] sm:$0xff] %v5617_v27  ;;  %7279 = vst [vmem:[#allocation241_spill] sm:$0xff] %v5623_v48  ;;  %v3291_v48 = vpop.f32.mrf.mxu1 }
 0x278   : > { %2517 = vrot.lane.b32.xlu1 %v5557_v54, %s3806_s25  ;;  %2471 = vrot.lane.b32.xlu0 %v5621_v44, %s3805_s26 }
 0x27a   : > { %v5633_v25 = vpop.permute.xlu1 %2297  ;;  %v5635_v51 = vpop.permute.xlu0 %2387 }
 0x27b   : > { %7281 = vst [vmem:[#allocation243_spill] sm:$0xff] %v5633_v25  ;;  %7282 = vst [vmem:[#allocation244_spill] sm:$0xff] %v5635_v51  ;;  %v3292_v25 = vadd.f32 %v3291_v48, %v3290_v11 }
 0x27c   : > { %2631 = vrot.lane.b32.xlu1 %v5627_v53, %s3805_s26  ;;  %2563 = vrot.lane.b32.xlu0 %v5515_v37, %s3807_s16 }
 0x27e   : > { %v5641_v33 = vpop.permute.xlu1 %2389  ;;  %v5643_v27 = vpop.permute.xlu0 %2343 }
 0x27f   : > { %7283 = vst [vmem:[#allocation245_spill] sm:$0xff] %v5641_v33  ;;  %7284 = vst [vmem:[#allocation246_spill] sm:$0xff] %v5643_v27  ;;  %v1025_v33 = vadd.f32 %v3292_v25, %v5438_v42  ;;  %v3293_v25 = vpop.f32.mrf.mxu1 }
 0x280   : > { %2723 = vrot.lane.b32.xlu1 %v5521_v20, %s3807_s16  ;;  %2677 = vrot.lane.b32.xlu0 %v5582_v14, %s3806_s25  ;;  %v5672_v20 = vmul.f32 %v5052_v9, %v5052_v9 }
 0x281   : > { %v5666_v48 = vadd.f32 %v3379_v45, %v1025_v33 }
 0x282   : > { %v5649_v43 = vpop.permute.xlu1 %2457  ;;  %v5651_v18 = vpop.permute.xlu0 %2455  ;;  %7289 = vst [vmem:[#allocation251_spill] sm:$0xff] %v5672_v20 }
 0x283   : > { %7285 = vst [vmem:[#allocation247_spill] sm:$0xff] %v5649_v43  ;;  %7286 = vst [vmem:[#allocation248_spill] sm:$0xff] %v5651_v18 }
 0x284   : > { %2059 = vrot.lane.b32.xlu1 %v4926_v15, %s3807_s16  ;;  %2015 = vrot.lane.b32.xlu0 %v5029_v34, %s3806_s25 }
 0x286   : > { %v5658_v27 = vpop.permute.xlu1 %2345  ;;  %v5660_v32 = vpop.permute.xlu0 %2299 }
 0x287   : > { %7287 = vst [vmem:[#allocation249_spill] sm:$0xff] %v5658_v27  ;;  %v5682_v27 = vmul.f32 %v5666_v48, %v5666_v48 }
 0x288   : > { %2405 = vrot.lane.b32.xlu1 %v5547_v60, %s3807_s16  ;;  %2061 = vrot.lane.b32.xlu0 %v4939_v61, %s3807_s16  ;;  %v3382_v61 = vpop.f32.mrf.mxu0 }
 0x289   : > { %7291 = vst [vmem:[#allocation253_spill] sm:$0xff] %v5682_v27 }
 0x28a   : > { %v5668_v11 = vpop.permute.xlu1 %2459  ;;  %v5674_v15 = vpop.permute.xlu0 %2391 }
 0x28b   : > { %7288 = vst [vmem:[#allocation250_spill] sm:$0xff] %v5668_v11  ;;  %7290 = vst [vmem:[#allocation252_spill] sm:$0xff] %v5674_v15  ;;  %v3294_v11 = vpop.f32.mrf.mxu1  ;;  %v1154_v43 = vpop.f32.mrf.mxu0 }
 0x28c   : > { %2519 = vrot.lane.b32.xlu1 %v5621_v44, %s3806_s25  ;;  %2473 = vrot.lane.b32.xlu0 %v5672_v20, %s3805_s26  ;;  %v3295_v15 = vadd.f32 %v3294_v11, %v3293_v25 }
 0x28e   : > { %v5684_v45 = vpop.permute.xlu1 %2505  ;;  %v5686_v33 = vpop.permute.xlu0 %2503 }
 0x28f   : > { %7292 = vst [vmem:[#allocation254_spill] sm:$0xff] %v5684_v45  ;;  %7293 = vst [vmem:[#allocation255_spill] sm:$0xff] %v5686_v33  ;;  %v1030_v45 = vadd.f32 %v3295_v15, %v5438_v42  ;;  %v5715_v15 = vmul.f32 %v5070_v6, %v5070_v6  ;;  %v464_v33 = vld [vmem:[%s4072_s24 + $0x10] sm:$0xff] }
 0x290   : > { %2633 = vrot.lane.b32.xlu1 %v5682_v27, %s3805_s26  ;;  %2565 = vrot.lane.b32.xlu0 %v5557_v54, %s3807_s16 }
 0x291   : > { %v5707_v25 = vadd.f32 %v1154_v43, %v1030_v45  ;;  %7297 = vst [vmem:[#allocation259_spill] sm:$0xff] %v5715_v15  ;;  %v3296_v45 = vpop.f32.mrf.mxu1 }
 0x292   : > { %v5692_v60 = vpop.permute.xlu1 %2347  ;;  %v5694_v30 = vpop.permute.xlu0 %2301 }
 0x294   : > { %2725 = vrot.lane.b32.xlu1 %v5582_v14, %s3807_s16  ;;  %2679 = vrot.lane.b32.xlu0 %v5627_v53, %s3806_s25 }
 0x296   : > { %v5701_v3 = vpop.permute.xlu1 %2461  ;;  %v5703_v11 = vpop.permute.xlu0 %2393 }
 0x297   : > { %7294 = vst [vmem:[#allocation256_spill] sm:$0xff] %v5701_v3  ;;  %7295 = vst [vmem:[#allocation257_spill] sm:$0xff] %v5703_v11  ;;  %v5721_v11 = vmul.f32 %v5707_v25, %v5707_v25 }
 0x298   : > { %2063 = vrot.lane.b32.xlu1 %v5029_v34, %s3807_s16  ;;  %2017 = vrot.lane.b32.xlu0 %v5050_v21, %s3806_s25 }
 0x29a   : > { %v5711_v46 = vpop.permute.xlu1 %2551  ;;  %v5717_v14 = vpop.permute.xlu0 %2507 }
 0x29b   : > { %7296 = vst [vmem:[#allocation258_spill] sm:$0xff] %v5711_v46  ;;  %7298 = vst [vmem:[#allocation260_spill] sm:$0xff] %v5717_v14  ;;  %v3297_v14 = vpop.f32.mrf.mxu1 }
 0x29c   : > { %2521 = vrot.lane.b32.xlu1 %v5672_v20, %s3806_s25  ;;  %2475 = vrot.lane.b32.xlu0 %v5715_v15, %s3805_s26 }
 0x29e   : > { %v5727_v43 = vpop.permute.xlu1 %2303  ;;  %v5729_v3 = vpop.permute.xlu0 %2553 }
 0x29f   : > { %7299 = vst [vmem:[#allocation261_spill] sm:$0xff] %v5727_v43  ;;  %7300 = vst [vmem:[#allocation262_spill] sm:$0xff] %v5729_v3  ;;  %v3298_v43 = vadd.f32 %v3297_v14, %v3296_v45  ;;  %v467_v3 = vld [vmem:[%s4072_s24 + $0x28] sm:$0xff]  ;;  %v5760_v14 = vmul.f32 %v5455_v40, %v464_v33  ;;  %v3299_v33 = vpop.f32.mrf.mxu1 }
 0x2a0   : > { %2635 = vrot.lane.b32.xlu1 %v5721_v11, %s3805_s26  ;;  %2567 = vrot.lane.b32.xlu0 %v5621_v44, %s3807_s16  ;;  %v5754_v44 = vmul.f32 %v5476_v13, %v467_v3  ;;  %v5774_v3 = vmul.f32 %v5083_v8, %v5083_v8 }
 0x2a1   : > { %7305 = vst [vmem:[#allocation267_spill] sm:$0xff] %v5760_v14 }
 0x2a2   : > { %v5735_v34 = vpop.permute.xlu1 %2395  ;;  %v5737_v46 = vpop.permute.xlu0 %2349  ;;  %7303 = vst [vmem:[#allocation265_spill] sm:$0xff] %v5754_v44  ;;  %7307 = vst [vmem:[#allocation269_spill] sm:$0xff] %v5774_v3 }
 0x2a4   : > { %2727 = vrot.lane.b32.xlu1 %v5627_v53, %s3807_s16  ;;  %2681 = vrot.lane.b32.xlu0 %v5682_v27, %s3806_s25  ;;  %v1035_v53 = vadd.f32 %v3298_v43, %v5438_v42 }
 0x2a6   : > { %v5743_v51 = vpop.permute.xlu1 %2509  ;;  %v5746_v5 = vpop.permute.xlu0 %2463 }
 0x2a7   : > { %7301 = vst [vmem:[#allocation263_spill] sm:$0xff] %v5743_v51  ;;  %7302 = vst [vmem:[#allocation264_spill] sm:$0xff] %v5746_v5  ;;  %v5768_v5 = vadd.f32 %v3382_v61, %v1035_v53 }
 0x2a8   : > { %2065 = vrot.lane.b32.xlu1 %v5050_v21, %s3807_s16  ;;  %2019 = vrot.lane.b32.xlu0 %v5107_v38, %s3806_s25 }
 0x2a9   : > { %v5784_v40 = vmul.f32 %v5768_v5, %v5768_v5 }
 0x2aa   : > { %v5757_v55 = vpop.permute.xlu1 %2305  ;;  %v5762_v45 = vpop.permute.xlu0 %2555 }
 0x2ab   : > { %7304 = vst [vmem:[#allocation266_spill] sm:$0xff] %v5757_v55  ;;  %7306 = vst [vmem:[#allocation268_spill] sm:$0xff] %v5762_v45  ;;  %v3300_v55 = vpop.f32.mrf.mxu1 }
 0x2ac   : > { %2133 = vrot.lane.b32.xlu1 %v5754_v44, %s3805_s26  ;;  %2131 = vrot.lane.b32.xlu0 %v5760_v14, %s3805_s26  ;;  %v3301_v45 = vadd.f32 %v3300_v55, %v3299_v33  ;;  %v5815_v55 = vmul.f32 %v5507_v59, %v470_v39 }
 0x2ae   : > { %v5770_v21 = vpop.permute.xlu1 %2397  ;;  %v5776_v13 = vpop.permute.xlu0 %2351  ;;  %7316 = vst [vmem:[#allocation278_spill] sm:$0xff] %v5815_v55 }
 0x2af   : > { %7308 = vst [vmem:[#allocation270_spill] sm:$0xff] %v5776_v13 }
 0x2b0   : > { %2523 = vrot.lane.b32.xlu1 %v5715_v15, %s3806_s25  ;;  %2477 = vrot.lane.b32.xlu0 %v5774_v3, %s3805_s26 }
 0x2b2   : > { %v5786_v61 = vpop.permute.xlu1 %2511  ;;  %v5788_v53 = vpop.permute.xlu0 %2465 }
 0x2b3   : > { %7309 = vst [vmem:[#allocation271_spill] sm:$0xff] %v5786_v61  ;;  %7310 = vst [vmem:[#allocation272_spill] sm:$0xff] %v5788_v53  ;;  %v3385_v53 = vpop.f32.mrf.mxu0 }
 0x2b4   : > { %2637 = vrot.lane.b32.xlu1 %v5784_v40, %s3805_s26  ;;  %2569 = vrot.lane.b32.xlu0 %v5672_v20, %s3807_s16  ;;  %v1040_v20 = vadd.f32 %v3301_v45, %v5438_v42 }
 0x2b6   : > { %v5794_v43 = vpop.permute.xlu1 %2623  ;;  %v5796_v51 = vpop.permute.xlu0 %2557 }
 0x2b7   : > { %7311 = vst [vmem:[#allocation273_spill] sm:$0xff] %v5794_v43  ;;  %7312 = vst [vmem:[#allocation274_spill] sm:$0xff] %v5796_v51  ;;  %v1164_v51 = vpop.f32.mrf.mxu0 }
 0x2b8   : > { %2729 = vrot.lane.b32.xlu1 %v5682_v27, %s3807_s16  ;;  %2683 = vrot.lane.b32.xlu0 %v5721_v11, %s3806_s25 }
 0x2ba   : > { %v5802_v61 = vpop.permute.xlu1 %2307  ;;  %v5804_v13 = vpop.permute.xlu0 %2625 }
 0x2bb   : > { %7313 = vst [vmem:[#allocation275_spill] sm:$0xff] %v5802_v61  ;;  %7314 = vst [vmem:[#allocation276_spill] sm:$0xff] %v5804_v13  ;;  %v5821_v61 = vadd.f32 %v1164_v51, %v1040_v20  ;;  %v3302_v51 = vpop.f32.mrf.mxu1 }
 0x2bc   : > { %2067 = vrot.lane.b32.xlu1 %v5107_v38, %s3807_s16  ;;  %2021 = vrot.lane.b32.xlu0 %v5124_v28, %s3806_s25 }
 0x2bd   : > { %v5831_v13 = vmul.f32 %v5821_v61, %v5821_v61 }
 0x2be   : > { %v5812_v27 = vpop.permute.xlu1 %2399  ;;  %v5817_v33 = vpop.permute.xlu0 %2353 }
 0x2bf   : > { %7315 = vst [vmem:[#allocation277_spill] sm:$0xff] %v5812_v27  ;;  %7317 = vst [vmem:[#allocation279_spill] sm:$0xff] %v5817_v33 }
 0x2c0   : > { %2179 = vrot.lane.b32.xlu1 %v5760_v14, %s3806_s25  ;;  %2135 = vrot.lane.b32.xlu0 %v5815_v55, %s3805_s26  ;;  %7319 = vst [vmem:[#allocation281_spill] sm:$0xff] %v5831_v13 }
 0x2c2   : > { %v5825_v45 = vpop.permute.xlu1 %2513  ;;  %v5827_v38 = vpop.permute.xlu0 %2467 }
 0x2c3   : > { %7318 = vst [vmem:[#allocation280_spill] sm:$0xff] %v5825_v45  ;;  %v3303_v45 = vpop.f32.mrf.mxu1 }
 0x2c4   : > { %2525 = vrot.lane.b32.xlu1 %v5774_v3, %s3806_s25  ;;  %2181 = vrot.lane.b32.xlu0 %v5754_v44, %s3806_s25 }
 0x2c5   : > { %v3305_v27 = vpop.f32.mrf.mxu1 }
 0x2c6   : > { %v5837_v59 = vpop.permute.xlu1 %2627  ;;  %v5839_v39 = vpop.permute.xlu0 %2559 }
 0x2c7   : > { %7320 = vst [vmem:[#allocation282_spill] sm:$0xff] %v5837_v59  ;;  %7321 = vst [vmem:[#allocation283_spill] sm:$0xff] %v5839_v39  ;;  %v3304_v59 = vadd.f32 %v3303_v45, %v3302_v51  ;;  %v3306_v51 = vpop.f32.mrf.mxu1 }
 0x2c8   : > { %2639 = vrot.lane.b32.xlu1 %v5831_v13, %s3805_s26  ;;  %2571 = vrot.lane.b32.xlu0 %v5715_v15, %s3807_s16 }
 0x2c9   : > { %v1045_v15 = vadd.f32 %v3304_v59, %v5438_v42  ;;  %v3308_v59 = vpop.f32.mrf.mxu1 }
 0x2ca   : > { %v5845_v20 = vpop.permute.xlu1 %2673  ;;  %v5847_v33 = vpop.permute.xlu0 %2671 }
 0x2cb   : > { %7322 = vst [vmem:[#allocation284_spill] sm:$0xff] %v5845_v20  ;;  %7323 = vst [vmem:[#allocation285_spill] sm:$0xff] %v5847_v33  ;;  %v5866_v33 = vmul.f32 %v5570_v0, %v473_v31 }
 0x2cc   : > { %2731 = vrot.lane.b32.xlu1 %v5721_v11, %s3807_s16  ;;  %2685 = vrot.lane.b32.xlu0 %v5784_v40, %s3806_s25 }
 0x2cd   : > { %7326 = vst [vmem:[#allocation288_spill] sm:$0xff] %v5866_v33 }
 0x2ce   : > { %v5853_v43 = vpop.permute.xlu1 %2355  ;;  %v5855_v39 = vpop.permute.xlu0 %2309 }
 0x2cf   : > { %7324 = vst [vmem:[#allocation286_spill] sm:$0xff] %v5853_v43  ;;  %7325 = vst [vmem:[#allocation287_spill] sm:$0xff] %v5855_v39  ;;  %v5874_v43 = vadd.f32 %v3385_v53, %v1045_v15  ;;  %v3309_v53 = vpop.f32.mrf.mxu1 }
 0x2d0   : > { %2069 = vrot.lane.b32.xlu1 %v5124_v28, %s3807_s16  ;;  %2023 = vrot.lane.b32.xlu0 %v5171_v56, %s3806_s25 }
 0x2d1   : > { %v5886_v31 = vmul.f32 %v5874_v43, %v5874_v43 }
 0x2d2   : > { %v5863_v20 = vpop.permute.xlu1 %2469  ;;  %v5868_v45 = vpop.permute.xlu0 %2401 }
 0x2d3   : > { %7327 = vst [vmem:[#allocation289_spill] sm:$0xff] %v5868_v45  ;;  %7329 = vst [vmem:[#allocation291_spill] sm:$0xff] %v5886_v31 }
 0x2d4   : > { %2183 = vrot.lane.b32.xlu1 %v5815_v55, %s3806_s25  ;;  %2137 = vrot.lane.b32.xlu0 %v5866_v33, %s3805_s26 }
 0x2d6   : > { %v5876_v39 = vpop.permute.xlu1 %2561  ;;  %v5878_v10 = vpop.permute.xlu0 %2515 }
 0x2d7   : > { %7328 = vst [vmem:[#allocation290_spill] sm:$0xff] %v5876_v39  ;;  %v3307_v39 = vadd.f32 %v3306_v51, %v3305_v27 }
 0x2d8   : > { %2229 = vrot.lane.b32.xlu1 %v5754_v44, %s3807_s16  ;;  %2227 = vrot.lane.b32.xlu0 %v5760_v14, %s3807_s16  ;;  %v3388_v14 = vpop.f32.mrf.mxu1 }
 0x2da   : > { %v5888_v0 = vpop.permute.xlu1 %2675  ;;  %v5890_v15 = vpop.permute.xlu0 %2629 }
 0x2db   : > { %7330 = vst [vmem:[#allocation292_spill] sm:$0xff] %v5888_v0  ;;  %7331 = vst [vmem:[#allocation293_spill] sm:$0xff] %v5890_v15  ;;  %v1050_v0 = vadd.f32 %v3307_v39, %v5438_v42  ;;  %v1174_v18 = vpop.f32.mrf.mxu1 }
 0x2dc   : > { %2641 = vrot.lane.b32.xlu1 %v5886_v31, %s3805_s26  ;;  %2573 = vrot.lane.b32.xlu0 %v5774_v3, %s3807_s16  ;;  %v476_v3 = vld [vmem:[%s4072_s24 + $0x70] sm:$0xff] }
 0x2dd   : > { %v5914_v27 = vadd.f32 %v1174_v18, %v1050_v0 }
 0x2de   : > { %v5896_v45 = vpop.permute.xlu1 %2721  ;;  %v5898_v44 = vpop.permute.xlu0 %2719 }
 0x2df   : > { %7332 = vst [vmem:[#allocation294_spill] sm:$0xff] %v5896_v45  ;;  %7333 = vst [vmem:[#allocation295_spill] sm:$0xff] %v5898_v44  ;;  %v5919_v45 = vmul.f32 %v5613_v4, %v476_v3 }
 0x2e0   : > { %2733 = vrot.lane.b32.xlu1 %v5784_v40, %s3807_s16  ;;  %2687 = vrot.lane.b32.xlu0 %v5831_v13, %s3806_s25 }
 0x2e1   : > { %7337 = vst [vmem:[#allocation299_spill] sm:$0xff] %v5919_v45 }
 0x2e2   : > { %v5904_v15 = vpop.permute.xlu1 %2013  ;;  %v5907_v57 = vpop.permute.xlu0 %2011 }
 0x2e3   : > { %7334 = vst [vmem:[#allocation296_spill] sm:$0xff] %v5904_v15  ;;  %7335 = vst [vmem:[#allocation297_spill] sm:$0xff] %v5907_v57  ;;  %v5929_v15 = vmul.f32 %v5914_v27, %v5914_v27  ;;  %v3310_v57 = vadd.f32 %v3309_v53, %v3308_v59 }
 0x2e4   : > { %2071 = vrot.lane.b32.xlu1 %v5171_v56, %s3807_s16  ;;  %2025 = vrot.lane.b32.xlu0 %v5186_v36, %s3806_s25 }
 0x2e5   : > { %7338 = vst [vmem:[#allocation300_spill] sm:$0xff] %v5929_v15 }
 0x2e6   : > { %v5916_v51 = vpop.permute.xlu1 %2403  ;;  %v5921_v39 = vpop.permute.xlu0 %2357 }
 0x2e7   : > { %7336 = vst [vmem:[#allocation298_spill] sm:$0xff] %v5916_v51  ;;  %v490_v51 = vld [vmem:[%s4072_s24 + $0xe0] sm:$0xff] }
 0x2e8   : > { %2185 = vrot.lane.b32.xlu1 %v5866_v33, %s3806_s25  ;;  %2139 = vrot.lane.b32.xlu0 %v5919_v45, %s3805_s26  ;;  %v5951_v44 = vmul.f32 %v5052_v9, %v490_v51 }
 0x2ea   : > { %v5931_v18 = vpop.permute.xlu1 %2517  ;;  %v5933_v0 = vpop.permute.xlu0 %2471  ;;  %7342 = vst [vmem:[#allocation304_spill] sm:$0xff] %v5951_v44 }
 0x2eb   : > { %7339 = vst [vmem:[#allocation301_spill] sm:$0xff] %v5933_v0  ;;  %v479_v0 = vld [vmem:[%s4072_s24 + $0x88] sm:$0xff] }
 0x2ec   : > { %2643 = vrot.lane.b32.xlu1 %v5929_v15, %s3805_s26  ;;  %2231 = vrot.lane.b32.xlu0 %v5815_v55, %s3807_s16 }
 0x2ee   : > { %v5939_v4 = vpop.permute.xlu1 %2631  ;;  %v5941_v3 = vpop.permute.xlu0 %2563 }
 0x2ef   : > { %7340 = vst [vmem:[#allocation302_spill] sm:$0xff] %v5939_v4  ;;  %v5961_v4 = vmul.f32 %v5666_v48, %v479_v0 }
 0x2f0   : > { %2735 = vrot.lane.b32.xlu1 %v5831_v13, %s3807_s16  ;;  %2689 = vrot.lane.b32.xlu0 %v5886_v31, %s3806_s25 }
 0x2f1   : > { %7344 = vst [vmem:[#allocation306_spill] sm:$0xff] %v5961_v4 }
 0x2f2   : > { %v5948_v56 = vpop.permute.xlu1 %2723  ;;  %v5954_v55 = vpop.permute.xlu0 %2677 }
 0x2f3   : > { %7341 = vst [vmem:[#allocation303_spill] sm:$0xff] %v5948_v56  ;;  %7343 = vst [vmem:[#allocation305_spill] sm:$0xff] %v5954_v55  ;;  %v1055_v56 = vadd.f32 %v3310_v57, %v5438_v42  ;;  %v493_v42 = vld [vmem:[%s4072_s24 + $0xf8] sm:$0xff] }
 0x2f4   : > { %2027 = vrot.lane.b32.xlu1 %v5226_v49, %s3806_s25  ;;  %1981 = vrot.lane.b32.xlu0 %v5951_v44, %s3805_s26 }
 0x2f5   : > { %v5974_v53 = vadd.f32 %v3388_v14, %v1055_v56  ;;  %v5996_v56 = vmul.f32 %v5070_v6, %v493_v42 }
 0x2f6   : > { %v5963_v13 = vpop.permute.xlu1 %2059  ;;  %v5966_v9 = vpop.permute.xlu0 %2015 }
 0x2f7   : > { %v5987_v48 = vmul.f32 %v5974_v53, %v5974_v53  ;;  %7347 = vst [vmem:[#allocation309_spill] sm:$0xff] %v5996_v56 }
 0x2f8   : > { %2141 = vrot.lane.b32.xlu1 %v5961_v4, %s3805_s26  ;;  %2073 = vrot.lane.b32.xlu0 %v5186_v36, %s3807_s16 }
 0x2f9   : > { %7345 = vst [vmem:[#allocation307_spill] sm:$0xff] %v5987_v48 }
 0x2fa   : > { %v5972_v59 = vpop.permute.xlu1 %2405  ;;  %v5976_v51 = vpop.permute.xlu0 %2061 }
 0x2fc   : > { %2233 = vrot.lane.b32.xlu1 %v5866_v33, %s3807_s16  ;;  %2187 = vrot.lane.b32.xlu0 %v5919_v45, %s3806_s25 }
 0x2fe   : > { %v5982_v57 = vpop.permute.xlu1 %2519  ;;  %v5989_v0 = vpop.permute.xlu0 %2473 }
 0x2ff   : > { %7346 = vst [vmem:[#allocation308_spill] sm:$0xff] %v5989_v0  ;;  %v482_v0 = vld [vmem:[%s4072_s24 + $0xa0] sm:$0xff] }
 0x300   : > { %2691 = vrot.lane.b32.xlu1 %v5929_v15, %s3806_s25  ;;  %2645 = vrot.lane.b32.xlu0 %v5987_v48, %s3805_s26  ;;  %v6018_v42 = vmul.f32 %v5707_v25, %v482_v0 }
 0x302   : > { %v5998_v14 = vpop.permute.xlu1 %2633  ;;  %v6000_v36 = vpop.permute.xlu0 %2565 }
 0x303   : > { %7348 = vst [vmem:[#allocation310_spill] sm:$0xff] %v5998_v14 }
 0x304   : > { %1983 = vrot.lane.b32.xlu1 %v5996_v56, %s3805_s26  ;;  %2737 = vrot.lane.b32.xlu0 %v5886_v31, %s3807_s16 }
 0x306   : > { %v6006_v33 = vpop.permute.xlu1 %2725  ;;  %v6008_v55 = vpop.permute.xlu0 %2679 }
 0x307   : > { %7349 = vst [vmem:[#allocation311_spill] sm:$0xff] %v6006_v33  ;;  %7350 = vst [vmem:[#allocation312_spill] sm:$0xff] %v6008_v55 }
 0x308   : > { %2075 = vrot.lane.b32.xlu1 %v5226_v49, %s3807_s16  ;;  %2029 = vrot.lane.b32.xlu0 %v5951_v44, %s3806_s25  ;;  %v496_v49 = vld [vmem:[%s4072_s24 + $0x110] sm:$0xff] }
 0x309   : > { %v6036_v25 = vmul.f32 %v5083_v8, %v496_v49 }
 0x30a   : > { %v6015_v6 = vpop.permute.xlu1 %2063  ;;  %v6020_v14 = vpop.permute.xlu0 %2017 }
 0x30b   : > { %7351 = vst [vmem:[#allocation313_spill] sm:$0xff] %v6015_v6  ;;  %7352 = vst [vmem:[#allocation314_spill] sm:$0xff] %v6020_v14  ;;  %v485_v6 = vld [vmem:[%s4072_s24 + $0xb8] sm:$0xff] }
 0x30c   : > { %2189 = vrot.lane.b32.xlu1 %v5961_v4, %s3806_s25  ;;  %2143 = vrot.lane.b32.xlu0 %v6018_v42, %s3805_s26  ;;  %v6058_v49 = vmul.f32 %v5768_v5, %v485_v6 }
 0x30e   : > { %v6026_v55 = vpop.permute.xlu1 %2521  ;;  %v6029_v33 = vpop.permute.xlu0 %2475 }
 0x30f   : > { %7353 = vst [vmem:[#allocation315_spill] sm:$0xff] %v6026_v55 }
 0x310   : > { %2693 = vrot.lane.b32.xlu1 %v5987_v48, %s3806_s25  ;;  %2235 = vrot.lane.b32.xlu0 %v5919_v45, %s3807_s16 }
 0x312   : > { %v6038_v0 = vpop.permute.xlu1 %2635  ;;  %v6040_v14 = vpop.permute.xlu0 %2567 }
 0x314   : > { %1985 = vrot.lane.b32.xlu1 %v6036_v25, %s3805_s26  ;;  %2739 = vrot.lane.b32.xlu0 %v5929_v15, %s3807_s16 }
 0x316   : > { %v6046_v31 = vpop.permute.xlu1 %2727  ;;  %v6048_v55 = vpop.permute.xlu0 %2681 }
 0x317   : > { %7354 = vst [vmem:[#allocation316_spill] sm:$0xff] %v6046_v31  ;;  %7355 = vst [vmem:[#allocation317_spill] sm:$0xff] %v6048_v55 }
 0x318   : > { %2077 = vrot.lane.b32.xlu1 %v5951_v44, %s3807_s16  ;;  %2031 = vrot.lane.b32.xlu0 %v5996_v56, %s3806_s25  ;;  %v488_v44 = vld [vmem:[%s4072_s24 + $0xd0] sm:$0xff] }
 0x31a   : > { %v6055_v8 = vpop.permute.xlu1 %2065  ;;  %v6060_v45 = vpop.permute.xlu0 %2019 }
 0x31b   : > { %7356 = vst [vmem:[#allocation318_spill] sm:$0xff] %v6055_v8  ;;  %7357 = vst [vmem:[#allocation319_spill] sm:$0xff] %v6060_v45  ;;  %v6088_v8 = vmul.f32 %v5821_v61, %v488_v44  ;;  %v491_v61 = vld [vmem:[%s4072_s24 + $0xe8] sm:$0xff] }
 0x31c   : > { %2191 = vrot.lane.b32.xlu1 %v6018_v42, %s3806_s25  ;;  %2145 = vrot.lane.b32.xlu0 %v6058_v49, %s3805_s26 }
 0x31e   : > { %v6066_v55 = vpop.permute.xlu1 %2133  ;;  %v6068_v31 = vpop.permute.xlu0 %2131 }
 0x320   : > { %2741 = vrot.lane.b32.xlu1 %v5987_v48, %s3807_s16  ;;  %2237 = vrot.lane.b32.xlu0 %v5961_v4, %s3807_s16  ;;  %v2329_v48 = vadd.f32 %v5660_v32, %v5338_v35 }
 0x322   : > { %v6074_v5 = vpop.permute.xlu1 %2523  ;;  %v6076_v6 = vpop.permute.xlu0 %2477  ;;  %v2377_v15 = vadd.f32 %v5692_v60, %v2329_v48 }
 0x323   : > { %7358 = vst [vmem:[#allocation320_spill] sm:$0xff] %v6074_v5 }
 0x324   : > { %2079 = vrot.lane.b32.xlu1 %v5996_v56, %s3807_s16  ;;  %2033 = vrot.lane.b32.xlu0 %v6036_v25, %s3806_s25  ;;  %v2330_v56 = vadd.f32 %v5694_v30, %v5370_v7  ;;  %v2425_v32 = vadd.f32 %v5735_v34, %v2377_v15  ;;  %v6112_v7 = vmul.f32 %v5874_v43, %v491_v61  ;;  %v494_v34 = vld [vmem:[%s4072_s24 + $0x100] sm:$0xff] }
 0x325   : > { %v6127_v43 = vmul.f32 %v5914_v27, %v494_v34  ;;  %v7360_v34 = vld [vmem:[#allocation127_spill] sm:$0xff] }
 0x326   : > { %v6083_v45 = vpop.permute.xlu1 %2637  ;;  %v6090_v4 = vpop.permute.xlu0 %2569  ;;  %v2378_v44 = vadd.f32 %v5737_v46, %v2330_v56  ;;  %v2437_v30 = vadd.f32 %v2425_v32, %v5515_v37  ;;  %v2323_v46 = vadd.f32 %v5310_v63, %v4882_v52  ;;  %v1836_v32 = vadd.f32 %v5418_v16, %v5055_v2 }
 0x328   : > { %2193 = vrot.lane.b32.xlu1 %v6058_v49, %s3806_s25  ;;  %2147 = vrot.lane.b32.xlu0 %v6088_v8, %s3805_s26  ;;  %v2426_v60 = vadd.f32 %v5770_v21, %v2378_v44  ;;  %v2497_v56 = vadd.f32 %v5827_v38, %v2437_v30  ;;  %v2371_v44 = vadd.f32 %v5592_v19, %v2323_v46  ;;  %v7361_v46 = vld [vmem:[#allocation185_spill] sm:$0xff] }
 0x329   : > { %v1884_v27 = vadd.f32 %v5435_v24, %v1836_v32  ;;  %v7364_v32 = vld [vmem:[#allocation184_spill] sm:$0xff] }
 0x32a   : > { %v6099_v5 = vpop.permute.xlu1 %2729  ;;  %v2684_v35 = vpop.permute.xlu0 %2683  ;;  %v2438_v21 = vadd.f32 %v2426_v60, %v5557_v54  ;;  %v2545_v52 = vadd.f32 %v5878_v10, %v2497_v56  ;;  %v2324_v54 = vadd.f32 %v5360_v41, %v4946_v50  ;;  %v2419_v61 = vadd.f32 %v5609_v17, %v2371_v44  ;;  %v497_v50 = vld [vmem:[%s4072_s24 + $0x118] sm:$0xff]  ;;  %s3724_s24 = scalar_lea.vmem %s3093_s11, 128 }
 0x32b   : > { %v1932_v19 = vadd.f32 %v5446_v58, %v1884_v27  ;;  %v1831_v41 = vadd.f32 %v5312_v1, %v4880_v29  ;;  %v2325_v29 = vadd.f32 %v5366_v26, %v4950_v22  ;;  %v1832_v56 = vadd.f32 %v7361_v46, %v7360_v34  ;;  %v7367_v27 = vld [vmem:[#allocation244_spill] sm:$0xff]  ;;  %p3725_p12 = scmp.ne.s32.totalorder %s3093_s11, %s3724_s24 }
 0x32c   : > { %2081 = vrot.lane.b32.xlu1 %v6036_v25, %s3807_s16  ;;  %2239 = vrot.lane.b32.xlu0 %v6018_v42, %s3807_s16  ;;  %v2498_v38 = vadd.f32 %v5863_v20, %v2438_v21  ;;  %v2593_v2 = vadd.f32 %v5941_v3, %v2545_v52  ;;  %v2372_v20 = vadd.f32 %v5559_v23, %v2324_v54  ;;  %v7359_v23 = vld [vmem:[#allocation248_spill] sm:$0xff] }
 0x32d   : > { %v1879_v58 = vadd.f32 %v5328_v12, %v1831_v41  ;;  %v7362_v12 = vld [vmem:[#allocation237_spill] sm:$0xff]  ;;  %v7370_v41 = vld [vmem:[#allocation208_spill] sm:$0xff]  ;;  %p3726_p13 = pnand %p3725_p12, %p7662_p1 }
 0x32e   : > { %v6109_v48 = vpop.permute.xlu1 %2067  ;;  %v6116_v15 = vpop.permute.xlu0 %2021  ;;  %v2546_v16 = vadd.f32 %v5931_v18, %v2498_v38  ;;  %v2420_v17 = vadd.f32 %v5607_v47, %v2372_v20  ;;  %v2431_v18 = vadd.f32 %v2419_v61, %v5326_v62  ;;  %v2605_v3 = vadd.f32 %v2593_v2, %v5721_v11  ;;  %v7368_v2 = vld [vmem:[#allocation198_spill] sm:$0xff] }
 0x32f   : > { %v6173_v47 = vmul.f32 %v5974_v53, %v497_v50  ;;  %v2373_v21 = vadd.f32 %v7362_v12, %v2325_v29  ;;  %v7365_v53 = vld [vmem:[#allocation255_spill] sm:$0xff]  ;;  %v7373_v29 = vld [vmem:[#allocation189_spill] sm:$0xff]  ;;  %p3727_p2 = pneg %p3726_p13 }
 0x330   : > { %2195 = vrot.lane.b32.xlu1 %v6088_v8, %s3806_s25  ;;  %2149 = vrot.lane.b32.xlu0 %v6112_v7, %s3805_s26  ;;  %v2594_v24 = vadd.f32 %v6000_v36, %v2546_v16  ;;  %v1944_v36 = vadd.f32 %v1932_v19, %v5124_v28  ;;  %v2491_v30 = vadd.f32 %v7359_v23, %v2431_v18  ;;  %v7363_v28 = vld [vmem:[#allocation187_spill] sm:$0xff]  ;;  %v7369_v16 = vld [vmem:[#allocation261_spill] sm:$0xff]  ;;  %v7372_v18 = vld [vmem:[#allocation258_spill] sm:$0xff] }
 0x331   : > { %v2665_v62 = vadd.f32 %v6038_v0, %v2605_v3  ;;  %v1927_v26 = vadd.f32 %v7363_v28, %v1879_v58  ;;  %v2432_v44 = vadd.f32 %v2420_v17, %v7364_v32  ;;  %v7366_v0 = vld [vmem:[#allocation186_spill] sm:$0xff]  ;;  %v2421_v61 = vadd.f32 %v7367_v27, %v2373_v21  ;;  %v7383_v27 = vld [vmem:[#allocation228_spill] sm:$0xff] }
 0x332   : > { %v6129_v37 = vpop.permute.xlu1 %2179  ;;  %v6135_v63 = vpop.permute.xlu0 %2135  ;;  %v2606_v22 = vadd.f32 %v2594_v24, %v5784_v40  ;;  %v2539_v52 = vadd.f32 %v7365_v53, %v2491_v30  ;;  %v1880_v54 = vadd.f32 %v7366_v0, %v1832_v56  ;;  %v2331_v40 = vadd.f32 %v7369_v16, %v7368_v2  ;;  %v7371_v24 = vld [vmem:[#allocation247_spill] sm:$0xff]  ;;  %v7374_v30 = vld [vmem:[#allocation270_spill] sm:$0xff]  ;;  %v7382_v0 = vld [vmem:[#allocation277_spill] sm:$0xff] }
 0x333   : > { %v2713_v38 = vadd.f32 %v2684_v35, %v2665_v62  ;;  %v2004_v50 = vadd.f32 %v7370_v41, %v1944_v36  ;;  %v2492_v17 = vadd.f32 %v7371_v24, %v2432_v44  ;;  %v7376_v56 = vld [vmem:[#allocation134_spill] sm:$0xff]  ;;  %v7377_v36 = vld [vmem:[#allocation192_spill] sm:$0xff]  ;;  %v7384_v2 = vld [vmem:[#allocation287_spill] sm:$0xff] }
 0x334   : > { %2151 = vrot.lane.b32.xlu1 %v6127_v43, %s3805_s26  ;;  %2241 = vrot.lane.b32.xlu0 %v6058_v49, %s3807_s16  ;;  %v2666_v19 = vadd.f32 %v6083_v45, %v2606_v22  ;;  %v2587_v3 = vadd.f32 %v7372_v18, %v2539_v52  ;;  %v1928_v23 = vadd.f32 %v7373_v29, %v1880_v54  ;;  %v7375_v45 = vld [vmem:[#allocation130_spill] sm:$0xff]  ;;  %v7381_v52 = vld [vmem:[#allocation188_spill] sm:$0xff]  ;;  %v7387_v24 = vld [vmem:[#allocation211_spill] sm:$0xff] }
 0x335   : > { %v2379_v62 = vadd.f32 %v7374_v30, %v2331_v40  ;;  %v1939_v46 = vadd.f32 %v1927_v26, %v7375_v45  ;;  %v1833_v12 = vadd.f32 %v7377_v36, %v7376_v56  ;;  %v7378_v21 = vld [vmem:[#allocation254_spill] sm:$0xff]  ;;  %v2052_v28 = vadd.f32 %v6116_v15, %v2004_v50  ;;  %v7385_v40 = vld [vmem:[#allocation195_spill] sm:$0xff]  ;;  %v7388_v18 = vld [vmem:[#allocation132_spill] sm:$0xff] }
 0x336   : > { %v6148_v10 = vpop.permute.xlu1 %2525  ;;  %v6152_v60 = vpop.permute.xlu0 %2181  ;;  %v2540_v22 = vadd.f32 %v7378_v21, %v2492_v17  ;;  %v7379_v32 = vld [vmem:[#allocation150_spill] sm:$0xff]  ;;  %v2334_v26 = vadd.f32 %v7384_v2, %v7383_v27  ;;  %v2599_v15 = vadd.f32 %v2587_v3, %v7387_v24  ;;  %v7389_v29 = vld [vmem:[#allocation213_spill] sm:$0xff]  ;;  %v7399_v2 = vld [vmem:[#allocation216_spill] sm:$0xff] }
 0x337   : > { %v7380_v44 = vld [vmem:[#allocation210_spill] sm:$0xff]  ;;  %v2427_v54 = vadd.f32 %v7382_v0, %v2379_v62  ;;  %v7393_v3 = vld [vmem:[#allocation273_spill] sm:$0xff]  ;;  %v7397_v0 = vld [vmem:[#allocation176_spill] sm:$0xff] }
 0x338   : > { %2243 = vrot.lane.b32.xlu1 %v6088_v8, %s3807_s16  ;;  %2197 = vrot.lane.b32.xlu0 %v6112_v7, %s3806_s25  ;;  %v1837_v53 = vadd.f32 %v7380_v44, %v7379_v32  ;;  %v7390_v30 = vld [vmem:[#allocation250_spill] sm:$0xff]  ;;  %v2382_v45 = vadd.f32 %v5921_v39, %v2334_v26  ;;  %v7395_v32 = vld [vmem:[#allocation260_spill] sm:$0xff] }
 0x339   : > { %v7391_v56 = vld [vmem:[#allocation190_spill] sm:$0xff] }
 0x33a   : > { %v6168_v1 = vpop.permute.xlu1 %2639  ;;  %v6176_v11 = vpop.permute.xlu0 %2571  ;;  %v1999_v36 = vadd.f32 %v7391_v56, %v1939_v46  ;;  %v2430_v39 = vadd.f32 %v5972_v59, %v2382_v45  ;;  %v7398_v27 = vld [vmem:[#allocation238_spill] sm:$0xff]  ;;  %v7405_v59 = vld [vmem:[#allocation239_spill] sm:$0xff]  ;;  %v7406_v45 = vld [vmem:[#allocation276_spill] sm:$0xff] }
 0x33b   : > { %v2326_v46 = vadd.f32 %v7398_v27, %v7397_v0 }
 0x33c   : > { %2199 = vrot.lane.b32.xlu1 %v6127_v43, %s3806_s25  ;;  %2153 = vrot.lane.b32.xlu0 %v6173_v47, %s3805_s26  ;;  %s3808_s26 = smov [#allocation10]  }
 0x33e   : > { %v2732_v20 = vpop.permute.xlu1 %2731  ;;  %v2686_v58 = vpop.permute.xlu0 %2685 }
 0x33f   : > { %v6197_v35 = vadd.f32 %v2732_v20, %v2713_v38  ;;  %v6201_v34 = vadd.f32 %v2686_v58, %v2666_v19  ;;  %v2433_v38 = vadd.f32 %v2421_v61, %v7381_v52  ;;  %v1881_v19 = vadd.f32 %v7385_v40, %v1833_v12  ;;  %v7386_v20 = vld [vmem:[#allocation262_spill] sm:$0xff]  ;;  %v7392_v12 = vld [vmem:[#allocation197_spill] sm:$0xff] }
 0x340   : > { %2201 = vrot.lane.b32.xlu1 %v6173_v47, %s3806_s25  ;;  %2245 = vrot.lane.b32.xlu0 %v6112_v7, %s3807_s16  ;;  %v2588_v41 = vadd.f32 %v7386_v20, %v2540_v22  ;;  %v1940_v58 = vadd.f32 %v1928_v23, %v7388_v18  ;;  %v1885_v61 = vadd.f32 %v7389_v29, %v1837_v53  ;;  %v7396_v53 = vld [vmem:[#allocation240_spill] sm:$0xff]  ;;  %s3728_s25 = sshll.u32 %s3808_s26, 4  ;;  %s3729_s25 = int_to_ptr.vmem [resolvable:$false] %s3728_s25 }
 0x341   : > { %v2493_v62 = vadd.f32 %v7390_v30, %v2433_v38  ;;  %v1929_v21 = vadd.f32 %v7392_v12, %v1881_v19  ;;  %v2659_v22 = vadd.f32 %v7393_v3, %v2599_v15  ;;  %v2439_v52 = vadd.f32 %v2427_v54, %v7396_v53  ;;  %v7401_v19 = vld [vmem:[#allocation297_spill] sm:$0xff]  ;;  %v7402_v15 = vld [vmem:[#allocation191_spill] sm:$0xff]  ;;  %v7403_v29 = vld [vmem:[#allocation268_spill] sm:$0xff]  ;;  %s3730_s19 = scalar_lea.vmem %s3729_s25, 256  ;;  %p3731_p7 = scmp.lt.s32.totalorder %s3093_s11, %s3729_s25 }
 0x342   : > { %v2070_v16 = vpop.permute.xlu1 %2069  ;;  %v6223_v17 = vpop.permute.xlu0 %2023  ;;  %v2600_v26 = vadd.f32 %v2588_v41, %v7399_v2  ;;  %v2047_v20 = vadd.f32 %v7401_v19, %v1999_v36  ;;  %v2000_v18 = vadd.f32 %v7402_v15, %v1940_v58  ;;  %v7404_v54 = vld [vmem:[#allocation301_spill] sm:$0xff]  ;;  %v7407_v12 = vld [vmem:[#allocation295_spill] sm:$0xff]  ;;  %v7412_v2 = vld [vmem:[#allocation158_spill] sm:$0xff]  ;;  %p3732_p0 = scmp.lt.s32.totalorder %s3730_s19, %s3724_s24 }
 0x343   : > { %v6221_v50 = vadd.f32 %v2070_v16, %v2052_v28  ;;  %v7394_v28 = vld [vmem:[#allocation217_spill] sm:$0xff]  ;;  %v2541_v44 = vadd.f32 %v7395_v32, %v2493_v62  ;;  %v2499_v30 = vadd.f32 %v7404_v54, %v2439_v52  ;;  %v2374_v62 = vadd.f32 %v7405_v59, %v2326_v46  ;;  %v7409_v32 = vld [vmem:[#allocation214_spill] sm:$0xff]  ;;  %v7410_v36 = vld [vmem:[#allocation275_spill] sm:$0xff] }
 0x344   : > { %2249 = vrot.lane.b32.xlu1 %v6173_v47, %s3807_s16  ;;  %2247 = vrot.lane.b32.xlu0 %v6127_v43, %s3807_s16  ;;  %v1933_v23 = vadd.f32 %v7394_v28, %v1885_v61  ;;  %v7400_v16 = vld [vmem:[#allocation285_spill] sm:$0xff]  ;;  %v2660_v56 = vadd.f32 %v7406_v45, %v2600_v26  ;;  %v2095_v41 = vadd.f32 %v5963_v13, %v2047_v20  ;;  %v7414_v19 = vld [vmem:[#allocation284_spill] sm:$0xff]  ;;  %v7416_v13 = vld [vmem:[#allocation222_spill] sm:$0xff]  ;;  %p3733_p5 = por %p3732_p0, %p3731_p7 }
 0x345   : > { %v2707_v40 = vadd.f32 %v7400_v16, %v2659_v22  ;;  %v2589_v61 = vadd.f32 %v7403_v29, %v2541_v44  ;;  %v7408_v28 = vld [vmem:[#allocation141_spill] sm:$0xff]  ;;  %v2333_v53 = vadd.f32 %v7410_v36, %v7409_v32  ;;  %v2547_v0 = vadd.f32 %v5982_v57, %v2499_v30  ;;  %v7415_v15 = vld [vmem:[#allocation296_spill] sm:$0xff]  ;;  %v7418_v30 = vld [vmem:[#allocation294_spill] sm:$0xff] }
 0x346   : > { %v6240_v38 = vpop.permute.xlu1 %2183  ;;  %v6247_v24 = vpop.permute.xlu0 %2137  ;;  %v1941_v22 = vadd.f32 %v1929_v21, %v7408_v28  ;;  %v7411_v58 = vld [vmem:[#allocation269_spill] sm:$0xff]  ;;  %v1945_v52 = vadd.f32 %v1933_v23, %v7412_v2  ;;  %v2708_v26 = vadd.f32 %v7414_v19, %v2660_v56  ;;  %v7417_v21 = vld [vmem:[#allocation286_spill] sm:$0xff]  ;;  %v7419_v45 = vld [vmem:[#allocation267_spill] sm:$0xff]  ;;  %p3734_p9 = pnand %p3733_p5, %p3727_p2 }
 0x347   : > { %v2755_v3 = vadd.f32 %v7407_v12, %v2707_v40  ;;  %v2442_v27 = vadd.f32 %v2430_v39, %v7411_v58  ;;  %v7413_v16 = vld [vmem:[#allocation245_spill] sm:$0xff]  ;;  %v2048_v40 = vadd.f32 %v7415_v15, %v2000_v18  ;;  %v2601_v20 = vadd.f32 %v2589_v61, %v7416_v13  ;;  %v7421_v56 = vld [vmem:[#allocation194_spill] sm:$0xff]  ;;  %v7428_v19 = vld [vmem:[#allocation279_spill] sm:$0xff] }
 0x348   : > { %v2422_v46 = vadd.f32 %v7413_v16, %v2374_v62  ;;  %v2381_v54 = vadd.f32 %v7417_v21, %v2333_v53  ;;  %v2595_v59 = vadd.f32 %v6040_v14, %v2547_v0  ;;  %v2756_v39 = vadd.f32 %v7418_v30, %v2708_v26  ;;  %v7420_v12 = vld [vmem:[#allocation137_spill] sm:$0xff]  ;;  %v7423_v32 = vld [vmem:[#allocation266_spill] sm:$0xff]  ;;  %v7429_v15 = vld [vmem:[#allocation292_spill] sm:$0xff] }
 0x349   : > { %v2502_v57 = vadd.f32 %v6076_v6, %v2442_v27  ;;  %3504 = vrsqrt.f32 %v2755_v3  ;;  %v2096_v23 = vadd.f32 %v5976_v51, %v2048_v40  ;;  %v2107_v62 = vadd.f32 %v2095_v41, %v7419_v45  ;;  %v7422_v18 = vld [vmem:[#allocation205_spill] sm:$0xff]  ;;  %v7424_v61 = vld [vmem:[#allocation282_spill] sm:$0xff]  ;;  %v7425_v6 = vld [vmem:[#allocation200_spill] sm:$0xff] }
 0x34a   : > { %v2230_v44 = vpop.permute.xlu1 %2229  ;;  %v2228_v29 = vpop.permute.xlu0 %2227  ;;  %v1834_v28 = vadd.f32 %v7421_v56, %v7420_v12  ;;  %v2332_v36 = vadd.f32 %v7423_v32, %v7422_v18  ;;  %v2661_v58 = vadd.f32 %v7424_v61, %v2601_v20  ;;  %v2001_v0 = vadd.f32 %v7425_v6, %v1941_v22  ;;  %v7426_v27 = vld [vmem:[#allocation193_spill] sm:$0xff]  ;;  %v7427_v2 = vld [vmem:[#allocation298_spill] sm:$0xff]  ;;  %v7433_v45 = vld [vmem:[#allocation256_spill] sm:$0xff] }
 0x34b   : > { %v2550_v53 = vadd.f32 %v6148_v10, %v2502_v57  ;;  %v2434_v3 = vadd.f32 %v2422_v46, %v7426_v27  ;;  %v2429_v51 = vadd.f32 %v7427_v2, %v2381_v54  ;;  %v2167_v41 = vadd.f32 %v6068_v31, %v2107_v62  ;;  %v7430_v13 = vld [vmem:[#allocation281_spill] sm:$0xff]  ;;  %v7431_v10 = vld [vmem:[#allocation219_spill] sm:$0xff]  ;;  %v7438_v27 = vld [vmem:[#allocation196_spill] sm:$0xff] }
 0x34c   : > { %v2380_v26 = vadd.f32 %v7428_v19, %v2332_v36  ;;  %v2709_v40 = vadd.f32 %v7429_v15, %v2661_v58  ;;  %v2607_v21 = vadd.f32 %v2595_v59, %v7430_v13  ;;  %v2005_v57 = vadd.f32 %v7431_v10, %v1945_v52  ;;  %v7432_v30 = vld [vmem:[#allocation265_spill] sm:$0xff]  ;;  %v7435_v62 = vld [vmem:[#allocation303_spill] sm:$0xff]  ;;  %v7442_v15 = vld [vmem:[#allocation320_spill] sm:$0xff] }
 0x34d   : > { %3506 = vrsqrt.f32 %v2756_v39  ;;  %v2108_v22 = vadd.f32 %v2096_v23, %v7432_v30  ;;  %v2215_v46 = vadd.f32 %v6129_v37, %v2167_v41  ;;  %v2494_v54 = vadd.f32 %v7433_v45, %v2434_v3  ;;  %v7434_v12 = vld [vmem:[#allocation289_spill] sm:$0xff]  ;;  %v7436_v36 = vld [vmem:[#allocation259_spill] sm:$0xff] }
 0x34e   : > { %v6278_v14 = vpop.permute.xlu1 %2641  ;;  %v2574_v16 = vpop.permute.xlu0 %2573  ;;  %v2428_v31 = vadd.f32 %v7434_v12, %v2380_v26  ;;  %v2757_v56 = vadd.f32 %v7435_v62, %v2709_v40  ;;  %v2667_v18 = vadd.f32 %v6168_v1, %v2607_v21  ;;  %v2441_v59 = vadd.f32 %v2429_v51, %v7436_v36  ;;  %v7437_v23 = vld [vmem:[#allocation263_spill] sm:$0xff]  ;;  %v7447_v12 = vld [vmem:[#allocation234_spill] sm:$0xff]  ;;  %v7448_v36 = vld [vmem:[#allocation144_spill] sm:$0xff] }
 0x34f   : > { %v6287_v20 = vadd.f32 %v2574_v16, %v2550_v53  ;;  %v2168_v61 = vadd.f32 %v6066_v55, %v2108_v22  ;;  %v2263_v58 = vadd.f32 %v2228_v29, %v2215_v46  ;;  %v2542_v37 = vadd.f32 %v7437_v23, %v2494_v54  ;;  %v7439_v55 = vld [vmem:[#allocation274_spill] sm:$0xff]  ;;  %v7441_v16 = vld [vmem:[#allocation313_spill] sm:$0xff]  ;;  %v7444_v21 = vld [vmem:[#allocation199_spill] sm:$0xff] }
 0x350   : > { %v2049_v53 = vadd.f32 %v5966_v9, %v2001_v0  ;;  %v1882_v3 = vadd.f32 %v7438_v27, %v1834_v28  ;;  %v2501_v1 = vadd.f32 %v6029_v33, %v2441_v59  ;;  %v2053_v51 = vadd.f32 %v6223_v17, %v2005_v57  ;;  %v7443_v33 = vld [vmem:[#allocation308_spill] sm:$0xff]  ;;  %v7445_v30 = vld [vmem:[#allocation315_spill] sm:$0xff]  ;;  %v7446_v46 = vld [vmem:[#allocation278_spill] sm:$0xff] }
 0x351   : > { %v2216_v2 = vadd.f32 %v6152_v60, %v2168_v61  ;;  %v2590_v29 = vadd.f32 %v7439_v55, %v2542_v37  ;;  %3508 = vrsqrt.f32 %v2757_v56  ;;  %v2767_v40 = vsub.f32 0.0, %v2263_v58  ;;  %v7450_v58 = vld [vmem:[#allocation300_spill] sm:$0xff] }
 0x352   : > { %v2734_v32 = vpop.permute.xlu1 %2733  ;;  %v2688_v39 = vpop.permute.xlu0 %2687  ;;  %v2097_v19 = vadd.f32 %v7441_v16, %v2049_v53  ;;  %v2549_v9 = vadd.f32 %v7442_v15, %v2501_v1  ;;  %v1930_v17 = vadd.f32 %v7444_v21, %v1882_v3  ;;  %v7451_v37 = vld [vmem:[#allocation180_spill] sm:$0xff]  ;;  %v7452_v53 = vld [vmem:[#allocation241_spill] sm:$0xff]  ;;  %v7455_v16 = vld [vmem:[#allocation291_spill] sm:$0xff] }
 0x353   : > { %v6299_v52 = vadd.f32 %v2734_v32, %v6201_v34  ;;  %v6303_v6 = vadd.f32 %v2688_v39, %v2667_v18  ;;  %v7440_v34 = vld [vmem:[#allocation251_spill] sm:$0xff]  ;;  %v2264_v0 = vadd.f32 %v2230_v44, %v2216_v2  ;;  %v2327_v27 = vadd.f32 %v7452_v53, %v7451_v37  ;;  %v7453_v2 = vld [vmem:[#allocation305_spill] sm:$0xff]  ;;  %v7463_v37 = vld [vmem:[#allocation288_spill] sm:$0xff] }
 0x354   : > { %v2440_v41 = vadd.f32 %v2428_v31, %v7440_v34  ;;  %v2597_v10 = vadd.f32 %v6176_v11, %v2549_v9  ;;  %v2109_v45 = vadd.f32 %v2097_v19, %v7446_v46  ;;  %v2602_v31 = vadd.f32 %v2590_v29, %v7447_v12  ;;  %v7449_v11 = vld [vmem:[#allocation293_spill] sm:$0xff]  ;;  %v7454_v34 = vld [vmem:[#allocation246_spill] sm:$0xff] }
 0x355   : > { %v2768_v44 = vsub.f32 0.0, %v2264_v0  ;;  %v1942_v59 = vadd.f32 %v1930_v17, %v7448_v36  ;;  %v7456_v15 = vld [vmem:[#allocation201_spill] sm:$0xff]  ;;  %v7457_v0 = vld [vmem:[#allocation311_spill] sm:$0xff] }
 0x356   : > { %v2072_v26 = vpop.permute.xlu1 %2071  ;;  %v6315_v28 = vpop.permute.xlu0 %2025  ;;  %v2500_v60 = vadd.f32 %v7443_v33, %v2440_v41  ;;  %v2169_v32 = vadd.f32 %v6135_v63, %v2109_v45  ;;  %v2662_v61 = vadd.f32 %v7449_v11, %v2602_v31  ;;  %v2609_v39 = vadd.f32 %v2597_v10, %v7450_v58  ;;  %v7462_v58 = vld [vmem:[#allocation264_spill] sm:$0xff] }
 0x357   : > { %v6313_v13 = vadd.f32 %v2072_v26, %v2053_v51  ;;  %v3505_v57 = vpop.eup %3504  ;;  %v2375_v41 = vadd.f32 %v7454_v34, %v2327_v27  ;;  %v2002_v9 = vadd.f32 %v7456_v15, %v1942_v59  ;;  %v7464_v27 = vld [vmem:[#allocation143_spill] sm:$0xff] }
 0x358   : > { %v2548_v22 = vadd.f32 %v7445_v30, %v2500_v60  ;;  %v6323_v62 = vmul.f32 %v3505_v57, %v2767_v40  ;;  %v2217_v3 = vadd.f32 %v6240_v38, %v2169_v32  ;;  %v2710_v51 = vadd.f32 %v7453_v2, %v2662_v61  ;;  %v7458_v40 = vld [vmem:[#allocation252_spill] sm:$0xff]  ;;  %v7459_v57 = vld [vmem:[#allocation314_spill] sm:$0xff]  ;;  %v7466_v2 = vld [vmem:[#allocation271_spill] sm:$0xff] }
 0x359   : > { %v2423_v33 = vadd.f32 %v7458_v40, %v2375_v41  ;;  %v2050_v30 = vadd.f32 %v7459_v57, %v2002_v9  ;;  %v7470_v40 = vld [vmem:[#allocation181_spill] sm:$0xff] }
 0x35a   : > { %v2186_v54 = vpop.permute.xlu1 %2185  ;;  %v6325_v56 = vpop.permute.xlu0 %2139  ;;  %v2596_v18 = vadd.f32 %v6090_v4, %v2548_v22  ;;  %v2827_v4 = vsub.f32 0.0, %v6323_v62  ;;  %v2758_v38 = vadd.f32 %v7457_v0, %v2710_v51  ;;  %v7469_v0 = vld [vmem:[#allocation206_spill] sm:$0xff] }
 0x35b   : > { %v3507_v23 = vpop.eup %3506 }
 0x35c   : > { %v6336_v55 = vmul.f32 %v3507_v23, %v2768_v44  ;;  %v2608_v19 = vadd.f32 %v2596_v18, %v7455_v16  ;;  %v2840_v45 = vsel %vm2839_vm0, %v2827_v4, -inf  ;;  %3510 = vrsqrt.f32 %v2758_v38  ;;  %v7461_v18 = vld [vmem:[#allocation203_spill] sm:$0xff]  ;;  %v7467_v16 = vld [vmem:[#allocation204_spill] sm:$0xff] }
 0x35d   : > { %v2435_v32 = vadd.f32 %v2423_v33, %v7461_v18  ;;  %v7471_v33 = vld [vmem:[#allocation243_spill] sm:$0xff]  ;;  %v7474_v18 = vld [vmem:[#allocation149_spill] sm:$0xff] }
 0x35e   : > { %v2644_v1 = vpop.permute.xlu1 %2643  ;;  %v2232_v29 = vpop.permute.xlu0 %2231  ;;  %v2668_v60 = vadd.f32 %v6278_v14, %v2608_v19  ;;  %v2828_v22 = vsub.f32 0.0, %v6336_v55  ;;  %v7460_v14 = vld [vmem:[#allocation318_spill] sm:$0xff] }
 0x35f   : > { %v6339_v63 = vadd.f32 %v2644_v1, %v2609_v39  ;;  %v2265_v26 = vadd.f32 %v2232_v29, %v2217_v3  ;;  %v3509_v10 = vpop.eup %3508  ;;  %v2098_v44 = vadd.f32 %v7460_v14, %v2050_v30  ;;  %v2495_v39 = vadd.f32 %v7462_v58, %v2435_v32  ;;  %v7465_v3 = vld [vmem:[#allocation202_spill] sm:$0xff]  ;;  %v7472_v30 = vld [vmem:[#allocation249_spill] sm:$0xff] }
 0x360   : > { %v2843_v61 = vsel %vm2839_vm0, %v2828_v22, -inf  ;;  %v1835_v1 = vadd.f32 %v7465_v3, %v7464_v27  ;;  %v7477_v27 = vld [vmem:[#allocation312_spill] sm:$0xff] }
 0x361   : > { %v2769_v21 = vsub.f32 0.0, %v2265_v26  ;;  %v2110_v53 = vadd.f32 %v2098_v44, %v7463_v37  ;;  %v2543_v51 = vadd.f32 %v7466_v2, %v2495_v39  ;;  %v7468_v26 = vld [vmem:[#allocation283_spill] sm:$0xff]  ;;  %v7476_v39 = vld [vmem:[#allocation302_spill] sm:$0xff] }
 0x362   : > { %v6347_v17 = vpop.permute.xlu1 %2735  ;;  %v2690_v46 = vpop.permute.xlu0 %2689  ;;  %v1883_v19 = vadd.f32 %v7467_v16, %v1835_v1  ;;  %v7478_v2 = vld [vmem:[#allocation207_spill] sm:$0xff] }
 0x363   : > { %v6354_v12 = vmul.f32 %v3509_v10, %v2769_v21  ;;  %v6356_v31 = vadd.f32 %v2690_v46, %v2668_v60  ;;  %2841 = vmax.xlane.f32.xlu0 %v2840_v45  ;;  %v2170_v34 = vadd.f32 %v6247_v24, %v2110_v53  ;;  %v2591_v15 = vadd.f32 %v7468_v26, %v2543_v51  ;;  %v7473_v45 = vld [vmem:[#allocation242_spill] sm:$0xff] }
 0x364   : > { %v1931_v38 = vadd.f32 %v7469_v0, %v1883_v19  ;;  %v2328_v60 = vadd.f32 %v7471_v33, %v7470_v40  ;;  %v7480_v19 = vld [vmem:[#allocation316_spill] sm:$0xff]  ;;  %v7482_v33 = vld [vmem:[#allocation319_spill] sm:$0xff] }
 0x365   : > { %v2829_v36 = vsub.f32 0.0, %v6354_v12  ;;  %v2218_v9 = vadd.f32 %v2186_v54, %v2170_v34  ;;  %v2603_v14 = vadd.f32 %v2591_v15, %v7473_v45  ;;  %v7479_v34 = vld [vmem:[#allocation209_spill] sm:$0xff] }
 0x366   : > { %v6361_v59 = vpop.permute.xlu1 %2027  ;;  %v6363_v11 = vpop.permute.xlu0 %1981  ;;  %v2376_v46 = vadd.f32 %v7472_v30, %v2328_v60  ;;  %v1943_v32 = vadd.f32 %v1931_v38, %v7474_v18  ;;  %v7481_v38 = vld [vmem:[#allocation272_spill] sm:$0xff] }
 0x367   : > { %v2846_v23 = vsel %vm2839_vm0, %v2829_v36, -inf  ;;  %v2663_v54 = vadd.f32 %v7476_v39, %v2603_v14  ;;  %v7484_v14 = vld [vmem:[#allocation290_spill] sm:$0xff] }
 0x368   : > { %2844 = vmax.xlane.f32.xlu1 %v2843_v61  ;;  %2847 = vmax.xlane.f32.xlu0 %v2846_v23  ;;  %v7475_v61 = vld [vmem:[#allocation257_spill] sm:$0xff]  ;;  %v2003_v51 = vadd.f32 %v7478_v2, %v1943_v32 }
 0x369   : > { %v3511_v44 = vpop.eup %3510  ;;  %v2424_v58 = vadd.f32 %v7475_v61, %v2376_v46  ;;  %v2711_v3 = vadd.f32 %v7477_v27, %v2663_v54  ;;  %v7487_v27 = vld [vmem:[#allocation310_spill] sm:$0xff] }
 0x36a   : > { %v6376_v29 = vpop.permute.xlu1 %2141  ;;  %v6379_v41 = vpop.permute.xlu0 %2073  ;;  %v2051_v60 = vadd.f32 %v7482_v33, %v2003_v51 }
 0x36b   : > { %v2436_v16 = vadd.f32 %v2424_v58, %v7479_v34  ;;  %v2759_v26 = vadd.f32 %v7480_v19, %v2711_v3  ;;  %v7486_v58 = vld [vmem:[#allocation253_spill] sm:$0xff] }
 0x36c   : > { %v2099_v30 = vadd.f32 %v6109_v48, %v2051_v60  ;;  %v7488_v34 = vld [vmem:[#allocation317_spill] sm:$0xff] }
 0x36d   : > { %v2496_v40 = vadd.f32 %v7481_v38, %v2436_v16  ;;  %3512 = vrsqrt.f32 %v2759_v26 }
 0x36e   : > { %v2234_v21 = vpop.permute.xlu1 %2233  ;;  %v2188_v57 = vpop.permute.xlu0 %2187 }
 0x36f   : > { %v2266_v10 = vadd.f32 %v2234_v21, %v2218_v9  ;;  %v7483_v21 = vld [vmem:[#allocation280_spill] sm:$0xff] }
 0x371   : > { %v2770_v24 = vsub.f32 0.0, %v2266_v10  ;;  %v2544_v10 = vadd.f32 %v7483_v21, %v2496_v40 }
 0x372   : > { %v6391_v23 = vpop.permute.xlu1 %2691  ;;  %v6395_v53 = vpop.permute.xlu0 %2645 }
 0x373   : > { %v6393_v37 = vmul.f32 %v3511_v44, %v2770_v24  ;;  %v2592_v24 = vadd.f32 %v7484_v14, %v2544_v10  ;;  %v7485_v44 = vld [vmem:[#allocation299_spill] sm:$0xff] }
 0x374   : > { %v2111_v18 = vadd.f32 %v2099_v30, %v7485_v44  ;;  %v7490_v30 = vld [vmem:[#allocation212_spill] sm:$0xff] }
 0x375   : > { %v2830_v1 = vsub.f32 0.0, %v6393_v37  ;;  %v2604_v39 = vadd.f32 %v2592_v24, %v7486_v58  ;;  %v7491_v24 = vld [vmem:[#allocation306_spill] sm:$0xff] }
 0x376   : > { %v6402_v15 = vpop.permute.xlu1 %1983  ;;  %v6404_v9 = vpop.permute.xlu0 %2737  ;;  %v2171_v54 = vadd.f32 %v6325_v56, %v2111_v18  ;;  %v2112_v44 = vadd.f32 %v6221_v50, %v7491_v24  ;;  %v7498_v24 = vld [vmem:[#allocation160_spill] sm:$0xff] }
 0x377   : > { %v2849_v0 = vsel %vm2839_vm0, %v2830_v1, -inf  ;;  %v2664_v3 = vadd.f32 %v7487_v27, %v2604_v39  ;;  %v7492_v39 = vld [vmem:[#allocation215_spill] sm:$0xff] }
 0x378   : > { %2850 = vmax.xlane.f32.xlu0 %v2849_v0  ;;  %v2219_v2 = vadd.f32 %v2188_v57, %v2171_v54  ;;  %v2172_v27 = vadd.f32 %v6376_v29, %v2112_v44 }
 0x379   : > { %v2712_v16 = vadd.f32 %v7488_v34, %v2664_v3  ;;  %v7493_v3 = vld [vmem:[#allocation159_spill] sm:$0xff]  ;;  %v7495_v34 = vld [vmem:[#allocation218_spill] sm:$0xff] }
 0x37a   : > { %v6413_v46 = vpop.permute.xlu1 %2075  ;;  %v6415_v45 = vpop.permute.xlu0 %2029 }
 0x37b   : > { %v2760_v26 = vadd.f32 %v6099_v5, %v2712_v16  ;;  %v3513_v40 = vpop.eup %3512  ;;  %v7489_v5 = vld [vmem:[#allocation153_spill] sm:$0xff] }
 0x37c   : > { %v1838_v14 = vadd.f32 %v7490_v30, %v7489_v5  ;;  %v7497_v30 = vld [vmem:[#allocation226_spill] sm:$0xff] }
 0x37d   : > { %3514 = vrsqrt.f32 %v2760_v26 }
 0x37e   : > { %v2190_v32 = vpop.permute.xlu1 %2189  ;;  %v2144_v61 = vpop.permute.xlu0 %2143  ;;  %v1886_v54 = vadd.f32 %v7492_v39, %v1838_v14  ;;  %3516 = vrsqrt.f32 %v6197_v35  ;;  %v7501_v35 = vld [vmem:[#allocation162_spill] sm:$0xff] }
 0x37f   : > { %3518 = vrsqrt.f32 %v6299_v52 }
 0x380   : > { %v1934_v16 = vadd.f32 %v7495_v34, %v1886_v54 }
 0x382   : > { %v6422_v51 = vpop.permute.xlu1 %2693  ;;  %v2236_v48 = vpop.permute.xlu0 %2235 }
 0x383   : > { %v2267_v19 = vadd.f32 %v2236_v48, %v2219_v2  ;;  %v7494_v2 = vld [vmem:[#allocation221_spill] sm:$0xff] }
 0x384   : > { %v1839_v48 = vadd.f32 %v7494_v2, %v7493_v3  ;;  %v7500_v3 = vld [vmem:[#allocation220_spill] sm:$0xff] }
 0x385   : > { %v2771_v0 = vsub.f32 0.0, %v2267_v19  ;;  %v2220_v19 = vadd.f32 %v2190_v32, %v2172_v27  ;;  %v7499_v32 = vld [vmem:[#allocation166_spill] sm:$0xff] }
 0x386   : > { %v6426_v38 = vpop.permute.xlu1 %1985  ;;  %v6428_v33 = vpop.permute.xlu0 %2739 }
 0x387   : > { %v6430_v60 = vmul.f32 %v3513_v40, %v2771_v0  ;;  %v7496_v0 = vld [vmem:[#allocation224_spill] sm:$0xff] }
 0x388   : > { %v1887_v40 = vadd.f32 %v7496_v0, %v1839_v48  ;;  %v2113_v48 = vadd.f32 %v6313_v13, %v6018_v42  ;;  %v7502_v0 = vld [vmem:[#allocation223_spill] sm:$0xff]  ;;  %v7504_v42 = vld [vmem:[#allocation225_spill] sm:$0xff] }
 0x389   : > { %v7034_v56 = vsub.f32 0.0, %v6430_v60 }
 0x38a   : > { %v6433_v57 = vpop.permute.xlu1 %2077  ;;  %v6435_v21 = vpop.permute.xlu0 %2031  ;;  %v1935_v50 = vadd.f32 %v7497_v30, %v1887_v40  ;;  %v1840_v40 = vadd.f32 %v7502_v0, %v7501_v35 }
 0x38b   : > { %v2852_v10 = vsel %vm2839_vm0, %v7034_v56, -inf  ;;  %v1946_v56 = vadd.f32 %v1934_v16, %v7498_v24  ;;  %v3515_v44 = vpop.eup %3514 }
 0x38c   : > { %2853 = vmax.xlane.f32.xlu1 %v2852_v10  ;;  %v1947_v27 = vadd.f32 %v1935_v50, %v7499_v32  ;;  %v7503_v50 = vld [vmem:[#allocation229_spill] sm:$0xff]  ;;  %v1888_v13 = vadd.f32 %v7504_v42, %v1840_v40 }
 0x38d   : > { %v2006_v2 = vadd.f32 %v7500_v3, %v1946_v56  ;;  %v2763_v56 = vadd.f32 %v6347_v17, %v6303_v6  ;;  %v7511_v42 = vld [vmem:[#allocation233_spill] sm:$0xff] }
 0x38e   : > { %v2192_v18 = vpop.permute.xlu1 %2191  ;;  %v2146_v58 = vpop.permute.xlu0 %2145  ;;  %v2007_v24 = vadd.f32 %v7503_v50, %v1947_v27  ;;  %v7509_v50 = vld [vmem:[#allocation227_spill] sm:$0xff] }
 0x38f   : > { %v1936_v6 = vadd.f32 %v7509_v50, %v1888_v13  ;;  %3520 = vrsqrt.f32 %v2763_v56 }
 0x390   : > { %v2055_v27 = vadd.f32 %v6361_v59, %v2007_v24  ;;  %v7514_v24 = vld [vmem:[#allocation307_spill] sm:$0xff] }
 0x391   : > { %v2610_v13 = vadd.f32 %v6287_v20, %v7514_v24  ;;  %v7516_v20 = vld [vmem:[#allocation309_spill] sm:$0xff] }
 0x392   : > { %v6449_v26 = vpop.permute.xlu1 %2741  ;;  %v2238_v10 = vpop.permute.xlu0 %2237 }
 0x393   : > { %v2268_v5 = vadd.f32 %v2238_v10, %v2220_v19  ;;  %v2054_v10 = vadd.f32 %v6315_v28, %v2006_v2  ;;  %v7505_v28 = vld [vmem:[#allocation169_spill] sm:$0xff]  ;;  %v7507_v2 = vld [vmem:[#allocation170_spill] sm:$0xff] }
 0x395   : > { %v2772_v14 = vsub.f32 0.0, %v2268_v5  ;;  %v2173_v5 = vadd.f32 %v2144_v61, %v2113_v48  ;;  %v7506_v61 = vld [vmem:[#allocation230_spill] sm:$0xff]  ;;  %v7508_v48 = vld [vmem:[#allocation231_spill] sm:$0xff] }
 0x396   : > { %v6455_v29 = vpop.permute.xlu1 %2079  ;;  %v6457_v39 = vpop.permute.xlu0 %2033  ;;  %v1841_v3 = vadd.f32 %v7506_v61, %v7505_v28  ;;  %v1842_v35 = vadd.f32 %v7508_v48, %v7507_v2  ;;  %v7512_v61 = vld [vmem:[#allocation235_spill] sm:$0xff]  ;;  %v7513_v48 = vld [vmem:[#allocation236_spill] sm:$0xff] }
 0x397   : > { %v6459_v54 = vmul.f32 %v3515_v44, %v2772_v14  ;;  %v2102_v14 = vadd.f32 %v6379_v41, %v2054_v10  ;;  %v2221_v44 = vadd.f32 %v2192_v18, %v2173_v5  ;;  %v2103_v41 = vadd.f32 %v6413_v46, %v2055_v27  ;;  %v3517_v28 = vpop.eup %3516 }
 0x398   : > { %v1890_v52 = vadd.f32 %v7511_v42, %v1842_v35  ;;  %v2670_v46 = vadd.f32 %v6395_v53, %v2610_v13 }
 0x399   : > { %v2832_v34 = vsub.f32 0.0, %v6459_v54  ;;  %v2114_v18 = vadd.f32 %v2102_v14, %v6058_v49  ;;  %v2115_v49 = vadd.f32 %v2103_v41, %v6088_v8  ;;  %v2764_v14 = vadd.f32 %v6404_v9, %v6356_v31 }
 0x39a   : > { %v2194_v16 = vpop.permute.xlu1 %2193  ;;  %v2148_v19 = vpop.permute.xlu0 %2147  ;;  %v1938_v59 = vadd.f32 %v7513_v48, %v1890_v52  ;;  %v2717_v8 = vadd.f32 %v6391_v23, %v6339_v63 }
 0x39b   : > { %v2855_v30 = vsel %vm2839_vm0, %v2832_v34, -inf  ;;  %v2174_v50 = vadd.f32 %v2146_v58, %v2114_v18  ;;  %v2175_v42 = vadd.f32 %v2148_v19, %v2115_v49  ;;  %3522 = vrsqrt.f32 %v2764_v14  ;;  %v3519_v19 = vpop.eup %3518 }
 0x39c   : > { %2856 = vmax.xlane.f32.xlu0 %v2855_v30  ;;  %v7510_v30 = vld [vmem:[#allocation232_spill] sm:$0xff]  ;;  %v1950_v58 = vadd.f32 %v1938_v59, %v6036_v25  ;;  %v2765_v25 = vadd.f32 %v6428_v33, %v2717_v8 }
 0x39d   : > { %v1889_v40 = vadd.f32 %v7510_v30, %v1841_v3  ;;  %v2222_v27 = vadd.f32 %v2194_v16, %v2174_v50 }
 0x39e   : > { %v2082_v32 = vpop.permute.xlu1 %2081  ;;  %v2240_v0 = vpop.permute.xlu0 %2239  ;;  %v2010_v16 = vadd.f32 %v6426_v38, %v1950_v58 }
 0x39f   : > { %v2269_v17 = vadd.f32 %v2240_v0, %v2221_v44  ;;  %v1937_v2 = vadd.f32 %v7512_v61, %v1889_v40  ;;  %v7515_v0 = vld [vmem:[#allocation304_spill] sm:$0xff] }
 0x3a0   : > { %v1948_v3 = vadd.f32 %v1936_v6, %v7515_v0  ;;  %v2718_v6 = vadd.f32 %v6422_v51, %v2670_v46  ;;  %v2058_v18 = vadd.f32 %v6457_v39, %v2010_v16 }
 0x3a1   : > { %v2773_v10 = vsub.f32 0.0, %v2269_v17  ;;  %v1949_v40 = vadd.f32 %v1937_v2, %v7516_v20 }
 0x3a2   : > { %v2196_v5 = vpop.permute.xlu1 %2195  ;;  %v2150_v44 = vpop.permute.xlu0 %2149  ;;  %v2008_v56 = vadd.f32 %v6363_v11, %v1948_v3  ;;  %v2766_v51 = vadd.f32 %v6449_v26, %v2718_v6  ;;  %v2106_v38 = vadd.f32 %v2082_v32, %v2058_v18 }
 0x3a3   : > { %v6493_v35 = vmul.f32 %v3517_v28, %v2773_v10  ;;  %v2009_v9 = vadd.f32 %v6402_v15, %v1949_v40  ;;  %v2223_v41 = vadd.f32 %v2196_v5, %v2175_v42  ;;  %v3521_v5 = vpop.eup %3520 }
 0x3a4   : > { %v2056_v11 = vadd.f32 %v6415_v45, %v2008_v56  ;;  %3524 = vrsqrt.f32 %v2766_v51  ;;  %v2118_v13 = vadd.f32 %v2106_v38, %v6173_v47 }
 0x3a5   : > { %v2833_v17 = vsub.f32 0.0, %v6493_v35  ;;  %v2057_v15 = vadd.f32 %v6435_v21, %v2009_v9  ;;  %3526 = vrsqrt.f32 %v2765_v25 }
 0x3a6   : > { %v2152_v30 = vpop.permute.xlu1 %2151  ;;  %v2242_v52 = vpop.permute.xlu0 %2241  ;;  %v2104_v63 = vadd.f32 %v6433_v57, %v2056_v11 }
 0x3a7   : > { %v2270_v53 = vadd.f32 %v2242_v52, %v2222_v27  ;;  %v2858_v31 = vsel %vm2839_vm0, %v2833_v17, -inf  ;;  %v2105_v33 = vadd.f32 %v6455_v29, %v2057_v15 }
 0x3a8   : > { %2859 = vmax.xlane.f32.xlu1 %v2858_v31  ;;  %v2116_v57 = vadd.f32 %v2104_v63, %v6112_v7  ;;  %v3523_v40 = vpop.eup %3522 }
 0x3a9   : > { %v2774_v23 = vsub.f32 0.0, %v2270_v53  ;;  %v2117_v29 = vadd.f32 %v2105_v33, %v6127_v43 }
 0x3aa   : > { %v2244_v45 = vpop.permute.xlu1 %2243  ;;  %v2198_v28 = vpop.permute.xlu0 %2197  ;;  %v2176_v24 = vadd.f32 %v2150_v44, %v2116_v57 }
 0x3ab   : > { %v2271_v10 = vadd.f32 %v2244_v45, %v2223_v41  ;;  %v6517_v61 = vmul.f32 %v3519_v19, %v2774_v23  ;;  %v2177_v44 = vadd.f32 %v2152_v30, %v2117_v29  ;;  %v7517_v29 = vsub.f32 0.0, %v6430_v60 }
 0x3ac   : > { %v2224_v0 = vadd.f32 %v2198_v28, %v2176_v24 }
 0x3ad   : > { %v2775_v26 = vsub.f32 0.0, %v2271_v10  ;;  %v2834_v2 = vsub.f32 0.0, %v6517_v61 }
 0x3ae   : > { %v2200_v48 = vpop.permute.xlu1 %2199  ;;  %v2154_v39 = vpop.permute.xlu0 %2153 }
 0x3af   : > { %v6522_v59 = vmul.f32 %v3521_v5, %v2775_v26  ;;  %v2861_v21 = vsel %vm2839_vm0, %v2834_v2, -inf  ;;  %v2178_v3 = vadd.f32 %v2154_v39, %v2118_v13  ;;  %v2225_v14 = vadd.f32 %v2200_v48, %v2177_v44 }
 0x3b0   : > { %2862 = vmax.xlane.f32.xlu0 %v2861_v21 }
 0x3b1   : > { %v2835_v32 = vsub.f32 0.0, %v6522_v59  ;;  %v3525_v52 = vpop.eup %3524 }
 0x3b2   : > { %v2202_v7 = vpop.permute.xlu1 %2201  ;;  %v2246_v50 = vpop.permute.xlu0 %2245 }
 0x3b3   : > { %v2864_v46 = vsel %vm2839_vm0, %v2835_v32, -inf  ;;  %v2272_v49 = vadd.f32 %v2246_v50, %v2224_v0  ;;  %v2226_v56 = vadd.f32 %v2202_v7, %v2178_v3  ;;  %v3527_v53 = vpop.eup %3526 }
 0x3b4   : > { %2865 = vmax.xlane.f32.xlu1 %v2864_v46 }
 0x3b5   : > { %v2776_v27 = vsub.f32 0.0, %v2272_v49 }
 0x3b6   : > { %v2250_v20 = vpop.permute.xlu1 %2249  ;;  %v2248_v6 = vpop.permute.xlu0 %2247 }
 0x3b7   : > { %v2274_v47 = vadd.f32 %v2250_v20, %v2226_v56  ;;  %v6533_v58 = vmul.f32 %v3523_v40, %v2776_v27  ;;  %v2273_v43 = vadd.f32 %v2248_v6, %v2225_v14 }
 0x3b9   : > { %v2778_v42 = vsub.f32 0.0, %v2274_v47  ;;  %v2836_v8 = vsub.f32 0.0, %v6533_v58  ;;  %v2777_v11 = vsub.f32 0.0, %v2273_v43 }
 0x3bb   : > { %v6536_v31 = vmul.f32 %v3525_v52, %v2778_v42  ;;  %v6538_v30 = vmul.f32 %v3527_v53, %v2777_v11  ;;  %v2867_v9 = vsel %vm2839_vm0, %v2836_v8, -inf }
 0x3bc   : > { %2868 = vmax.xlane.f32.xlu0 %v2867_v9 }
 0x3bd   : > { %v2838_v16 = vsub.f32 0.0, %v6536_v31  ;;  %v2837_v51 = vsub.f32 0.0, %v6538_v30 }
 0x3bf   : > { %v2873_v41 = vsel %vm2839_vm0, %v2838_v16, -inf  ;;  %v2870_v25 = vsel %vm2839_vm0, %v2837_v51, -inf }
 0x3c0   : > { %2874 = vmax.xlane.f32.xlu0 %v2873_v41  ;;  %2871 = vmax.xlane.f32.xlu1 %v2870_v25 }
 0x3ec   : > { %v6551_v63 = vpop.xlane.xlu0 %2841 }
 0x3ed   : > { %v2876_v23 = vmax.f32 %v6551_v63, -1.0 }
 0x3ef   : > { %v2888_v45 = vsub.f32 %v2827_v4, %v2876_v23 }
 0x3f1   : > { %v6558_v19 = vpop.xlane.xlu1 %2844  ;;  %v2900_v18 = vmul.f32 1.442695, %v2888_v45  ;;  %v6561_v28 = vpop.xlane.xlu0 %2847 }
 0x3f2   : > { %v2877_v10 = vmax.f32 %v6558_v19, -1.0  ;;  %v2878_v15 = vmax.f32 %v6561_v28, -1.0  ;;  %v7525_v19 = vld [vmem:[#allocation55_spill] sm:$0xff] }
 0x3f3   : > { %3528 = vpow2.f32 %v2900_v18 }
 0x3f4   : > { %v2889_v38 = vsub.f32 %v2828_v22, %v2877_v10  ;;  %v2890_v62 = vsub.f32 %v2829_v36, %v2878_v15 }
 0x3f6   : > { %v2902_v4 = vmul.f32 1.442695, %v2889_v38  ;;  %v2904_v26 = vmul.f32 1.442695, %v2890_v62 }
 0x3f8   : > { %3530 = vpow2.f32 %v2902_v4 }
 0x3f9   : > { %3532 = vpow2.f32 %v2904_v26 }
 0x400   : > { %v6572_v5 = vpop.eup %3528 }
 0x401   : > { %v6574_v33 = vpop.xlane.xlu0 %2850  ;;  %v2924_v48 = vsel %vm2839_vm0, %v6572_v5, 0.0 }
 0x402   : > { %v2879_v57 = vmax.f32 %v6574_v33, -1.0  ;;  %2925 = vadd.xlane.f32.xlu1 %v2924_v48  ;;  %v7538_v33 = vld [vmem:[#allocation45_spill] sm:$0xff] }
 0x404   : > { %v2891_v55 = vsub.f32 %v2830_v1, %v2879_v57 }
 0x405   : > { %v6583_v22 = vpop.eup %3530 }
 0x406   : > { %v2906_v12 = vmul.f32 1.442695, %v2891_v55  ;;  %v2927_v36 = vsel %vm2839_vm0, %v6583_v22, 0.0  ;;  %v6587_v39 = vpop.eup %3532 }
 0x407   : > { %2928 = vadd.xlane.f32.xlu0 %v2927_v36  ;;  %v2930_v24 = vsel %vm2839_vm0, %v6587_v39, 0.0  ;;  %v2960_v36 = vsub.f32 -1.0, %v2876_v23  ;;  %v7523_v23 = vld [vmem:[#allocation19_spill] sm:$0xff] }
 0x408   : > { %3534 = vpow2.f32 %v2906_v12  ;;  %2931 = vadd.xlane.f32.xlu1 %v2930_v24 }
 0x409   : > { %v2972_v24 = vmul.f32 1.442695, %v2960_v36 }
 0x415   : > { %v6591_v21 = vpop.eup %3534  ;;  %v6593_v13 = vpop.xlane.xlu1 %2853 }
 0x416   : > { %v2933_v37 = vsel %vm2839_vm0, %v6591_v21, 0.0  ;;  %v2880_v1 = vmax.f32 %v6593_v13, -1.0 }
 0x417   : > { %2934 = vadd.xlane.f32.xlu0 %v2933_v37  ;;  %v2961_v37 = vsub.f32 -1.0, %v2877_v10 }
 0x418   : > { %v2892_v0 = vsub.f32 %v7517_v29, %v2880_v1  ;;  %v7518_v29 = vld [vmem:[#allocation20_spill] sm:$0xff] }
 0x41a   : > { %v2908_v7 = vmul.f32 1.442695, %v2892_v0  ;;  %v7519_v0 = vld [vmem:[#allocation44_spill] sm:$0xff] }
 0x41c   : > { %3536 = vpow2.f32 %v2908_v7  ;;  %v1339_v7 = vadd.f32 %v7519_v0, %v7518_v29  ;;  %v7534_v29 = vld [vmem:[#allocation34_spill] sm:$0xff] }
 0x425   : > { %v6602_v3 = vpop.xlane.xlu0 %2856 }
 0x426   : > { %v2881_v50 = vmax.f32 %v6602_v3, -1.0 }
 0x428   : > { %v2893_v46 = vsub.f32 %v2832_v34, %v2881_v50 }
 0x429   : > { %v6609_v44 = vpop.eup %3536 }
 0x42a   : > { %v2910_v49 = vmul.f32 1.442695, %v2893_v46  ;;  %v2936_v56 = vsel %vm2839_vm0, %v6609_v44, 0.0  ;;  %v2962_v46 = vsub.f32 -1.0, %v2878_v15  ;;  %v7528_v15 = vld [vmem:[#allocation77_spill] sm:$0xff] }
 0x42b   : > { %2937 = vadd.xlane.f32.xlu1 %v2936_v56  ;;  %v7520_v56 = vld [vmem:[#allocation22_spill] sm:$0xff] }
 0x42c   : > { %3538 = vpow2.f32 %v2910_v49  ;;  %v2974_v49 = vmul.f32 1.442695, %v2961_v37  ;;  %v2976_v63 = vmul.f32 1.442695, %v2962_v46  ;;  %v7535_v46 = vld [vmem:[#allocation91_spill] sm:$0xff] }
 0x431   : > { %v6613_v60 = vpop.xlane.xlu1 %2859 }
 0x432   : > { %v2882_v14 = vmax.f32 %v6613_v60, -1.0 }
 0x434   : > { %v2894_v27 = vsub.f32 %v2833_v17, %v2882_v14 }
 0x436   : > { %v2912_v20 = vmul.f32 1.442695, %v2894_v27  ;;  %v7521_v27 = vld [vmem:[#allocation46_spill] sm:$0xff] }
 0x438   : > { %3540 = vpow2.f32 %v2912_v20  ;;  %v1340_v20 = vadd.f32 %v7521_v27, %v7520_v56  ;;  %v7536_v56 = vld [vmem:[#allocation116_spill] sm:$0xff] }
 0x439   : > { %v6620_v54 = vpop.eup %3538  ;;  %v6622_v34 = vpop.xlane.xlu0 %2862 }
 0x43a   : > { %v2883_v40 = vmax.f32 %v6622_v34, -1.0  ;;  %v2939_v47 = vsel %vm2839_vm0, %v6620_v54, 0.0  ;;  %v1388_v10 = vadd.f32 %v7525_v19, %v1340_v20 }
 0x43b   : > { %2940 = vadd.xlane.f32.xlu0 %v2939_v47  ;;  %v7522_v47 = vld [vmem:[#allocation56_spill] sm:$0xff] }
 0x43c   : > { %v2895_v6 = vsub.f32 %v2834_v2, %v2883_v40 }
 0x43d   : > { %v6631_v43 = vpop.xlane.xlu1 %2865 }
 0x43e   : > { %v2884_v35 = vmax.f32 %v6631_v43, -1.0  ;;  %v2914_v17 = vmul.f32 1.442695, %v2895_v6  ;;  %v1387_v6 = vadd.f32 %v7522_v47, %v1339_v7 }
 0x440   : > { %v2896_v42 = vsub.f32 %v2835_v32, %v2884_v35  ;;  %3542 = vpow2.f32 %v2914_v17  ;;  %v7524_v17 = vld [vmem:[#allocation43_spill] sm:$0xff] }
 0x442   : > { %v2916_v52 = vmul.f32 1.442695, %v2896_v42  ;;  %v1341_v42 = vadd.f32 %v7524_v17, %v7523_v23 }
 0x444   : > { %3544 = vpow2.f32 %v2916_v52  ;;  %v7526_v52 = vld [vmem:[#allocation79_spill] sm:$0xff] }
 0x445   : > { %v6638_v11 = vpop.eup %3540  ;;  %v6640_v53 = vpop.xlane.xlu0 %2868 }
 0x446   : > { %v2885_v61 = vmax.f32 %v6640_v53, -1.0  ;;  %v2942_v2 = vsel %vm2839_vm0, %v6638_v11, 0.0 }
 0x447   : > { %2943 = vadd.xlane.f32.xlu1 %v2942_v2  ;;  %v1435_v2 = vadd.f32 %v7526_v52, %v1387_v6  ;;  %v7537_v6 = vld [vmem:[#allocation21_spill] sm:$0xff] }
 0x448   : > { %v2897_v9 = vsub.f32 %v2836_v8, %v2885_v61 }
 0x449   : > { %v6649_v59 = vpop.xlane.xlu1 %2871  ;;  %v6651_v32 = vpop.xlane.xlu0 %2874 }
 0x44a   : > { %v2918_v41 = vmul.f32 1.442695, %v2897_v9  ;;  %v2886_v25 = vmax.f32 %v6649_v59, -1.0  ;;  %v2887_v45 = vmax.f32 %v6651_v32, -1.0  ;;  %v7527_v9 = vld [vmem:[#allocation58_spill] sm:$0xff] }
 0x44b   : > { %v1389_v28 = vadd.f32 %v7527_v9, %v1341_v42  ;;  %v7540_v42 = vld [vmem:[#allocation103_spill] sm:$0xff] }
 0x44c   : > { %3546 = vpow2.f32 %v2918_v41  ;;  %v2898_v18 = vsub.f32 %v2837_v51, %v2886_v25  ;;  %v2899_v58 = vsub.f32 %v2838_v16, %v2887_v45  ;;  %v1436_v41 = vadd.f32 %v7528_v15, %v1388_v10 }
 0x44d   : > { %v6663_v8 = vpop.eup %3542  ;;  %v2970_v53 = vsub.f32 -1.0, %v2886_v25 }
 0x44e   : > { %v2920_v38 = vmul.f32 1.442695, %v2898_v18  ;;  %v2922_v62 = vmul.f32 1.442695, %v2899_v58  ;;  %v2945_v4 = vsel %vm2839_vm0, %v6663_v8, 0.0  ;;  %v7529_v18 = vld [vmem:[#allocation32_spill] sm:$0xff] }
 0x44f   : > { %2946 = vadd.xlane.f32.xlu0 %v2945_v4  ;;  %v1447_v58 = vadd.f32 %v1435_v2, %v7529_v18  ;;  %v2963_v4 = vsub.f32 -1.0, %v2879_v57  ;;  %v1342_v57 = vadd.f32 %v7538_v33, %v7537_v6  ;;  %v7541_v2 = vld [vmem:[#allocation106_spill] sm:$0xff]  ;;  %v7551_v6 = vld [vmem:[#allocation64_spill] sm:$0xff] }
 0x450   : > { %3548 = vpow2.f32 %v2920_v38  ;;  %v7530_v38 = vld [vmem:[#allocation82_spill] sm:$0xff] }
 0x451   : > { %v6667_v26 = vpop.eup %3544  ;;  %3550 = vpow2.f32 %v2922_v62  ;;  %v1437_v62 = vadd.f32 %v7530_v38, %v1389_v28  ;;  %v2978_v7 = vmul.f32 1.442695, %v2963_v4  ;;  %v7542_v28 = vld [vmem:[#allocation115_spill] sm:$0xff]  ;;  %v7544_v38 = vld [vmem:[#allocation57_spill] sm:$0xff] }
 0x452   : > { %v2948_v30 = vsel %vm2839_vm0, %v6667_v26, 0.0  ;;  %3552 = vpow2.f32 %v2972_v24  ;;  %v7533_v24 = vld [vmem:[#allocation104_spill] sm:$0xff] }
 0x453   : > { %2949 = vadd.xlane.f32.xlu1 %v2948_v30  ;;  %3554 = vpow2.f32 %v2974_v49  ;;  %v7531_v30 = vld [vmem:[#allocation92_spill] sm:$0xff]  ;;  %v1449_v0 = vadd.f32 %v1437_v62, %v7534_v29  ;;  %v1390_v62 = vadd.f32 %v7544_v38, %v1342_v57  ;;  %v7547_v29 = vld [vmem:[#allocation59_spill] sm:$0xff] }
 0x454   : > { %3556 = vpow2.f32 %v2976_v63  ;;  %v7539_v63 = vld [vmem:[#allocation94_spill] sm:$0xff]  ;;  %v7552_v57 = vld [vmem:[#allocation168_spill] sm:$0xff] }
 0x455   : > { %v1509_v23 = vadd.f32 %v7539_v63, %v1449_v0  ;;  %3558 = vpow2.f32 %v2978_v7  ;;  %v7548_v7 = vld [vmem:[#allocation148_spill] sm:$0xff] }
 0x457   : > { %v1557_v9 = vadd.f32 %v7541_v2, %v1509_v23  ;;  %v2803_v23 = vld [vmem:[%s6726_s9] sm:$0xff] }
 0x459   : > { %v6671_v51 = vpop.eup %3546 }
 0x45a   : > { %v2951_v31 = vsel %vm2839_vm0, %v6671_v51, 0.0 }
 0x45b   : > { %2952 = vadd.xlane.f32.xlu0 %v2951_v31  ;;  %v1507_v31 = vadd.f32 %v7531_v30, %v1447_v58  ;;  %v7545_v30 = vld [vmem:[#allocation118_spill] sm:$0xff] }
 0x45d   : > { %v6675_v16 = vpop.eup %3548  ;;  %v1555_v37 = vadd.f32 %v7533_v24, %v1507_v31  ;;  %v1605_v31 = vadd.f32 %v7545_v30, %v1557_v9  ;;  %v7556_v9 = vld [vmem:[#allocation152_spill] sm:$0xff] }
 0x45e   : > { %v2954_v48 = vsel %vm2839_vm0, %v6675_v16, 0.0  ;;  %v6679_v55 = vpop.eup %3550  ;;  %v7559_v30 = vld [vmem:[#allocation172_spill] sm:$0xff] }
 0x45f   : > { %2955 = vadd.xlane.f32.xlu1 %v2954_v48  ;;  %v2957_v12 = vsel %vm2839_vm0, %v6679_v55, 0.0  ;;  %v3553_v48 = vpop.eup %3552  ;;  %v1603_v27 = vadd.f32 %v7536_v56, %v1555_v37  ;;  %v7549_v56 = vld [vmem:[#allocation81_spill] sm:$0xff]  ;;  %v1617_v33 = vadd.f32 %v1605_v31, %v7551_v6 }
 0x460   : > { %2958 = vadd.xlane.f32.xlu0 %v2957_v12  ;;  %v7532_v12 = vld [vmem:[#allocation31_spill] sm:$0xff]  ;;  %v2996_v20 = vmul.f32 16.0, %v3553_v48  ;;  %v3555_v47 = vpop.eup %3554  ;;  %v7546_v48 = vld [vmem:[#allocation129_spill] sm:$0xff] }
 0x461   : > { %v1448_v36 = vadd.f32 %v1436_v41, %v7532_v12  ;;  %v3557_v52 = vpop.eup %3556  ;;  %v7543_v41 = vld [vmem:[#allocation60_spill] sm:$0xff]  ;;  %v2997_v58 = vmul.f32 16.0, %v3555_v47 }
 0x462   : > { %v1615_v18 = vadd.f32 %v1603_v27, %v7543_v41  ;;  %v1438_v27 = vadd.f32 %v7549_v56, %v1390_v62  ;;  %v3559_v38 = vpop.eup %3558  ;;  %v7558_v62 = vld [vmem:[#allocation93_spill] sm:$0xff] }
 0x463   : > { %v1508_v49 = vadd.f32 %v7535_v46, %v1448_v36  ;;  %v2998_v36 = vmul.f32 16.0, %v3557_v52  ;;  %v7555_v52 = vld [vmem:[#allocation33_spill] sm:$0xff] }
 0x464   : > { %v1675_v12 = vadd.f32 %v7546_v48, %v1615_v18  ;;  %v1450_v2 = vadd.f32 %v1438_v27, %v7555_v52 }
 0x465   : > { %v1556_v19 = vadd.f32 %v7540_v42, %v1508_v49 }
 0x466   : > { %v1723_v46 = vadd.f32 %v7548_v7, %v1675_v12 }
 0x467   : > { %v1604_v15 = vadd.f32 %v7542_v28, %v1556_v19  ;;  %v7554_v19 = vld [vmem:[#allocation147_spill] sm:$0xff] }
 0x468   : > { %v1771_v63 = vadd.f32 %v7552_v57, %v1723_v46  ;;  %v7561_v46 = vld [vmem:[#allocation117_spill] sm:$0xff] }
 0x469   : > { %v1616_v0 = vadd.f32 %v1604_v15, %v7547_v29  ;;  %v7557_v15 = vld [vmem:[#allocation167_spill] sm:$0xff] }
 0x46a   : > { %v2815_v18 = vsub.f32 %v2803_v23, %v1771_v63  ;;  %v7563_v23 = vld [vmem:[#allocation48_spill] sm:$0xff] }
 0x46c   : > { %v3020_v48 = vmul.f32 %v6572_v5, %v2815_v18  ;;  %v7568_v18 = vld [vmem:[#allocation171_spill] sm:$0xff] }
 0x48b   : > { %v2926_v17 = vpop.xlane.xlu1 %2925 }
 0x48c   : > { %v3008_v10 = vadd.f32 %v2996_v20, %v2926_v17  ;;  %v7550_v20 = vld [vmem:[#allocation128_spill] sm:$0xff]  ;;  %v7553_v17 = vld [vmem:[#allocation133_spill] sm:$0xff] }
 0x48d   : > { %v1676_v47 = vadd.f32 %v7550_v20, %v1616_v0  ;;  %v1677_v42 = vadd.f32 %v7553_v17, %v1617_v33  ;;  %v2999_v20 = vmul.f32 16.0, %v3559_v38  ;;  %v7569_v38 = vld [vmem:[#allocation84_spill] sm:$0xff] }
 0x48e   : > { %3560 = vrcp.f32 %v3008_v10 }
 0x48f   : > { %v1724_v10 = vadd.f32 %v7554_v19, %v1676_v47  ;;  %v1725_v28 = vadd.f32 %v7556_v9, %v1677_v42  ;;  %v7564_v42 = vld [vmem:[#allocation63_spill] sm:$0xff] }
 0x490   : > { %v2929_v4 = vpop.xlane.xlu0 %2928 }
 0x491   : > { %v3009_v24 = vadd.f32 %v2997_v58, %v2929_v4  ;;  %v2932_v37 = vpop.xlane.xlu1 %2931  ;;  %v1772_v41 = vadd.f32 %v7557_v15, %v1724_v10  ;;  %v2804_v58 = vld [vmem:[%s6726_s9 + $0x8] sm:$0xff]  ;;  %v1510_v4 = vadd.f32 %v7558_v62, %v1450_v2  ;;  %v1773_v31 = vadd.f32 %v7559_v30, %v1725_v28 }
 0x492   : > { %v3010_v49 = vadd.f32 %v2998_v36, %v2932_v37  ;;  %v2805_v36 = vld [vmem:[%s6726_s9 + $0x10] sm:$0xff]  ;;  %v7560_v37 = vld [vmem:[#allocation105_spill] sm:$0xff]  ;;  %v7566_v28 = vld [vmem:[#allocation62_spill] sm:$0xff]  ;;  %v2965_v30 = vsub.f32 -1.0, %v2881_v50 }
 0x493   : > { %3562 = vrcp.f32 %v3009_v24  ;;  %v2964_v24 = vsub.f32 -1.0, %v2880_v1  ;;  %v1558_v29 = vadd.f32 %v7560_v37, %v1510_v4  ;;  %v2816_v0 = vsub.f32 %v2804_v58, %v1772_v41  ;;  %v7562_v1 = vld [vmem:[#allocation24_spill] sm:$0xff]  ;;  %v7567_v41 = vld [vmem:[#allocation151_spill] sm:$0xff] }
 0x494   : > { %3564 = vrcp.f32 %v3010_v49  ;;  %v2817_v56 = vsub.f32 %v2805_v36, %v1773_v31  ;;  %v1343_v17 = vadd.f32 %v7563_v23, %v7562_v1  ;;  %v2806_v4 = vld [vmem:[%s6726_s9 + $0x18] sm:$0xff]  ;;  %v2966_v23 = vsub.f32 -1.0, %v2882_v14 }
 0x495   : > { %v1606_v49 = vadd.f32 %v7561_v46, %v1558_v29  ;;  %v3021_v27 = vmul.f32 %v6583_v22, %v2816_v0  ;;  %v2980_v6 = vmul.f32 1.442695, %v2964_v24  ;;  %v7565_v22 = vld [vmem:[#allocation131_spill] sm:$0xff]  ;;  %v7571_v37 = vld [vmem:[#allocation96_spill] sm:$0xff]  ;;  %v2982_v0 = vmul.f32 1.442695, %v2965_v30 }
 0x496   : > { %v3022_v5 = vmul.f32 %v6587_v39, %v2817_v56  ;;  %v1391_v15 = vadd.f32 %v7566_v28, %v1343_v17  ;;  %v7573_v56 = vld [vmem:[#allocation47_spill] sm:$0xff]  ;;  %v7582_v28 = vld [vmem:[#allocation50_spill] sm:$0xff]  ;;  %v2967_v14 = vsub.f32 -1.0, %v2883_v40 }
 0x497   : > { %v1618_v19 = vadd.f32 %v1606_v49, %v7564_v42  ;;  %v7572_v49 = vld [vmem:[#allocation23_spill] sm:$0xff]  ;;  %v7586_v30 = vld [vmem:[#allocation66_spill] sm:$0xff] }
 0x498   : > { %v1439_v62 = vadd.f32 %v7569_v38, %v1391_v15  ;;  %v7578_v17 = vld [vmem:[#allocation83_spill] sm:$0xff]  ;;  %v2807_v38 = vld [vmem:[%s6726_s9 + $0x20] sm:$0xff] }
 0x499   : > { %v1678_v2 = vadd.f32 %v7565_v22, %v1618_v19  ;;  %v7579_v19 = vld [vmem:[#allocation136_spill] sm:$0xff] }
 0x49b   : > { %v3561_v12 = vpop.eup %3560  ;;  %v1726_v39 = vadd.f32 %v7567_v41, %v1678_v2  ;;  %v2984_v2 = vmul.f32 1.442695, %v2966_v23  ;;  %v7583_v41 = vld [vmem:[#allocation35_spill] sm:$0xff] }
 0x49c   : > { %v3033_v7 = vmul.f32 %v3561_v12, %v3020_v48  ;;  %v7570_v48 = vld [vmem:[#allocation36_spill] sm:$0xff] }
 0x49d   : > { %v1774_v58 = vadd.f32 %v7568_v18, %v1726_v39  ;;  %v1451_v12 = vadd.f32 %v1439_v62, %v7570_v48  ;;  %v7584_v18 = vld [vmem:[#allocation174_spill] sm:$0xff]  ;;  %v7585_v62 = vld [vmem:[#allocation95_spill] sm:$0xff] }
 0x49e   : > { %v7587_v48 = vld [vmem:[#allocation107_spill] sm:$0xff] }
 0x49f   : > { %v2818_v31 = vsub.f32 %v2806_v4, %v1774_v58  ;;  %v1511_v29 = vadd.f32 %v7571_v37, %v1451_v12  ;;  %v7588_v37 = vld [vmem:[#allocation119_spill] sm:$0xff] }
 0x4a0   : > { %v3563_v47 = vpop.eup %3562  ;;  %v2935_v33 = vpop.xlane.xlu0 %2934 }
 0x4a1   : > { %v3035_v57 = vmul.f32 %v3563_v47, %v3021_v27  ;;  %v3011_v63 = vadd.f32 %v2999_v20, %v2935_v33  ;;  %v3565_v13 = vpop.eup %3564  ;;  %v3023_v36 = vmul.f32 %v6591_v21, %v2818_v31  ;;  %v1344_v27 = vadd.f32 %v7573_v56, %v7572_v49  ;;  %v7574_v20 = vld [vmem:[#allocation108_spill] sm:$0xff] }
 0x4a2   : > { %v3037_v10 = vmul.f32 %v3565_v13, %v3022_v5  ;;  %v1559_v47 = vadd.f32 %v7574_v20, %v1511_v29  ;;  %v7575_v33 = vld [vmem:[#allocation120_spill] sm:$0xff]  ;;  %v2986_v49 = vmul.f32 1.442695, %v2967_v14 }
 0x4a3   : > { %v3056_v52 = vadd.f32 %v3035_v57, %v3033_v7  ;;  %3566 = vrcp.f32 %v3011_v63  ;;  %v7576_v57 = vld [vmem:[#allocation61_spill] sm:$0xff]  ;;  %v7577_v13 = vld [vmem:[#allocation68_spill] sm:$0xff] }
 0x4a4   : > { %3568 = vpow2.f32 %v2980_v6  ;;  %v1607_v3 = vadd.f32 %v7575_v33, %v1559_v47  ;;  %v1392_v21 = vadd.f32 %v7576_v57, %v1344_v27  ;;  %v7589_v27 = vld [vmem:[#allocation86_spill] sm:$0xff]  ;;  %v7590_v47 = vld [vmem:[#allocation25_spill] sm:$0xff] }
 0x4a5   : > { %v3057_v9 = vadd.f32 %v3056_v52, %v3037_v10  ;;  %3570 = vpow2.f32 %v2982_v0  ;;  %v7580_v52 = vld [vmem:[#allocation155_spill] sm:$0xff]  ;;  %v7591_v33 = vld [vmem:[#allocation49_spill] sm:$0xff] }
 0x4a6   : > { %v1619_v1 = vadd.f32 %v1607_v3, %v7577_v13  ;;  %v1440_v42 = vadd.f32 %v7578_v17, %v1392_v21  ;;  %v1346_v3 = vadd.f32 %v7591_v33, %v7590_v47  ;;  %v7594_v21 = vld [vmem:[#allocation52_spill] sm:$0xff]  ;;  %v7597_v17 = vld [vmem:[#allocation65_spill] sm:$0xff] }
 0x4a7   : > { %v7612_v47 = vld [vmem:[#allocation97_spill] sm:$0xff] }
 0x4a8   : > { %v1679_v10 = vadd.f32 %v7579_v19, %v1619_v1  ;;  %v1452_v39 = vadd.f32 %v1440_v42, %v7583_v41  ;;  %v7596_v1 = vld [vmem:[#allocation135_spill] sm:$0xff]  ;;  %v1394_v42 = vadd.f32 %v7597_v17, %v1346_v3  ;;  %v2969_v19 = vsub.f32 -1.0, %v2885_v61  ;;  %v7613_v3 = vld [vmem:[#allocation40_spill] sm:$0xff]  ;;  %v7619_v17 = vld [vmem:[#allocation109_spill] sm:$0xff] }
 0x4aa   : > { %v1727_v22 = vadd.f32 %v7580_v52, %v1679_v10  ;;  %v1512_v4 = vadd.f32 %v7585_v62, %v1452_v39  ;;  %v7598_v10 = vld [vmem:[#allocation98_spill] sm:$0xff]  ;;  %v7602_v39 = vld [vmem:[#allocation173_spill] sm:$0xff] }
 0x4ab   : > { %v2808_v62 = vld [vmem:[%s6726_s9 + $0x28] sm:$0xff] }
 0x4ac   : > { %v1775_v58 = vadd.f32 %v7584_v18, %v1727_v22  ;;  %v1560_v12 = vadd.f32 %v7587_v48, %v1512_v4  ;;  %v7599_v22 = vld [vmem:[#allocation154_spill] sm:$0xff]  ;;  %v2990_v4 = vmul.f32 1.442695, %v2969_v19 }
 0x4ae   : > { %v1608_v29 = vadd.f32 %v7588_v37, %v1560_v12  ;;  %v7606_v12 = vld [vmem:[#allocation27_spill] sm:$0xff] }
 0x4b0   : > { %v3567_v24 = vpop.eup %3566 }
 0x4b1   : > { %v3569_v7 = vpop.eup %3568  ;;  %v3039_v46 = vmul.f32 %v3567_v24, %v3023_v36  ;;  %v2819_v36 = vsub.f32 %v2807_v38, %v1775_v58  ;;  %v2968_v24 = vsub.f32 -1.0, %v2884_v35  ;;  %v7593_v35 = vld [vmem:[#allocation28_spill] sm:$0xff]  ;;  %v7603_v58 = vld [vmem:[#allocation85_spill] sm:$0xff] }
 0x4b2   : > { %v3000_v50 = vmul.f32 16.0, %v3569_v7  ;;  %v3571_v60 = vpop.eup %3570  ;;  %v1442_v38 = vadd.f32 %v7603_v58, %v1394_v42 }
 0x4b3   : > { %v3058_v6 = vadd.f32 %v3057_v9, %v3039_v46  ;;  %v7581_v9 = vld [vmem:[#allocation26_spill] sm:$0xff]  ;;  %v3024_v0 = vmul.f32 %v6609_v44, %v2819_v36  ;;  %v3001_v7 = vmul.f32 16.0, %v3571_v60  ;;  %v1347_v44 = vadd.f32 %v7594_v21, %v7593_v35  ;;  %v7607_v36 = vld [vmem:[#allocation51_spill] sm:$0xff] }
 0x4b4   : > { %v2938_v5 = vpop.xlane.xlu1 %2937  ;;  %v1345_v15 = vadd.f32 %v7582_v28, %v7581_v9  ;;  %v7600_v9 = vld [vmem:[#allocation70_spill] sm:$0xff] }
 0x4b5   : > { %v3012_v63 = vadd.f32 %v3000_v50, %v2938_v5  ;;  %v2988_v50 = vmul.f32 1.442695, %v2968_v24  ;;  %v7592_v5 = vld [vmem:[#allocation67_spill] sm:$0xff]  ;;  %v1395_v28 = vadd.f32 %v7600_v9, %v1347_v44  ;;  %v7604_v60 = vld [vmem:[#allocation122_spill] sm:$0xff]  ;;  %v1348_v24 = vadd.f32 %v7607_v36, %v7606_v12  ;;  %v7622_v9 = vld [vmem:[#allocation121_spill] sm:$0xff] }
 0x4b6   : > { %v1393_v31 = vadd.f32 %v7586_v30, %v1345_v15  ;;  %v1620_v57 = vadd.f32 %v1608_v29, %v7592_v5  ;;  %v7601_v15 = vld [vmem:[#allocation110_spill] sm:$0xff]  ;;  %v7605_v30 = vld [vmem:[#allocation88_spill] sm:$0xff]  ;;  %v2971_v29 = vsub.f32 -1.0, %v2887_v45  ;;  %v7614_v45 = vld [vmem:[#allocation69_spill] sm:$0xff] }
 0x4b7   : > { %3572 = vrcp.f32 %v3012_v63  ;;  %v7595_v63 = vld [vmem:[#allocation38_spill] sm:$0xff]  ;;  %v1396_v5 = vadd.f32 %v7614_v45, %v1348_v24  ;;  %v7628_v12 = vld [vmem:[#allocation71_spill] sm:$0xff]  ;;  %v7636_v45 = vld [vmem:[#allocation156_spill] sm:$0xff] }
 0x4b8   : > { %3574 = vpow2.f32 %v2984_v2  ;;  %v1441_v20 = vadd.f32 %v7589_v27, %v1393_v31  ;;  %v1680_v23 = vadd.f32 %v7596_v1, %v1620_v57  ;;  %v1443_v31 = vadd.f32 %v7605_v30, %v1395_v28  ;;  %v7615_v57 = vld [vmem:[#allocation139_spill] sm:$0xff] }
 0x4b9   : > { %v2992_v27 = vmul.f32 1.442695, %v2970_v53  ;;  %v2994_v21 = vmul.f32 1.442695, %v2971_v29  ;;  %v7627_v53 = vld [vmem:[#allocation124_spill] sm:$0xff]  ;;  %v2809_v30 = vld [vmem:[%s6726_s9 + $0x30] sm:$0xff] }
 0x4ba   : > { %v1453_v13 = vadd.f32 %v1441_v20, %v7595_v63  ;;  %v7610_v20 = vld [vmem:[#allocation30_spill] sm:$0xff]  ;;  %v7616_v63 = vld [vmem:[#allocation29_spill] sm:$0xff] }
 0x4bc   : > { %v1513_v52 = vadd.f32 %v7598_v10, %v1453_v13  ;;  %v7617_v13 = vld [vmem:[#allocation53_spill] sm:$0xff] }
 0x4bd   : > { %v1350_v1 = vadd.f32 %v7617_v13, %v7616_v63  ;;  %v7620_v10 = vld [vmem:[#allocation157_spill] sm:$0xff] }
 0x4be   : > { %v1561_v41 = vadd.f32 %v7601_v15, %v1513_v52  ;;  %v7639_v13 = vld [vmem:[#allocation41_spill] sm:$0xff] }
 0x4c0   : > { %v1609_v14 = vadd.f32 %v7604_v60, %v1561_v41  ;;  %v7623_v41 = vld [vmem:[#allocation74_spill] sm:$0xff]  ;;  %v7626_v60 = vld [vmem:[#allocation73_spill] sm:$0xff] }
 0x4c4   : > { %v3573_v46 = vpop.eup %3572  ;;  %v2941_v56 = vpop.xlane.xlu0 %2940 }
 0x4c5   : > { %v3041_v34 = vmul.f32 %v3573_v46, %v3024_v0  ;;  %v3013_v40 = vadd.f32 %v3001_v7, %v2941_v56  ;;  %v3575_v2 = vpop.eup %3574  ;;  %v7608_v7 = vld [vmem:[#allocation37_spill] sm:$0xff] }
 0x4c6   : > { %v3002_v61 = vmul.f32 16.0, %v3575_v2  ;;  %v1454_v46 = vadd.f32 %v1442_v38, %v7608_v7  ;;  %v7625_v38 = vld [vmem:[#allocation177_spill] sm:$0xff] }
 0x4c7   : > { %v3059_v43 = vadd.f32 %v3058_v6, %v3041_v34  ;;  %3576 = vrcp.f32 %v3013_v40  ;;  %v1728_v6 = vadd.f32 %v7599_v22, %v1680_v23  ;;  %v7611_v34 = vld [vmem:[#allocation54_spill] sm:$0xff] }
 0x4c8   : > { %3578 = vpow2.f32 %v2986_v49  ;;  %v7609_v49 = vld [vmem:[#allocation72_spill] sm:$0xff]  ;;  %v1349_v40 = vadd.f32 %v7611_v34, %v7610_v20  ;;  %v1514_v33 = vadd.f32 %v7612_v47, %v1454_v46 }
 0x4c9   : > { %3580 = vpow2.f32 %v2988_v50  ;;  %v1776_v18 = vadd.f32 %v7602_v39, %v1728_v6  ;;  %v1621_v56 = vadd.f32 %v1609_v14, %v7609_v49  ;;  %v1455_v50 = vadd.f32 %v1443_v31, %v7613_v3  ;;  %v7621_v6 = vld [vmem:[#allocation112_spill] sm:$0xff]  ;;  %v7631_v49 = vld [vmem:[#allocation89_spill] sm:$0xff] }
 0x4ca   : > { %3582 = vpow2.f32 %v2990_v4  ;;  %v1562_v42 = vadd.f32 %v7619_v17, %v1514_v33  ;;  %v1397_v39 = vadd.f32 %v7623_v41, %v1349_v40  ;;  %v1398_v14 = vadd.f32 %v7626_v60, %v1350_v1  ;;  %v7634_v40 = vld [vmem:[#allocation99_spill] sm:$0xff] }
 0x4cb   : > { %v2820_v37 = vsub.f32 %v2808_v62, %v1776_v18  ;;  %v1681_v35 = vadd.f32 %v7615_v57, %v1621_v56  ;;  %v7624_v18 = vld [vmem:[#allocation87_spill] sm:$0xff]  ;;  %v7637_v57 = vld [vmem:[#allocation42_spill] sm:$0xff] }
 0x4cc   : > { %v1610_v28 = vadd.f32 %v7622_v9, %v1562_v42  ;;  %v1444_v58 = vadd.f32 %v7624_v18, %v1396_v5  ;;  %v1446_v56 = vadd.f32 %v7631_v49, %v1398_v14  ;;  %v7641_v17 = vld [vmem:[#allocation175_spill] sm:$0xff] }
 0x4cd   : > { %v3025_v59 = vmul.f32 %v6620_v54, %v2820_v37  ;;  %v7618_v54 = vld [vmem:[#allocation100_spill] sm:$0xff]  ;;  %v1729_v52 = vadd.f32 %v7620_v10, %v1681_v35  ;;  %v7629_v37 = vld [vmem:[#allocation90_spill] sm:$0xff] }
 0x4ce   : > { %v1515_v23 = vadd.f32 %v7618_v54, %v1455_v50  ;;  %v1622_v36 = vadd.f32 %v1610_v28, %v7628_v12  ;;  %v1445_v29 = vadd.f32 %v7629_v37, %v1397_v39  ;;  %v7635_v50 = vld [vmem:[#allocation142_spill] sm:$0xff]  ;;  %v1458_v1 = vadd.f32 %v1446_v56, %v7639_v13  ;;  %v7640_v54 = vld [vmem:[#allocation163_spill] sm:$0xff]  ;;  %v7657_v13 = vld [vmem:[#allocation145_spill] sm:$0xff] }
 0x4cf   : > { %v1777_v62 = vadd.f32 %v7625_v38, %v1729_v52  ;;  %v7645_v39 = vld [vmem:[#allocation179_spill] sm:$0xff]  ;;  %v7646_v38 = vld [vmem:[#allocation114_spill] sm:$0xff] }
 0x4d0   : > { %v2944_v48 = vpop.xlane.xlu1 %2943  ;;  %v1563_v2 = vadd.f32 %v7621_v6, %v1515_v23  ;;  %v1457_v35 = vadd.f32 %v1445_v29, %v7637_v57  ;;  %v2810_v6 = vld [vmem:[%s6726_s9 + $0x38] sm:$0xff]  ;;  %v7655_v57 = vld [vmem:[#allocation146_spill] sm:$0xff] }
 0x4d1   : > { %v3014_v0 = vadd.f32 %v3002_v61, %v2944_v48  ;;  %v2821_v46 = vsub.f32 %v2809_v30, %v1777_v62 }
 0x4d2   : > { %v1611_v61 = vadd.f32 %v7627_v53, %v1563_v2  ;;  %v7647_v53 = vld [vmem:[#allocation113_spill] sm:$0xff] }
 0x4d3   : > { %3584 = vrcp.f32 %v3014_v0  ;;  %v7630_v0 = vld [vmem:[#allocation39_spill] sm:$0xff]  ;;  %v3026_v33 = vmul.f32 %v6638_v11, %v2821_v46  ;;  %v7651_v46 = vld [vmem:[#allocation140_spill] sm:$0xff] }
 0x4d4   : > { %v3577_v25 = vpop.eup %3576  ;;  %3586 = vpow2.f32 %v2992_v27  ;;  %v1456_v7 = vadd.f32 %v1444_v58, %v7630_v0  ;;  %v7632_v27 = vld [vmem:[#allocation138_spill] sm:$0xff]  ;;  %v7643_v11 = vld [vmem:[#allocation123_spill] sm:$0xff]  ;;  %v7650_v0 = vld [vmem:[#allocation125_spill] sm:$0xff] }
 0x4d5   : > { %v3579_v32 = vpop.eup %3578  ;;  %v3043_v44 = vmul.f32 %v3577_v25, %v3025_v59  ;;  %3588 = vpow2.f32 %v2994_v21  ;;  %v1682_v59 = vadd.f32 %v7632_v27, %v1622_v36  ;;  %v7633_v25 = vld [vmem:[#allocation76_spill] sm:$0xff]  ;;  %v7638_v21 = vld [vmem:[#allocation111_spill] sm:$0xff] }
 0x4d6   : > { %v3581_v19 = vpop.eup %3580  ;;  %v3003_v15 = vmul.f32 16.0, %v3579_v32  ;;  %v1623_v20 = vadd.f32 %v1611_v61, %v7633_v25  ;;  %v1516_v47 = vadd.f32 %v7634_v40, %v1456_v7  ;;  %v7652_v40 = vld [vmem:[#allocation80_spill] sm:$0xff] }
 0x4d7   : > { %v3060_v22 = vadd.f32 %v3059_v43, %v3043_v44  ;;  %v3004_v43 = vmul.f32 16.0, %v3581_v19  ;;  %v3583_v34 = vpop.eup %3582  ;;  %v1730_v5 = vadd.f32 %v7636_v45, %v1682_v59  ;;  %v7642_v19 = vld [vmem:[#allocation102_spill] sm:$0xff] }
 0x4d8   : > { %v2947_v4 = vpop.xlane.xlu0 %2946  ;;  %v1683_v32 = vadd.f32 %v7635_v50, %v1623_v20  ;;  %v1564_v44 = vadd.f32 %v7638_v21, %v1516_v47  ;;  %v1517_v10 = vadd.f32 %v7642_v19, %v1457_v35  ;;  %v3005_v2 = vmul.f32 16.0, %v3583_v34  ;;  %v7654_v45 = vld [vmem:[#allocation78_spill] sm:$0xff] }
 0x4d9   : > { %v3015_v31 = vadd.f32 %v3003_v15, %v2947_v4  ;;  %v1778_v42 = vadd.f32 %v7641_v17, %v1730_v5  ;;  %v7644_v15 = vld [vmem:[#allocation101_spill] sm:$0xff]  ;;  %v7656_v21 = vld [vmem:[#allocation178_spill] sm:$0xff]  ;;  %v7659_v17 = vld [vmem:[#allocation164_spill] sm:$0xff] }
 0x4da   : > { %v1731_v23 = vadd.f32 %v7640_v54, %v1683_v32  ;;  %v1612_v52 = vadd.f32 %v7643_v11, %v1564_v44  ;;  %v1518_v41 = vadd.f32 %v7644_v15, %v1458_v1  ;;  %v1565_v62 = vadd.f32 %v7646_v38, %v1517_v10  ;;  %v2811_v4 = vld [vmem:[%s6726_s9 + $0x40] sm:$0xff]  ;;  %v7660_v10 = vld [vmem:[#allocation183_spill] sm:$0xff]  ;;  %v2814_v15 = vld [vmem:[%s6726_s9 + $0x58] sm:$0xff] }
 0x4db   : > { %3590 = vrcp.f32 %v3015_v31  ;;  %v2822_v30 = vsub.f32 %v2810_v6, %v1778_v42  ;;  %v7648_v31 = vld [vmem:[#allocation126_spill] sm:$0xff]  ;;  %v7658_v54 = vld [vmem:[#allocation165_spill] sm:$0xff] }
 0x4dc   : > { %v2950_v48 = vpop.xlane.xlu1 %2949  ;;  %v1779_v18 = vadd.f32 %v7645_v39, %v1731_v23  ;;  %v1566_v61 = vadd.f32 %v7647_v53, %v1518_v41  ;;  %v7661_v6 = vld [vmem:[#allocation182_spill] sm:$0xff] }
 0x4dd   : > { %v3016_v24 = vadd.f32 %v3004_v43, %v2950_v48  ;;  %v1613_v43 = vadd.f32 %v7648_v31, %v1565_v62  ;;  %v7649_v48 = vld [vmem:[#allocation75_spill] sm:$0xff]  ;;  %v3027_v37 = vmul.f32 %v6663_v8, %v2822_v30 }
 0x4de   : > { %v1624_v12 = vadd.f32 %v1612_v52, %v7649_v48  ;;  %v2823_v36 = vsub.f32 %v2811_v4, %v1779_v18  ;;  %v1614_v7 = vadd.f32 %v7650_v0, %v1566_v61  ;;  %v2813_v52 = vld [vmem:[%s6726_s9 + $0x50] sm:$0xff] }
 0x4df   : > { %3592 = vrcp.f32 %v3016_v24  ;;  %v1625_v47 = vadd.f32 %v1613_v43, %v7652_v40 }
 0x4e0   : > { %v3585_v3 = vpop.eup %3584  ;;  %v1684_v49 = vadd.f32 %v7651_v46, %v1624_v12  ;;  %v3028_v25 = vmul.f32 %v6667_v26, %v2823_v36  ;;  %v1626_v5 = vadd.f32 %v1614_v7, %v7654_v45  ;;  %v2812_v26 = vld [vmem:[%s6726_s9 + $0x48] sm:$0xff] }
 0x4e1   : > { %v3045_v63 = vmul.f32 %v3585_v3, %v3026_v33  ;;  %v3587_v28 = vpop.eup %3586  ;;  %v7653_v33 = vld [vmem:[#allocation161_spill] sm:$0xff]  ;;  %v1685_v35 = vadd.f32 %v7655_v57, %v1625_v47 }
 0x4e2   : > { %v3589_v14 = vpop.eup %3588  ;;  %v1732_v3 = vadd.f32 %v7653_v33, %v1684_v49  ;;  %v1686_v1 = vadd.f32 %v7657_v13, %v1626_v5 }
 0x4e3   : > { %v3061_v9 = vadd.f32 %v3060_v22, %v3045_v63  ;;  %v3006_v22 = vmul.f32 16.0, %v3587_v28  ;;  %v3007_v27 = vmul.f32 16.0, %v3589_v14  ;;  %v1733_v23 = vadd.f32 %v7658_v54, %v1685_v35 }
 0x4e4   : > { %v2953_v58 = vpop.xlane.xlu0 %2952  ;;  %v1780_v44 = vadd.f32 %v7656_v21, %v1732_v3  ;;  %v1734_v42 = vadd.f32 %v7659_v17, %v1686_v1 }
 0x4e5   : > { %v3017_v60 = vadd.f32 %v3005_v2, %v2953_v58  ;;  %v1781_v11 = vadd.f32 %v7660_v10, %v1733_v23 }
 0x4e6   : > { %v2824_v19 = vsub.f32 %v2812_v26, %v1780_v44  ;;  %v1782_v2 = vadd.f32 %v7661_v6, %v1734_v42 }
 0x4e7   : > { %3594 = vrcp.f32 %v3017_v60  ;;  %v2825_v41 = vsub.f32 %v2813_v52, %v1781_v11 }
 0x4e8   : > { %v2956_v24 = vpop.xlane.xlu1 %2955  ;;  %v3591_v29 = vpop.eup %3590  ;;  %v2826_v18 = vsub.f32 %v2814_v15, %v1782_v2 }
 0x4e9   : > { %v3018_v56 = vadd.f32 %v3006_v22, %v2956_v24  ;;  %v2959_v59 = vpop.xlane.xlu0 %2958  ;;  %v3047_v20 = vmul.f32 %v3591_v29, %v3027_v37  ;;  %v3030_v58 = vmul.f32 %v6675_v16, %v2825_v41 }
 0x4ea   : > { %v3019_v8 = vadd.f32 %v3007_v27, %v2959_v59  ;;  %v3031_v4 = vmul.f32 %v6679_v55, %v2826_v18 }
 0x4eb   : > { %3596 = vrcp.f32 %v3018_v56  ;;  %v3062_v32 = vadd.f32 %v3061_v9, %v3047_v20  ;;  %v3029_v9 = vmul.f32 %v6671_v51, %v2824_v19 }
 0x4ec   : > { %v3593_v34 = vpop.eup %3592  ;;  %3598 = vrcp.f32 %v3019_v8 }
 0x4ed   : > { %v3049_v50 = vmul.f32 %v3593_v34, %v3028_v25 }
 0x4ef   : > { %v3063_v63 = vadd.f32 %v3062_v32, %v3049_v50 }
 0x4f4   : > { %v3595_v28 = vpop.eup %3594 }
 0x4f5   : > { %v3051_v39 = vmul.f32 %v3595_v28, %v3029_v9 }
 0x4f7   : > { %v3064_v38 = vadd.f32 %v3063_v63, %v3051_v39 }
 0x4f8   : > { %v3597_v62 = vpop.eup %3596 }
 0x4f9   : > { %v3053_v60 = vmul.f32 %v3597_v62, %v3030_v58  ;;  %v3599_v14 = vpop.eup %3598 }
 0x4fa   : > { %v3055_v53 = vmul.f32 %v3599_v14, %v3031_v4 }
 0x4fb   : > { %v3065_v61 = vadd.f32 %v3064_v38, %v3053_v60 }
 0x4fd   : > { %v3066_v30 = vadd.f32 %v3065_v61, %v3055_v53 }
 0x4ff   : > { %v3067_v51 = vsel %vm2839_vm0, %v3066_v30, 0.0 }
 0x500   : > { %3068 = vadd.xlane.f32.xlu1 %v3067_v51 }
 0x589   : > { %v3069_v31 = vpop.xlane.xlu1 %3068 }
 0x58a   : > { %v3238_v43 = vmul.f32 -0.083333336, %v3069_v31 }
 0x58c   : > { %v3072_v48 = vmul.f32 1.442695, %v3238_v43 }
 0x58e   : > { %3600 = vpow2.f32 %v3072_v48 }
 0x59b   : > { %v3601_v16 = vpop.eup %3600 }
 0x59c   : > { %v3074_v12 = vadd.f32 1.0, %v3601_v16 }
 0x59e   : > { %3602 = vrcp.f32 %v3074_v12 }
 0x5ab   : > { %v3603_v55 = vpop.eup %3602 }
 0x5ac   : > { %3077 = vst [vmem:[%s380_s29] sm:$0xff] %v3603_v55 }
 0x5ad   : > { %3737 = shalt.err (!%p3734_p9)
}
 0x5ae   : > { %s3738_s16 = scalar_lea.hbm %s6887_s15, 128  ;;  %s3742_s23 = scalar_lea.hbm %s6930_s6, 256 }
 0x5af   : > { %p3739_p10 = scmp.ne.s32.totalorder %s6887_s15, %s3738_s16  ;;  %p3743_p6 = scmp.lt.s32.totalorder %s6887_s15, %s6930_s6 }
 0x5b0   : > { %p3744_p4 = scmp.lt.s32.totalorder %s3742_s23, %s3738_s16 }
 0x5b1   : > { %p3740_p8 = pnand %p3739_p10, %p7662_p1 }
 0x5b2   : > { %p3745_p3 = por %p3744_p4, %p3743_p6 }
 0x5b3   : > { %p3741_p11 = pneg %p3740_p8 }
 0x5b5   : > { %p3746_p12 = pnand %p3745_p3, %p3741_p11 }
 0x5b7   : > { %3749 = shalt.err (!%p3746_p12)
}
 0x5b8   : > { %3438 = dma.vmem_to_hbm [thread:$0]  (%p7662_p1), %s3093_s11, 128, %s6887_s15, %s3079_s27  }
 0x5b9 PF: > { %s7663_s1 = sld [smem:[#allocation16_spill]]  ;;  %s3104_s30 = sand.u32 1, %s3784_s21  }
 0x5ba   : > { %p7664_p13 = scmp.ne.s32.totalorder %s7046_s14, 0  ;;  %s3105_s9 = scalar_lea.sflag [#allocation4], %s3104_s30 }
 0x5bf   : > { %p7665_p2 = scmp.ge.s32.totalorder %s7663_s1, 2 }
 0x5c1   : > { %p3455_p7 = pnand %p7665_p2, %p7664_p13 }
 0x5c3   : > { %p3456_p0 = pneg %p3455_p7 }
 0x5c5   : > { %3779 = dma.done.wait (%p3456_p0), %s3105_s9, 128  }
 0x5c6   : > { %3781 = vsyncadd (%p3456_p0), %s3105_s9, 4294967168  ;;  %s7666_s24 = sld [smem:[#allocation17_spill]]  ;;  %s7669_s21 = smov %s3788_s22 }
 0x5c7   : > { %s7667_s18 = sld [smem:[#allocation15_spill]] }
 0x5c8   : > { %s7668_s23 = sld [smem:[#allocation18_spill]] }
 0x5cc   : > { %p23_p5 = scmp.ge.s32.totalorder %s7666_s24, 4  }
 0x5cd   : > { %s7670_s22 = smov %s7667_s18 }
 0x5ce   :  { %25 = sbr.rel (!%p23_p5) target bundleno = 10 (0xa), region = 120 }
 0x5d3   :  { %3110 = vsyncpa [#allocation3], 1 }
 0x5d4   :  { %3112 = vsyncpa [#allocation3 + $0x1], 1 }
 0x5d5   :  { %3113 = vsyncpa [#allocation6], 1 }
 0x5d6   :  { %3115 = vsyncpa [#allocation6 + $0x1], 1 }
 0x5d7   :  { %3116 = vsyncpa [#allocation9], 1 }
 0x5d8   :  { %3117 = vsyncpa [#allocation4], 1 }
 0x5d9   :  { %3119 = vsyncpa [#allocation4 + $0x1], 1 }

</bundles_post_ra>
